<compile_context>
chip_gen: v7x
topology: tpu7x:2x2x1
jax: 0.10.0
libtpu: 0.0.40
codegen_flags: <defaults>
</compile_context>

<pallas_src>
import jax
import jax.numpy as jnp
from jax.experimental import pallas as pl
from jax.experimental.pallas import tpu as pltpu

_LANE = 128
_SUBLANE = 8
_TILE_BYTES = 4 << 20            # ~4 MiB input tile (x2 double-buffer, x2 in+out)
_VMEM_LIMIT_BYTES = 32 << 20     # explicit: safe on v5e default (16 MiB) and v7x (64 MiB phys)
_MIN_PALLAS_ELEMS = 64 * 1024    # below this, plain XLA multiply is cheaper than a launch
_COL_CANDIDATES = (8192, 4096, 2048, 1024, 512, 256, 128)  # lane-dense widths


def _mul_kernel(scale_ref, x_ref, o_ref):
    # scale_ref is a (1,) f32 scalar in SMEM; broadcast-multiply over the tile.
    o_ref[...] = (x_ref[...] * scale_ref[0]).astype(o_ref.dtype)


def _choose_cols(n: int) -> int | None:
    """Largest lane-dense width (multiple of 128) that exactly divides n."""
    for c in _COL_CANDIDATES:
        if n % c == 0:
            return c
    return None


def _choose_tile_rows(rows: int, cols: int, itemsize: int) -> int:
    """~_TILE_BYTES per tile, multiple of 8 sublanes, never more than rows."""
    target = (_TILE_BYTES // (cols * itemsize)) // _SUBLANE * _SUBLANE
    target = max(_SUBLANE, target)
    if target >= rows:
        return rows          # single tile: block equals full dim (always legal)
    return target            # multiple of 8, partial last tile handled by cdiv grid


def _grid_semantics():
    """Use CORE_PARALLEL on v7x (2 TCs / chip) so both cores stream HBM."""
    try:
        kind = jax.devices()[0].device_kind.lower()
    except Exception:  # pragma: no cover - defensive
        kind = ""
    if "v7" in kind and hasattr(pltpu, "CORE_PARALLEL"):
        return (pltpu.CORE_PARALLEL,)
    return (pltpu.PARALLEL,)


def mul(x: jax.Array, scale: float) -> jax.Array:
    """Elementwise x * scale; hot path inside a Pallas kernel."""
    orig_shape = x.shape
    dtype = x.dtype
    n = x.size

    # Non-float dtypes: match x * python_float promotion semantics directly.
    if not jnp.issubdtype(dtype, jnp.floating):
        return x * scale

    # Fast path: tiny tensors — launch overhead dwarfs the op, let XLA fuse it.
    if n < _MIN_PALLAS_ELEMS:
        return x * scale

    cols = _choose_cols(n)
    if cols is None:
        # Rare: large n not divisible by 128. Padding would add a full extra
        # HBM pass; plain XLA elementwise is already at roofline here.
        return x * scale

    rows = n // cols
    itemsize = jnp.dtype(dtype).itemsize
    tile_rows = _choose_tile_rows(rows, cols, itemsize)
    grid = (pl.cdiv(rows, tile_rows),)

    x2d = x.reshape(rows, cols)                       # free reshape (no pad)
    scale_arr = jnp.full((1,), scale, dtype=jnp.float32)

    out2d = pl.pallas_call(
        _mul_kernel,
        out_shape=jax.ShapeDtypeStruct((rows, cols), dtype),
        grid_spec=pl.GridSpec(
            grid=grid,
            in_specs=[
                pl.BlockSpec(memory_space=pltpu.MemorySpace.SMEM),      # scale
                pl.BlockSpec((tile_rows, cols), lambda i: (i, 0)),      # x tile
            ],
            out_specs=pl.BlockSpec((tile_rows, cols), lambda i: (i, 0)),
        ),
        compiler_params=pltpu.CompilerParams(
            dimension_semantics=_grid_semantics(),
            vmem_limit_bytes=_VMEM_LIMIT_BYTES,
        ),
    )(scale_arr, x2d)

    return out2d.reshape(orig_shape)


if __name__ == "__main__":
    key = jax.random.PRNGKey(0)
    k_small, k_big = jax.random.split(key)
    scale = 1.0 / 9.0

    # Small NCHW demo shape from the module (batch=2, channels=4, 16x16):
    # goes through the small-input fast path.
    x_small = jax.random.normal(k_small, (2, 4, 16, 16), dtype=jnp.float32)
    y_small = mul(x_small, scale)

    # Activation-sized tensor that exercises the Pallas kernel path
    # (cols=8192, rows=256, tile_rows=128 -> 2 pipelined grid steps).
    x_big = jax.random.normal(k_big, (16, 32, 64, 64), dtype=jnp.float32)
    y_big = mul(x_big, scale)

    jax.block_until_ready((y_small, y_big))

    assert y_small.shape == x_small.shape and y_small.dtype == x_small.dtype
    assert jnp.allclose(y_small, x_small * scale, atol=1e-6, rtol=1e-6)
    assert y_big.shape == x_big.shape and y_big.dtype == x_big.dtype
    assert jnp.allclose(y_big, x_big * scale, atol=1e-6, rtol=1e-6)

    print("KERNEL_OK")
</pallas_src>

<mosaic_0001>
module attributes {stable_mosaic.version = 11 : i64} {
  func.func @_mul_kernel(%arg0: i32, %arg1: memref<1xf32, #tpu.memory_space<smem>>, %arg2: memref<128x8192xf32, #tpu.memory_space<vmem>>, %arg3: memref<128x8192xf32, #tpu.memory_space<vmem>>) attributes {dimension_semantics = [#tpu.dimension_semantics<parallel>], iteration_bounds = array<i64: 2>, scalar_prefetch = 0 : i64, scratch_operands = 0 : i64, tpu.core_type = #tpu.core_type<tc>, window_params = [{transform_indices = @transform_0, window_bounds = array<i64: 1>}, {transform_indices = @transform_1, window_bounds = array<i64: 128, 8192>}, {transform_indices = @transform_2, window_bounds = array<i64: 128, 8192>}]} {
    %c0 = arith.constant 0 : index
    %c0_0 = arith.constant 0 : index
    %0 = vector.load %arg2[%c0, %c0_0] : memref<128x8192xf32, #tpu.memory_space<vmem>>, vector<128x8192xf32>
    %c0_1 = arith.constant 0 : index
    %1 = memref.load %arg1[%c0_1] : memref<1xf32, #tpu.memory_space<smem>>
    %2 = vector.broadcast %1 : f32 to vector<128x8192xf32>
    %3 = arith.mulf %0, %2 : vector<128x8192xf32>
    %c0_2 = arith.constant 0 : index
    %c0_3 = arith.constant 0 : index
    %4 = vector.load %arg3[%c0_2, %c0_3] : memref<128x8192xf32, #tpu.memory_space<vmem>>, vector<128x8192xf32>
    tpu.vector_store %arg3[%c0_2, %c0_3], %3 {strides = array<i32>} : memref<128x8192xf32, #tpu.memory_space<vmem>>, vector<128x8192xf32>,
    return
  }
  func.func @transform_0(%arg0: i32) -> i32 {
    %c0_i32 = arith.constant 0 : i32
    %c0_i32_0 = arith.constant 0 : i32
    return %c0_i32 : i32
  }
  func.func @transform_1(%arg0: i32) -> (i32, i32) {
    %c0_i32 = arith.constant 0 : i32
    %c0_i32_0 = arith.constant 0 : i32
    return %arg0, %c0_i32 : i32, i32
  }
  func.func @transform_2(%arg0: i32) -> (i32, i32) {
    %c0_i32 = arith.constant 0 : i32
    %c0_i32_0 = arith.constant 0 : i32
    return %arg0, %c0_i32 : i32, i32
  }
}

</mosaic_0001>

<bundles_post_ra>
// kernel: tpu_custom_call.1
= control target key start
LH: loop header
LB: loop body
LE: loop exit
PB: predicated region body
PF: predicated region fallthrough
CT: control target
= control target key end

     0   :  { %s6761_s0 = inlined_call_operand.<no memory space> [shape: f32[1], index: 0, kind: input, shape index: {}]   ;;  %s6762_s1 = inlined_call_operand.hbm [shape: f32[256,8192], index: 1, kind: input, shape index: {}]   ;;  %s6763_s2 = inlined_call_operand.hbm [shape: f32[256,8192], index: 2, kind: output, shape index: {}]  }
   0x1   :  { %7 = sst [smem:[#allocation2]] %s6761_s0 }
   0x2   :  { %8 = vsyncpa [#allocation4], 0 }
   0x3   :  { %10 = vsyncpa [#allocation4 + $0x1], 0 }
   0x4   :  { %11 = vsyncpa [#allocation5], 0 }
   0x5   :  { %13 = vsyncpa [#allocation5 + $0x1], 0  ;;  %s3520_s11 = smov 0   ;;  %s3522_s12 = smov 0  }
   0x6   :  { %s3524_s13 = smov 0   ;;  %s3526_s14 = smov 0  }
   0x7 LB: > { %s3541_s0 = sadd.s32 4294967295, %s3494_s14   ;;  %s3328_s15 = sadd.s32 4294967294, %s3494_s14   ;;  %s3494_s14 = sphi %s3526_s14, %s6776_s14   ;;  %s3490_s13 = sphi %s3524_s13, %s6775_s13   ;;  %s3486_s12 = sphi %s3522_s12, %s6774_s12   ;;  %s3482_s11 = sphi %s3520_s11, %s6773_s11  }
   0x8   : > { %s3545_s16 = sadd.s32 1, %s3494_s14   ;;  %s47_s17 = sadd.s32 1, %s3490_s13 }
   0x9   : > { %s44_s18 = ssub.s32 %s3494_s14, %s3545_s16  ;;  %p54_p0 = scmp.ne.s32.totalorder %s3490_s13, %s3486_s12 }
   0xa   : > { %p45_p1 = scmp.eq.s32.totalorder %s44_s18, 0  ;;  %p55_p2 = scmp.eq.s32.totalorder %s3494_s14, 0 }
   0xb   : > { %p60_p3 = scmp.ne.s32.totalorder %s3486_s12, %s3482_s11  ;;  %p61_p4 = scmp.eq.s32.totalorder %s3541_s0, 0 }
   0xc   : > { %s3557_s19 = scalar_select %p45_p1, %s3490_s13, %s47_s17  }
   0xd   : > { %p3559_p5 = por %p55_p2, %p54_p0  ;;  %p3563_p6 = por %p61_p4, %p60_p3 }
   0xe   : > { %p84_p7 = scmp.eq.s32.totalorder %s3541_s0, 1  ;;  %p90_p8 = scmp.eq.s32.totalorder %s3328_s15, 1 }
   0xf   : > { %p3360_p10 = scmp.lt.s32.totalorder %s3494_s14, 2  ;;  %s113_s24 = sand.u32 1, %s3490_s13  }
  0x10   : > { %p3570_p11 = por %p84_p7, %p54_p0  ;;  %p3574_p12 = por %p90_p8, %p60_p3 }
  0x11   : > { %s3345_s25 = sshll.u32 %s3494_s14, 17  ;;  %s3331_s26 = sshll.u32 %s113_s24, 13 }
  0x12   : > { %s6767_s22 = scalar_select %p3570_p11, 1, 0 }
  0x13   : > { %s6768_s23 = scalar_select %p3574_p12, 1, 0 }
  0x14   : > { %s3583_s29 = scalar_lea.hbm %s6762_s1, %s3345_s25  ;;  %s117_s30 = scalar_lea.vmem [#allocation3], %s3331_s26 }
  0x15   : > { %s125_s3 = sshll.u32 %s117_s30, 4  ;;  %p3587_p13 = pnand %p3360_p10, %p3559_p5  ;;  %s3591_s3 = int_to_ptr.vmem [resolvable:$true] %s125_s3 }
  0x16   : > { %s3593_s5 = scalar_lea.sflag [#allocation4], %s113_s24  ;;  %s3398_s6 = scalar_lea.hbm %s3583_s29, 131072 }
  0x17   : > { %p3399_p0 = scmp.ne.s32.totalorder %s3583_s29, %s3398_s6  ;;  %p3400_p1 = pneg %p3587_p13 }
  0x18   : > { %s3403_s9 = scalar_lea.hbm %s6762_s1, 262144  ;;  %p3404_p4 = scmp.lt.u32.totalorder %s3583_s29, %s6762_s1 }
  0x19   : > { %p3401_p2 = pnand %p3400_p1, %p3399_p0  ;;  %p3405_p5 = scmp.lt.u32.totalorder %s3403_s9, %s3398_s6 }
  0x1a   : > { %p3407_p8 = scmp.lt.u32.totalorder %s3398_s6, %s3583_s29 }
  0x1b   : > { %p3402_p3 = pneg %p3401_p2  ;;  %p3406_p7 = por %p3405_p5, %p3404_p4 }
  0x1d   : > { %p3408_p10 = por %p3407_p8, %p3406_p7 }
  0x1f   : > { %p3409_p9 = pnand %p3408_p10, %p3402_p3 }
  0x21   : > { %3412 = shalt.err (!%p3409_p9)
}
  0x22   : > { %s3413_s17 = scalar_lea.vmem %s3591_s3, 131072  ;;  %s3496_s18 = smov [#allocation3]  }
  0x23   : > { %p3414_p0 = scmp.ne.s32.totalorder %s3591_s3, %s3413_s17  ;;  %s3418_s20 = sshll.u32 %s3496_s18, 4  ;;  %s3419_s20 = int_to_ptr.vmem [resolvable:$false] %s3418_s20 }
  0x24   : > { %s3420_s24 = scalar_lea.vmem %s3419_s20, 262144  ;;  %p3421_p11 = scmp.lt.s32.totalorder %s3591_s3, %s3419_s20 }
  0x25   : > { %p3416_p2 = pnand %p3414_p0, %p3400_p1  ;;  %p3422_p4 = scmp.lt.s32.totalorder %s3420_s24, %s3413_s17 }
  0x27   : > { %p3417_p12 = pneg %p3416_p2  ;;  %p3423_p5 = por %p3422_p4, %p3421_p11 }
  0x29   : > { %p3424_p7 = pnand %p3423_p5, %p3417_p12 }
  0x2b   : > { %3427 = shalt.err (!%p3424_p7)
}
  0x2c   : > { %s3497_s25 = smov 8192   ;;  %s3498_s26 = smov 512  }
  0x2d   : > { %3355 = dma.hbm_to_vmem [thread:$0]  (!%p3587_p13), %s3583_s29, 131072, %s3591_s3, %s3593_s5, %s3497_s25, %s3497_s25, %s3498_s26  }
  0x2e   : > { %p3335_p9 = scmp.ge.s32.totalorder %s3494_s14, 1  ;;  %p133_p1 = scmp.lt.s32.totalorder %s3494_s14, 3 }
  0x30   : > { %p134_p3 = pnand %p3335_p9, %p133_p1 }
  0x31   : > { %s3624_s27 = sand.u32 (!%p134_p3), 1, %s3486_s12  }
  0x32   : > { %137 = sbr.rel (%p134_p3) target bundleno = 593 (0x251), region = 28  ;;  %s3336_s28 = sshll.u32 (!%p134_p3), %s3624_s27, 13 }
  0x33   : > { %s140_s30 = scalar_lea.sflag (!%p134_p3), [#allocation4], %s3624_s27  ;;  %s3628_s6 = scalar_lea.vmem (!%p134_p3), [#allocation3], %s3336_s28 }
  0x39   : > { %3473 = dma.done.wait (%p3563_p6), %s140_s30, 131072  }
  0x3a   : > { %3475 = vsyncadd (%p3563_p6), %s140_s30, 4294836224  ;;  %s1190_s29 = sld [smem:[#allocation2]]  ;;  %v166_v0 = vld [vmem:[%s3628_s6] sm:$0xff]  ;;  %v167_v2 = vld [vmem:[%s3628_s6 + $0x8] sm:$0xff]  ;;  %s3651_s21 = scalar_lea.vmem [#allocation6], %s3336_s28 }
  0x3b   : > { %v168_v3 = vld [vmem:[%s3628_s6 + $0x10] sm:$0xff]  ;;  %v169_v7 = vld [vmem:[%s3628_s6 + $0x18] sm:$0xff]  ;;  %v170_v8 = vld [vmem:[%s3628_s6 + $0x20] sm:$0xff]  ;;  %s3347_s3 = sshll.u32 %s3541_s0, 17  ;;  %s3255_s4 = sshll.u32 %s3651_s21, 4  ;;  %s6709_s4 = int_to_ptr.vmem [resolvable:$true] %s3255_s4 }
  0x3c   : > { %v171_v9 = vld [vmem:[%s3628_s6 + $0x28] sm:$0xff]  ;;  %v172_v13 = vld [vmem:[%s3628_s6 + $0x30] sm:$0xff]  ;;  %v173_v14 = vld [vmem:[%s3628_s6 + $0x38] sm:$0xff]  ;;  %s6707_s7 = scalar_lea.hbm %s6763_s2, %s3347_s3  ;;  %s3241_s8 = scalar_lea.sflag [#allocation5], %s3624_s27 }
  0x3d   : > { %v174_v15 = vld [vmem:[%s3628_s6 + $0x40] sm:$0xff]  ;;  %v175_v19 = vld [vmem:[%s3628_s6 + $0x48] sm:$0xff]  ;;  %v176_v20 = vld [vmem:[%s3628_s6 + $0x50] sm:$0xff]  ;;  %s3428_s9 = scalar_lea.vmem %s6709_s4, 131072  ;;  %p6770_p11 = scmp.ne.s32.totalorder %s6767_s22, 0 }
  0x3e   : > { %v177_v21 = vld [vmem:[%s3628_s6 + $0x58] sm:$0xff]  ;;  %v178_v25 = vld [vmem:[%s3628_s6 + $0x60] sm:$0xff]  ;;  %v179_v26 = vld [vmem:[%s3628_s6 + $0x68] sm:$0xff]  ;;  %p3429_p6 = scmp.ne.s32.totalorder %s6709_s4, %s3428_s9  ;;  %s3499_s10 = smov [#allocation6]  }
  0x3f   : > { %v180_v27 = vld [vmem:[%s3628_s6 + $0x70] sm:$0xff]  ;;  %v181_v31 = vld [vmem:[%s3628_s6 + $0x78] sm:$0xff]  ;;  %v182_v32 = vld [vmem:[%s3628_s6 + $0x80] sm:$0xff]  ;;  %s3432_s15 = sshll.u32 %s3499_s10, 4  ;;  %s3433_s15 = int_to_ptr.vmem [resolvable:$false] %s3432_s15 }
  0x40   : > { %v3635_v1 = vstv %s1190_s29  ;;  %v183_v33 = vld [vmem:[%s3628_s6 + $0x88] sm:$0xff]  ;;  %v184_v37 = vld [vmem:[%s3628_s6 + $0x90] sm:$0xff]  ;;  %v185_v38 = vld [vmem:[%s3628_s6 + $0x98] sm:$0xff]  ;;  %p3430_p12 = pnand %p3429_p6, %p6770_p11  ;;  %s3434_s17 = scalar_lea.vmem %s3433_s15, 262144 }
  0x41   : > { %v1192_v4 = vmul.f32 %v3635_v1, %v166_v0  ;;  %v1193_v5 = vmul.f32 %v3635_v1, %v167_v2  ;;  %v1194_v6 = vmul.f32 %v3635_v1, %v168_v3  ;;  %v1195_v10 = vmul.f32 %v3635_v1, %v169_v7  ;;  %v186_v39 = vld [vmem:[%s3628_s6 + $0xa0] sm:$0xff]  ;;  %v187_v43 = vld [vmem:[%s3628_s6 + $0xa8] sm:$0xff]  ;;  %v188_v44 = vld [vmem:[%s3628_s6 + $0xb0] sm:$0xff]  ;;  %p3435_p8 = scmp.lt.s32.totalorder %s6709_s4, %s3433_s15  ;;  %p3436_p10 = scmp.lt.s32.totalorder %s3434_s17, %s3428_s9 }
  0x42   : > { %v1196_v11 = vmul.f32 %v3635_v1, %v170_v8  ;;  %v1197_v12 = vmul.f32 %v3635_v1, %v171_v9  ;;  %v1198_v16 = vmul.f32 %v3635_v1, %v172_v13  ;;  %v1199_v17 = vmul.f32 %v3635_v1, %v173_v14  ;;  %v189_v45 = vld [vmem:[%s3628_s6 + $0xb8] sm:$0xff]  ;;  %v190_v49 = vld [vmem:[%s3628_s6 + $0xc0] sm:$0xff]  ;;  %v191_v50 = vld [vmem:[%s3628_s6 + $0xc8] sm:$0xff]  ;;  %p3431_p13 = pneg %p3430_p12 }
  0x43   : > { %2216 = vst [vmem:[%s3651_s21] sm:$0xff] %v1192_v4  ;;  %2217 = vst [vmem:[%s3651_s21 + $0x8] sm:$0xff] %v1193_v5  ;;  %v1200_v18 = vmul.f32 %v3635_v1, %v174_v15  ;;  %v1201_v22 = vmul.f32 %v3635_v1, %v175_v19  ;;  %v1202_v23 = vmul.f32 %v3635_v1, %v176_v20  ;;  %v192_v51 = vld [vmem:[%s3628_s6 + $0xd0] sm:$0xff]  ;;  %v193_v55 = vld [vmem:[%s3628_s6 + $0xd8] sm:$0xff]  ;;  %p3437_p0 = por %p3436_p10, %p3435_p8 }
  0x44   : > { %2218 = vst [vmem:[%s3651_s21 + $0x10] sm:$0xff] %v1194_v6  ;;  %2219 = vst [vmem:[%s3651_s21 + $0x18] sm:$0xff] %v1195_v10  ;;  %v1203_v24 = vmul.f32 %v3635_v1, %v177_v21  ;;  %v1204_v28 = vmul.f32 %v3635_v1, %v178_v25  ;;  %v1205_v29 = vmul.f32 %v3635_v1, %v179_v26  ;;  %v194_v56 = vld [vmem:[%s3628_s6 + $0xe0] sm:$0xff]  ;;  %v195_v57 = vld [vmem:[%s3628_s6 + $0xe8] sm:$0xff] }
  0x45   : > { %2220 = vst [vmem:[%s3651_s21 + $0x20] sm:$0xff] %v1196_v11  ;;  %2221 = vst [vmem:[%s3651_s21 + $0x28] sm:$0xff] %v1197_v12  ;;  %v1206_v30 = vmul.f32 %v3635_v1, %v180_v27  ;;  %v1207_v34 = vmul.f32 %v3635_v1, %v181_v31  ;;  %v1208_v35 = vmul.f32 %v3635_v1, %v182_v32  ;;  %v196_v61 = vld [vmem:[%s3628_s6 + $0xf0] sm:$0xff]  ;;  %v197_v62 = vld [vmem:[%s3628_s6 + $0xf8] sm:$0xff]  ;;  %p3438_p2 = pnand %p3437_p0, %p3431_p13 }
  0x46   : > { %2222 = vst [vmem:[%s3651_s21 + $0x30] sm:$0xff] %v1198_v16  ;;  %2223 = vst [vmem:[%s3651_s21 + $0x38] sm:$0xff] %v1199_v17  ;;  %v1209_v36 = vmul.f32 %v3635_v1, %v183_v33  ;;  %v1210_v40 = vmul.f32 %v3635_v1, %v184_v37  ;;  %v1211_v41 = vmul.f32 %v3635_v1, %v185_v38  ;;  %v198_v63 = vld [vmem:[%s3628_s6 + $0x100] sm:$0xff]  ;;  %v199_v4 = vld [vmem:[%s3628_s6 + $0x108] sm:$0xff] }
  0x47   : > { %2224 = vst [vmem:[%s3651_s21 + $0x40] sm:$0xff] %v1200_v18  ;;  %2225 = vst [vmem:[%s3651_s21 + $0x48] sm:$0xff] %v1201_v22  ;;  %v1212_v42 = vmul.f32 %v3635_v1, %v186_v39  ;;  %v1213_v46 = vmul.f32 %v3635_v1, %v187_v43  ;;  %v1214_v47 = vmul.f32 %v3635_v1, %v188_v44  ;;  %v200_v5 = vld [vmem:[%s3628_s6 + $0x110] sm:$0xff]  ;;  %v201_v6 = vld [vmem:[%s3628_s6 + $0x118] sm:$0xff] }
  0x48   : > { %2226 = vst [vmem:[%s3651_s21 + $0x50] sm:$0xff] %v1202_v23  ;;  %2227 = vst [vmem:[%s3651_s21 + $0x58] sm:$0xff] %v1203_v24  ;;  %v1215_v48 = vmul.f32 %v3635_v1, %v189_v45  ;;  %v1216_v52 = vmul.f32 %v3635_v1, %v190_v49  ;;  %v1217_v53 = vmul.f32 %v3635_v1, %v191_v50  ;;  %v202_v10 = vld [vmem:[%s3628_s6 + $0x120] sm:$0xff]  ;;  %v203_v11 = vld [vmem:[%s3628_s6 + $0x128] sm:$0xff] }
  0x49   : > { %2228 = vst [vmem:[%s3651_s21 + $0x60] sm:$0xff] %v1204_v28  ;;  %2229 = vst [vmem:[%s3651_s21 + $0x68] sm:$0xff] %v1205_v29  ;;  %v1218_v54 = vmul.f32 %v3635_v1, %v192_v51  ;;  %v1219_v58 = vmul.f32 %v3635_v1, %v193_v55  ;;  %v1220_v59 = vmul.f32 %v3635_v1, %v194_v56  ;;  %v204_v12 = vld [vmem:[%s3628_s6 + $0x130] sm:$0xff]  ;;  %v205_v16 = vld [vmem:[%s3628_s6 + $0x138] sm:$0xff] }
  0x4a   : > { %2230 = vst [vmem:[%s3651_s21 + $0x70] sm:$0xff] %v1206_v30  ;;  %2231 = vst [vmem:[%s3651_s21 + $0x78] sm:$0xff] %v1207_v34  ;;  %v1221_v60 = vmul.f32 %v3635_v1, %v195_v57  ;;  %v1222_v0 = vmul.f32 %v3635_v1, %v196_v61  ;;  %v1223_v2 = vmul.f32 %v3635_v1, %v197_v62  ;;  %v206_v17 = vld [vmem:[%s3628_s6 + $0x140] sm:$0xff]  ;;  %v207_v18 = vld [vmem:[%s3628_s6 + $0x148] sm:$0xff] }
  0x4b   : > { %2232 = vst [vmem:[%s3651_s21 + $0x80] sm:$0xff] %v1208_v35  ;;  %2233 = vst [vmem:[%s3651_s21 + $0x88] sm:$0xff] %v1209_v36  ;;  %v1224_v3 = vmul.f32 %v3635_v1, %v198_v63  ;;  %v1225_v7 = vmul.f32 %v3635_v1, %v199_v4  ;;  %v1226_v8 = vmul.f32 %v3635_v1, %v200_v5  ;;  %v208_v22 = vld [vmem:[%s3628_s6 + $0x150] sm:$0xff]  ;;  %v209_v23 = vld [vmem:[%s3628_s6 + $0x158] sm:$0xff] }
  0x4c   : > { %2234 = vst [vmem:[%s3651_s21 + $0x90] sm:$0xff] %v1210_v40  ;;  %2235 = vst [vmem:[%s3651_s21 + $0x98] sm:$0xff] %v1211_v41  ;;  %v1227_v9 = vmul.f32 %v3635_v1, %v201_v6  ;;  %v1228_v13 = vmul.f32 %v3635_v1, %v202_v10  ;;  %v1229_v14 = vmul.f32 %v3635_v1, %v203_v11  ;;  %v210_v24 = vld [vmem:[%s3628_s6 + $0x160] sm:$0xff]  ;;  %v211_v28 = vld [vmem:[%s3628_s6 + $0x168] sm:$0xff] }
  0x4d   : > { %2236 = vst [vmem:[%s3651_s21 + $0xa0] sm:$0xff] %v1212_v42  ;;  %2237 = vst [vmem:[%s3651_s21 + $0xa8] sm:$0xff] %v1213_v46  ;;  %v1230_v15 = vmul.f32 %v3635_v1, %v204_v12  ;;  %v1231_v19 = vmul.f32 %v3635_v1, %v205_v16  ;;  %v1232_v20 = vmul.f32 %v3635_v1, %v206_v17  ;;  %v212_v29 = vld [vmem:[%s3628_s6 + $0x170] sm:$0xff]  ;;  %v213_v30 = vld [vmem:[%s3628_s6 + $0x178] sm:$0xff] }
  0x4e   : > { %2238 = vst [vmem:[%s3651_s21 + $0xb0] sm:$0xff] %v1214_v47  ;;  %2239 = vst [vmem:[%s3651_s21 + $0xb8] sm:$0xff] %v1215_v48  ;;  %v1233_v21 = vmul.f32 %v3635_v1, %v207_v18  ;;  %v1234_v25 = vmul.f32 %v3635_v1, %v208_v22  ;;  %v1235_v26 = vmul.f32 %v3635_v1, %v209_v23  ;;  %v214_v34 = vld [vmem:[%s3628_s6 + $0x180] sm:$0xff]  ;;  %v215_v35 = vld [vmem:[%s3628_s6 + $0x188] sm:$0xff] }
  0x4f   : > { %2240 = vst [vmem:[%s3651_s21 + $0xc0] sm:$0xff] %v1216_v52  ;;  %2241 = vst [vmem:[%s3651_s21 + $0xc8] sm:$0xff] %v1217_v53  ;;  %v1236_v27 = vmul.f32 %v3635_v1, %v210_v24  ;;  %v1237_v31 = vmul.f32 %v3635_v1, %v211_v28  ;;  %v1238_v32 = vmul.f32 %v3635_v1, %v212_v29  ;;  %v216_v36 = vld [vmem:[%s3628_s6 + $0x190] sm:$0xff]  ;;  %v217_v40 = vld [vmem:[%s3628_s6 + $0x198] sm:$0xff] }
  0x50   : > { %2242 = vst [vmem:[%s3651_s21 + $0xd0] sm:$0xff] %v1218_v54  ;;  %2243 = vst [vmem:[%s3651_s21 + $0xd8] sm:$0xff] %v1219_v58  ;;  %v1239_v33 = vmul.f32 %v3635_v1, %v213_v30  ;;  %v1240_v37 = vmul.f32 %v3635_v1, %v214_v34  ;;  %v1241_v38 = vmul.f32 %v3635_v1, %v215_v35  ;;  %v218_v41 = vld [vmem:[%s3628_s6 + $0x1a0] sm:$0xff]  ;;  %v219_v42 = vld [vmem:[%s3628_s6 + $0x1a8] sm:$0xff] }
  0x51   : > { %2244 = vst [vmem:[%s3651_s21 + $0xe0] sm:$0xff] %v1220_v59  ;;  %2245 = vst [vmem:[%s3651_s21 + $0xe8] sm:$0xff] %v1221_v60  ;;  %v1242_v39 = vmul.f32 %v3635_v1, %v216_v36  ;;  %v1243_v43 = vmul.f32 %v3635_v1, %v217_v40  ;;  %v1244_v44 = vmul.f32 %v3635_v1, %v218_v41  ;;  %v220_v46 = vld [vmem:[%s3628_s6 + $0x1b0] sm:$0xff]  ;;  %v221_v47 = vld [vmem:[%s3628_s6 + $0x1b8] sm:$0xff] }
  0x52   : > { %2246 = vst [vmem:[%s3651_s21 + $0xf0] sm:$0xff] %v1222_v0  ;;  %2247 = vst [vmem:[%s3651_s21 + $0xf8] sm:$0xff] %v1223_v2  ;;  %v1245_v45 = vmul.f32 %v3635_v1, %v219_v42  ;;  %v222_v48 = vld [vmem:[%s3628_s6 + $0x1c0] sm:$0xff]  ;;  %v1246_v49 = vmul.f32 %v3635_v1, %v220_v46  ;;  %v1247_v50 = vmul.f32 %v3635_v1, %v221_v47  ;;  %v223_v52 = vld [vmem:[%s3628_s6 + $0x1c8] sm:$0xff] }
  0x53   : > { %2248 = vst [vmem:[%s3651_s21 + $0x100] sm:$0xff] %v1224_v3  ;;  %2249 = vst [vmem:[%s3651_s21 + $0x108] sm:$0xff] %v1225_v7  ;;  %v1248_v51 = vmul.f32 %v3635_v1, %v222_v48  ;;  %v224_v53 = vld [vmem:[%s3628_s6 + $0x1d0] sm:$0xff]  ;;  %v225_v54 = vld [vmem:[%s3628_s6 + $0x1d8] sm:$0xff]  ;;  %v1249_v55 = vmul.f32 %v3635_v1, %v223_v52 }
  0x54   : > { %2250 = vst [vmem:[%s3651_s21 + $0x110] sm:$0xff] %v1226_v8  ;;  %2251 = vst [vmem:[%s3651_s21 + $0x118] sm:$0xff] %v1227_v9  ;;  %v1250_v56 = vmul.f32 %v3635_v1, %v224_v53  ;;  %v1251_v57 = vmul.f32 %v3635_v1, %v225_v54  ;;  %v226_v58 = vld [vmem:[%s3628_s6 + $0x1e0] sm:$0xff]  ;;  %v227_v59 = vld [vmem:[%s3628_s6 + $0x1e8] sm:$0xff] }
  0x55   : > { %2252 = vst [vmem:[%s3651_s21 + $0x120] sm:$0xff] %v1228_v13  ;;  %2253 = vst [vmem:[%s3651_s21 + $0x128] sm:$0xff] %v1229_v14  ;;  %v228_v60 = vld [vmem:[%s3628_s6 + $0x1f0] sm:$0xff]  ;;  %v1252_v61 = vmul.f32 %v3635_v1, %v226_v58  ;;  %v1253_v62 = vmul.f32 %v3635_v1, %v227_v59  ;;  %v229_v0 = vld [vmem:[%s3628_s6 + $0x1f8] sm:$0xff] }
  0x56   : > { %2254 = vst [vmem:[%s3651_s21 + $0x130] sm:$0xff] %v1230_v15  ;;  %2255 = vst [vmem:[%s3651_s21 + $0x138] sm:$0xff] %v1231_v19  ;;  %v1254_v63 = vmul.f32 %v3635_v1, %v228_v60  ;;  %v230_v2 = vld [vmem:[%s3628_s6 + $0x200] sm:$0xff]  ;;  %v231_v3 = vld [vmem:[%s3628_s6 + $0x208] sm:$0xff]  ;;  %v1255_v4 = vmul.f32 %v3635_v1, %v229_v0 }
  0x57   : > { %2256 = vst [vmem:[%s3651_s21 + $0x140] sm:$0xff] %v1232_v20  ;;  %2257 = vst [vmem:[%s3651_s21 + $0x148] sm:$0xff] %v1233_v21  ;;  %v1256_v5 = vmul.f32 %v3635_v1, %v230_v2  ;;  %v1257_v6 = vmul.f32 %v3635_v1, %v231_v3  ;;  %v232_v7 = vld [vmem:[%s3628_s6 + $0x210] sm:$0xff]  ;;  %v233_v8 = vld [vmem:[%s3628_s6 + $0x218] sm:$0xff] }
  0x58   : > { %2258 = vst [vmem:[%s3651_s21 + $0x150] sm:$0xff] %v1234_v25  ;;  %2259 = vst [vmem:[%s3651_s21 + $0x158] sm:$0xff] %v1235_v26  ;;  %v234_v9 = vld [vmem:[%s3628_s6 + $0x220] sm:$0xff]  ;;  %v1258_v10 = vmul.f32 %v3635_v1, %v232_v7  ;;  %v1259_v11 = vmul.f32 %v3635_v1, %v233_v8  ;;  %v235_v13 = vld [vmem:[%s3628_s6 + $0x228] sm:$0xff] }
  0x59   : > { %2260 = vst [vmem:[%s3651_s21 + $0x160] sm:$0xff] %v1236_v27  ;;  %2261 = vst [vmem:[%s3651_s21 + $0x168] sm:$0xff] %v1237_v31  ;;  %v1260_v12 = vmul.f32 %v3635_v1, %v234_v9  ;;  %v236_v14 = vld [vmem:[%s3628_s6 + $0x230] sm:$0xff]  ;;  %v237_v15 = vld [vmem:[%s3628_s6 + $0x238] sm:$0xff]  ;;  %v1261_v16 = vmul.f32 %v3635_v1, %v235_v13 }
  0x5a   : > { %2262 = vst [vmem:[%s3651_s21 + $0x170] sm:$0xff] %v1238_v32  ;;  %2263 = vst [vmem:[%s3651_s21 + $0x178] sm:$0xff] %v1239_v33  ;;  %v1262_v17 = vmul.f32 %v3635_v1, %v236_v14  ;;  %v1263_v18 = vmul.f32 %v3635_v1, %v237_v15  ;;  %v238_v19 = vld [vmem:[%s3628_s6 + $0x240] sm:$0xff]  ;;  %v239_v20 = vld [vmem:[%s3628_s6 + $0x248] sm:$0xff] }
  0x5b   : > { %2264 = vst [vmem:[%s3651_s21 + $0x180] sm:$0xff] %v1240_v37  ;;  %2265 = vst [vmem:[%s3651_s21 + $0x188] sm:$0xff] %v1241_v38  ;;  %v240_v21 = vld [vmem:[%s3628_s6 + $0x250] sm:$0xff]  ;;  %v1264_v22 = vmul.f32 %v3635_v1, %v238_v19  ;;  %v1265_v23 = vmul.f32 %v3635_v1, %v239_v20  ;;  %v241_v25 = vld [vmem:[%s3628_s6 + $0x258] sm:$0xff] }
  0x5c   : > { %2266 = vst [vmem:[%s3651_s21 + $0x190] sm:$0xff] %v1242_v39  ;;  %2267 = vst [vmem:[%s3651_s21 + $0x198] sm:$0xff] %v1243_v43  ;;  %v1266_v24 = vmul.f32 %v3635_v1, %v240_v21  ;;  %v242_v26 = vld [vmem:[%s3628_s6 + $0x260] sm:$0xff]  ;;  %v243_v27 = vld [vmem:[%s3628_s6 + $0x268] sm:$0xff]  ;;  %v1267_v28 = vmul.f32 %v3635_v1, %v241_v25 }
  0x5d   : > { %2268 = vst [vmem:[%s3651_s21 + $0x1a0] sm:$0xff] %v1244_v44  ;;  %2269 = vst [vmem:[%s3651_s21 + $0x1a8] sm:$0xff] %v1245_v45  ;;  %v1268_v29 = vmul.f32 %v3635_v1, %v242_v26  ;;  %v1269_v30 = vmul.f32 %v3635_v1, %v243_v27  ;;  %v244_v31 = vld [vmem:[%s3628_s6 + $0x270] sm:$0xff]  ;;  %v245_v32 = vld [vmem:[%s3628_s6 + $0x278] sm:$0xff] }
  0x5e   : > { %2270 = vst [vmem:[%s3651_s21 + $0x1b0] sm:$0xff] %v1246_v49  ;;  %2271 = vst [vmem:[%s3651_s21 + $0x1b8] sm:$0xff] %v1247_v50  ;;  %v246_v33 = vld [vmem:[%s3628_s6 + $0x280] sm:$0xff]  ;;  %v1270_v34 = vmul.f32 %v3635_v1, %v244_v31  ;;  %v1271_v35 = vmul.f32 %v3635_v1, %v245_v32  ;;  %v247_v37 = vld [vmem:[%s3628_s6 + $0x288] sm:$0xff] }
  0x5f   : > { %2272 = vst [vmem:[%s3651_s21 + $0x1c0] sm:$0xff] %v1248_v51  ;;  %2273 = vst [vmem:[%s3651_s21 + $0x1c8] sm:$0xff] %v1249_v55  ;;  %v1272_v36 = vmul.f32 %v3635_v1, %v246_v33  ;;  %v248_v38 = vld [vmem:[%s3628_s6 + $0x290] sm:$0xff]  ;;  %v249_v39 = vld [vmem:[%s3628_s6 + $0x298] sm:$0xff]  ;;  %v1273_v40 = vmul.f32 %v3635_v1, %v247_v37 }
  0x60   : > { %2274 = vst [vmem:[%s3651_s21 + $0x1d0] sm:$0xff] %v1250_v56  ;;  %2275 = vst [vmem:[%s3651_s21 + $0x1d8] sm:$0xff] %v1251_v57  ;;  %v1274_v41 = vmul.f32 %v3635_v1, %v248_v38  ;;  %v1275_v42 = vmul.f32 %v3635_v1, %v249_v39  ;;  %v250_v43 = vld [vmem:[%s3628_s6 + $0x2a0] sm:$0xff]  ;;  %v251_v44 = vld [vmem:[%s3628_s6 + $0x2a8] sm:$0xff] }
  0x61   : > { %2276 = vst [vmem:[%s3651_s21 + $0x1e0] sm:$0xff] %v1252_v61  ;;  %2277 = vst [vmem:[%s3651_s21 + $0x1e8] sm:$0xff] %v1253_v62  ;;  %v252_v45 = vld [vmem:[%s3628_s6 + $0x2b0] sm:$0xff]  ;;  %v1276_v46 = vmul.f32 %v3635_v1, %v250_v43  ;;  %v1277_v47 = vmul.f32 %v3635_v1, %v251_v44  ;;  %v253_v49 = vld [vmem:[%s3628_s6 + $0x2b8] sm:$0xff] }
  0x62   : > { %2278 = vst [vmem:[%s3651_s21 + $0x1f0] sm:$0xff] %v1254_v63  ;;  %2279 = vst [vmem:[%s3651_s21 + $0x1f8] sm:$0xff] %v1255_v4  ;;  %v1278_v48 = vmul.f32 %v3635_v1, %v252_v45  ;;  %v254_v50 = vld [vmem:[%s3628_s6 + $0x2c0] sm:$0xff]  ;;  %v255_v51 = vld [vmem:[%s3628_s6 + $0x2c8] sm:$0xff]  ;;  %v1279_v52 = vmul.f32 %v3635_v1, %v253_v49 }
  0x63   : > { %2280 = vst [vmem:[%s3651_s21 + $0x200] sm:$0xff] %v1256_v5  ;;  %2281 = vst [vmem:[%s3651_s21 + $0x208] sm:$0xff] %v1257_v6  ;;  %v1280_v53 = vmul.f32 %v3635_v1, %v254_v50  ;;  %v1281_v54 = vmul.f32 %v3635_v1, %v255_v51  ;;  %v256_v55 = vld [vmem:[%s3628_s6 + $0x2d0] sm:$0xff]  ;;  %v257_v56 = vld [vmem:[%s3628_s6 + $0x2d8] sm:$0xff] }
  0x64   : > { %2282 = vst [vmem:[%s3651_s21 + $0x210] sm:$0xff] %v1258_v10  ;;  %2283 = vst [vmem:[%s3651_s21 + $0x218] sm:$0xff] %v1259_v11  ;;  %v258_v57 = vld [vmem:[%s3628_s6 + $0x2e0] sm:$0xff]  ;;  %v1282_v58 = vmul.f32 %v3635_v1, %v256_v55  ;;  %v1283_v59 = vmul.f32 %v3635_v1, %v257_v56  ;;  %v259_v61 = vld [vmem:[%s3628_s6 + $0x2e8] sm:$0xff] }
  0x65   : > { %2284 = vst [vmem:[%s3651_s21 + $0x220] sm:$0xff] %v1260_v12  ;;  %2285 = vst [vmem:[%s3651_s21 + $0x228] sm:$0xff] %v1261_v16  ;;  %v1284_v60 = vmul.f32 %v3635_v1, %v258_v57  ;;  %v260_v62 = vld [vmem:[%s3628_s6 + $0x2f0] sm:$0xff]  ;;  %v261_v63 = vld [vmem:[%s3628_s6 + $0x2f8] sm:$0xff]  ;;  %v1285_v0 = vmul.f32 %v3635_v1, %v259_v61 }
  0x66   : > { %2286 = vst [vmem:[%s3651_s21 + $0x230] sm:$0xff] %v1262_v17  ;;  %2287 = vst [vmem:[%s3651_s21 + $0x238] sm:$0xff] %v1263_v18  ;;  %v1286_v2 = vmul.f32 %v3635_v1, %v260_v62  ;;  %v1287_v3 = vmul.f32 %v3635_v1, %v261_v63  ;;  %v262_v4 = vld [vmem:[%s3628_s6 + $0x300] sm:$0xff]  ;;  %v263_v5 = vld [vmem:[%s3628_s6 + $0x308] sm:$0xff] }
  0x67   : > { %2288 = vst [vmem:[%s3651_s21 + $0x240] sm:$0xff] %v1264_v22  ;;  %2289 = vst [vmem:[%s3651_s21 + $0x248] sm:$0xff] %v1265_v23  ;;  %v264_v6 = vld [vmem:[%s3628_s6 + $0x310] sm:$0xff]  ;;  %v1288_v7 = vmul.f32 %v3635_v1, %v262_v4  ;;  %v1289_v8 = vmul.f32 %v3635_v1, %v263_v5  ;;  %v265_v10 = vld [vmem:[%s3628_s6 + $0x318] sm:$0xff] }
  0x68   : > { %2290 = vst [vmem:[%s3651_s21 + $0x250] sm:$0xff] %v1266_v24  ;;  %2291 = vst [vmem:[%s3651_s21 + $0x258] sm:$0xff] %v1267_v28  ;;  %v1290_v9 = vmul.f32 %v3635_v1, %v264_v6  ;;  %v266_v11 = vld [vmem:[%s3628_s6 + $0x320] sm:$0xff]  ;;  %v267_v12 = vld [vmem:[%s3628_s6 + $0x328] sm:$0xff]  ;;  %v1291_v13 = vmul.f32 %v3635_v1, %v265_v10 }
  0x69   : > { %2292 = vst [vmem:[%s3651_s21 + $0x260] sm:$0xff] %v1268_v29  ;;  %2293 = vst [vmem:[%s3651_s21 + $0x268] sm:$0xff] %v1269_v30  ;;  %v1292_v14 = vmul.f32 %v3635_v1, %v266_v11  ;;  %v1293_v15 = vmul.f32 %v3635_v1, %v267_v12  ;;  %v268_v16 = vld [vmem:[%s3628_s6 + $0x330] sm:$0xff]  ;;  %v269_v17 = vld [vmem:[%s3628_s6 + $0x338] sm:$0xff] }
  0x6a   : > { %2294 = vst [vmem:[%s3651_s21 + $0x270] sm:$0xff] %v1270_v34  ;;  %2295 = vst [vmem:[%s3651_s21 + $0x278] sm:$0xff] %v1271_v35  ;;  %v270_v18 = vld [vmem:[%s3628_s6 + $0x340] sm:$0xff]  ;;  %v1294_v19 = vmul.f32 %v3635_v1, %v268_v16  ;;  %v1295_v20 = vmul.f32 %v3635_v1, %v269_v17  ;;  %v271_v22 = vld [vmem:[%s3628_s6 + $0x348] sm:$0xff] }
  0x6b   : > { %2296 = vst [vmem:[%s3651_s21 + $0x280] sm:$0xff] %v1272_v36  ;;  %2297 = vst [vmem:[%s3651_s21 + $0x288] sm:$0xff] %v1273_v40  ;;  %v1296_v21 = vmul.f32 %v3635_v1, %v270_v18  ;;  %v272_v23 = vld [vmem:[%s3628_s6 + $0x350] sm:$0xff]  ;;  %v273_v24 = vld [vmem:[%s3628_s6 + $0x358] sm:$0xff]  ;;  %v1297_v25 = vmul.f32 %v3635_v1, %v271_v22 }
  0x6c   : > { %2298 = vst [vmem:[%s3651_s21 + $0x290] sm:$0xff] %v1274_v41  ;;  %2299 = vst [vmem:[%s3651_s21 + $0x298] sm:$0xff] %v1275_v42  ;;  %v1298_v26 = vmul.f32 %v3635_v1, %v272_v23  ;;  %v1299_v27 = vmul.f32 %v3635_v1, %v273_v24  ;;  %v274_v28 = vld [vmem:[%s3628_s6 + $0x360] sm:$0xff]  ;;  %v275_v29 = vld [vmem:[%s3628_s6 + $0x368] sm:$0xff] }
  0x6d   : > { %2300 = vst [vmem:[%s3651_s21 + $0x2a0] sm:$0xff] %v1276_v46  ;;  %2301 = vst [vmem:[%s3651_s21 + $0x2a8] sm:$0xff] %v1277_v47  ;;  %v276_v30 = vld [vmem:[%s3628_s6 + $0x370] sm:$0xff]  ;;  %v1300_v31 = vmul.f32 %v3635_v1, %v274_v28  ;;  %v1301_v32 = vmul.f32 %v3635_v1, %v275_v29  ;;  %v277_v34 = vld [vmem:[%s3628_s6 + $0x378] sm:$0xff] }
  0x6e   : > { %2302 = vst [vmem:[%s3651_s21 + $0x2b0] sm:$0xff] %v1278_v48  ;;  %2303 = vst [vmem:[%s3651_s21 + $0x2b8] sm:$0xff] %v1279_v52  ;;  %v1302_v33 = vmul.f32 %v3635_v1, %v276_v30  ;;  %v278_v35 = vld [vmem:[%s3628_s6 + $0x380] sm:$0xff]  ;;  %v279_v36 = vld [vmem:[%s3628_s6 + $0x388] sm:$0xff]  ;;  %v1303_v37 = vmul.f32 %v3635_v1, %v277_v34 }
  0x6f   : > { %2304 = vst [vmem:[%s3651_s21 + $0x2c0] sm:$0xff] %v1280_v53  ;;  %2305 = vst [vmem:[%s3651_s21 + $0x2c8] sm:$0xff] %v1281_v54  ;;  %v1304_v38 = vmul.f32 %v3635_v1, %v278_v35  ;;  %v1305_v39 = vmul.f32 %v3635_v1, %v279_v36  ;;  %v280_v40 = vld [vmem:[%s3628_s6 + $0x390] sm:$0xff]  ;;  %v281_v41 = vld [vmem:[%s3628_s6 + $0x398] sm:$0xff] }
  0x70   : > { %2306 = vst [vmem:[%s3651_s21 + $0x2d0] sm:$0xff] %v1282_v58  ;;  %2307 = vst [vmem:[%s3651_s21 + $0x2d8] sm:$0xff] %v1283_v59  ;;  %v282_v42 = vld [vmem:[%s3628_s6 + $0x3a0] sm:$0xff]  ;;  %v1306_v43 = vmul.f32 %v3635_v1, %v280_v40  ;;  %v1307_v44 = vmul.f32 %v3635_v1, %v281_v41  ;;  %v283_v46 = vld [vmem:[%s3628_s6 + $0x3a8] sm:$0xff] }
  0x71   : > { %2308 = vst [vmem:[%s3651_s21 + $0x2e0] sm:$0xff] %v1284_v60  ;;  %2309 = vst [vmem:[%s3651_s21 + $0x2e8] sm:$0xff] %v1285_v0  ;;  %v1308_v45 = vmul.f32 %v3635_v1, %v282_v42  ;;  %v284_v47 = vld [vmem:[%s3628_s6 + $0x3b0] sm:$0xff]  ;;  %v285_v48 = vld [vmem:[%s3628_s6 + $0x3b8] sm:$0xff]  ;;  %v1309_v49 = vmul.f32 %v3635_v1, %v283_v46 }
  0x72   : > { %2310 = vst [vmem:[%s3651_s21 + $0x2f0] sm:$0xff] %v1286_v2  ;;  %2311 = vst [vmem:[%s3651_s21 + $0x2f8] sm:$0xff] %v1287_v3  ;;  %v1310_v50 = vmul.f32 %v3635_v1, %v284_v47  ;;  %v1311_v51 = vmul.f32 %v3635_v1, %v285_v48  ;;  %v286_v52 = vld [vmem:[%s3628_s6 + $0x3c0] sm:$0xff]  ;;  %v287_v53 = vld [vmem:[%s3628_s6 + $0x3c8] sm:$0xff] }
  0x73   : > { %2312 = vst [vmem:[%s3651_s21 + $0x300] sm:$0xff] %v1288_v7  ;;  %2313 = vst [vmem:[%s3651_s21 + $0x308] sm:$0xff] %v1289_v8  ;;  %v288_v54 = vld [vmem:[%s3628_s6 + $0x3d0] sm:$0xff]  ;;  %v1312_v55 = vmul.f32 %v3635_v1, %v286_v52  ;;  %v1313_v56 = vmul.f32 %v3635_v1, %v287_v53  ;;  %v289_v58 = vld [vmem:[%s3628_s6 + $0x3d8] sm:$0xff] }
  0x74   : > { %2314 = vst [vmem:[%s3651_s21 + $0x310] sm:$0xff] %v1290_v9  ;;  %2315 = vst [vmem:[%s3651_s21 + $0x318] sm:$0xff] %v1291_v13  ;;  %v1314_v57 = vmul.f32 %v3635_v1, %v288_v54  ;;  %v290_v59 = vld [vmem:[%s3628_s6 + $0x3e0] sm:$0xff]  ;;  %v291_v60 = vld [vmem:[%s3628_s6 + $0x3e8] sm:$0xff]  ;;  %v1315_v61 = vmul.f32 %v3635_v1, %v289_v58 }
  0x75   : > { %2316 = vst [vmem:[%s3651_s21 + $0x320] sm:$0xff] %v1292_v14  ;;  %2317 = vst [vmem:[%s3651_s21 + $0x328] sm:$0xff] %v1293_v15  ;;  %v1316_v62 = vmul.f32 %v3635_v1, %v290_v59  ;;  %v1317_v63 = vmul.f32 %v3635_v1, %v291_v60  ;;  %v292_v0 = vld [vmem:[%s3628_s6 + $0x3f0] sm:$0xff]  ;;  %v293_v2 = vld [vmem:[%s3628_s6 + $0x3f8] sm:$0xff] }
  0x76   : > { %2318 = vst [vmem:[%s3651_s21 + $0x330] sm:$0xff] %v1294_v19  ;;  %2319 = vst [vmem:[%s3651_s21 + $0x338] sm:$0xff] %v1295_v20  ;;  %v294_v3 = vld [vmem:[%s3628_s6 + $0x400] sm:$0xff]  ;;  %v1318_v4 = vmul.f32 %v3635_v1, %v292_v0  ;;  %v1319_v5 = vmul.f32 %v3635_v1, %v293_v2  ;;  %v295_v7 = vld [vmem:[%s3628_s6 + $0x408] sm:$0xff] }
  0x77   : > { %2320 = vst [vmem:[%s3651_s21 + $0x340] sm:$0xff] %v1296_v21  ;;  %2321 = vst [vmem:[%s3651_s21 + $0x348] sm:$0xff] %v1297_v25  ;;  %v1320_v6 = vmul.f32 %v3635_v1, %v294_v3  ;;  %v296_v8 = vld [vmem:[%s3628_s6 + $0x410] sm:$0xff]  ;;  %v297_v9 = vld [vmem:[%s3628_s6 + $0x418] sm:$0xff]  ;;  %v1321_v10 = vmul.f32 %v3635_v1, %v295_v7 }
  0x78   : > { %2322 = vst [vmem:[%s3651_s21 + $0x350] sm:$0xff] %v1298_v26  ;;  %2323 = vst [vmem:[%s3651_s21 + $0x358] sm:$0xff] %v1299_v27  ;;  %v1322_v11 = vmul.f32 %v3635_v1, %v296_v8  ;;  %v1323_v12 = vmul.f32 %v3635_v1, %v297_v9  ;;  %v298_v13 = vld [vmem:[%s3628_s6 + $0x420] sm:$0xff]  ;;  %v299_v14 = vld [vmem:[%s3628_s6 + $0x428] sm:$0xff] }
  0x79   : > { %2324 = vst [vmem:[%s3651_s21 + $0x360] sm:$0xff] %v1300_v31  ;;  %2325 = vst [vmem:[%s3651_s21 + $0x368] sm:$0xff] %v1301_v32  ;;  %v300_v15 = vld [vmem:[%s3628_s6 + $0x430] sm:$0xff]  ;;  %v1324_v16 = vmul.f32 %v3635_v1, %v298_v13  ;;  %v1325_v17 = vmul.f32 %v3635_v1, %v299_v14  ;;  %v301_v19 = vld [vmem:[%s3628_s6 + $0x438] sm:$0xff] }
  0x7a   : > { %2326 = vst [vmem:[%s3651_s21 + $0x370] sm:$0xff] %v1302_v33  ;;  %2327 = vst [vmem:[%s3651_s21 + $0x378] sm:$0xff] %v1303_v37  ;;  %v1326_v18 = vmul.f32 %v3635_v1, %v300_v15  ;;  %v302_v20 = vld [vmem:[%s3628_s6 + $0x440] sm:$0xff]  ;;  %v303_v21 = vld [vmem:[%s3628_s6 + $0x448] sm:$0xff]  ;;  %v1327_v22 = vmul.f32 %v3635_v1, %v301_v19 }
  0x7b   : > { %2328 = vst [vmem:[%s3651_s21 + $0x380] sm:$0xff] %v1304_v38  ;;  %2329 = vst [vmem:[%s3651_s21 + $0x388] sm:$0xff] %v1305_v39  ;;  %v1328_v23 = vmul.f32 %v3635_v1, %v302_v20  ;;  %v1329_v24 = vmul.f32 %v3635_v1, %v303_v21  ;;  %v304_v25 = vld [vmem:[%s3628_s6 + $0x450] sm:$0xff]  ;;  %v305_v26 = vld [vmem:[%s3628_s6 + $0x458] sm:$0xff] }
  0x7c   : > { %2330 = vst [vmem:[%s3651_s21 + $0x390] sm:$0xff] %v1306_v43  ;;  %2331 = vst [vmem:[%s3651_s21 + $0x398] sm:$0xff] %v1307_v44  ;;  %v306_v27 = vld [vmem:[%s3628_s6 + $0x460] sm:$0xff]  ;;  %v1330_v28 = vmul.f32 %v3635_v1, %v304_v25  ;;  %v1331_v29 = vmul.f32 %v3635_v1, %v305_v26  ;;  %v307_v31 = vld [vmem:[%s3628_s6 + $0x468] sm:$0xff] }
  0x7d   : > { %2332 = vst [vmem:[%s3651_s21 + $0x3a0] sm:$0xff] %v1308_v45  ;;  %2333 = vst [vmem:[%s3651_s21 + $0x3a8] sm:$0xff] %v1309_v49  ;;  %v1332_v30 = vmul.f32 %v3635_v1, %v306_v27  ;;  %v308_v32 = vld [vmem:[%s3628_s6 + $0x470] sm:$0xff]  ;;  %v309_v33 = vld [vmem:[%s3628_s6 + $0x478] sm:$0xff]  ;;  %v1333_v34 = vmul.f32 %v3635_v1, %v307_v31 }
  0x7e   : > { %2334 = vst [vmem:[%s3651_s21 + $0x3b0] sm:$0xff] %v1310_v50  ;;  %2335 = vst [vmem:[%s3651_s21 + $0x3b8] sm:$0xff] %v1311_v51  ;;  %v1334_v35 = vmul.f32 %v3635_v1, %v308_v32  ;;  %v1335_v36 = vmul.f32 %v3635_v1, %v309_v33  ;;  %v310_v37 = vld [vmem:[%s3628_s6 + $0x480] sm:$0xff]  ;;  %v311_v38 = vld [vmem:[%s3628_s6 + $0x488] sm:$0xff] }
  0x7f   : > { %2336 = vst [vmem:[%s3651_s21 + $0x3c0] sm:$0xff] %v1312_v55  ;;  %2337 = vst [vmem:[%s3651_s21 + $0x3c8] sm:$0xff] %v1313_v56  ;;  %v312_v39 = vld [vmem:[%s3628_s6 + $0x490] sm:$0xff]  ;;  %v1336_v40 = vmul.f32 %v3635_v1, %v310_v37  ;;  %v1337_v41 = vmul.f32 %v3635_v1, %v311_v38  ;;  %v313_v43 = vld [vmem:[%s3628_s6 + $0x498] sm:$0xff] }
  0x80   : > { %2338 = vst [vmem:[%s3651_s21 + $0x3d0] sm:$0xff] %v1314_v57  ;;  %2339 = vst [vmem:[%s3651_s21 + $0x3d8] sm:$0xff] %v1315_v61  ;;  %v1338_v42 = vmul.f32 %v3635_v1, %v312_v39  ;;  %v314_v44 = vld [vmem:[%s3628_s6 + $0x4a0] sm:$0xff]  ;;  %v315_v45 = vld [vmem:[%s3628_s6 + $0x4a8] sm:$0xff]  ;;  %v1339_v46 = vmul.f32 %v3635_v1, %v313_v43 }
  0x81   : > { %2340 = vst [vmem:[%s3651_s21 + $0x3e0] sm:$0xff] %v1316_v62  ;;  %2341 = vst [vmem:[%s3651_s21 + $0x3e8] sm:$0xff] %v1317_v63  ;;  %v1340_v47 = vmul.f32 %v3635_v1, %v314_v44  ;;  %v1341_v48 = vmul.f32 %v3635_v1, %v315_v45  ;;  %v316_v49 = vld [vmem:[%s3628_s6 + $0x4b0] sm:$0xff]  ;;  %v317_v50 = vld [vmem:[%s3628_s6 + $0x4b8] sm:$0xff] }
  0x82   : > { %2342 = vst [vmem:[%s3651_s21 + $0x3f0] sm:$0xff] %v1318_v4  ;;  %2343 = vst [vmem:[%s3651_s21 + $0x3f8] sm:$0xff] %v1319_v5  ;;  %v318_v51 = vld [vmem:[%s3628_s6 + $0x4c0] sm:$0xff]  ;;  %v1342_v52 = vmul.f32 %v3635_v1, %v316_v49  ;;  %v1343_v53 = vmul.f32 %v3635_v1, %v317_v50  ;;  %v319_v55 = vld [vmem:[%s3628_s6 + $0x4c8] sm:$0xff] }
  0x83   : > { %2344 = vst [vmem:[%s3651_s21 + $0x400] sm:$0xff] %v1320_v6  ;;  %2345 = vst [vmem:[%s3651_s21 + $0x408] sm:$0xff] %v1321_v10  ;;  %v1344_v54 = vmul.f32 %v3635_v1, %v318_v51  ;;  %v320_v56 = vld [vmem:[%s3628_s6 + $0x4d0] sm:$0xff]  ;;  %v321_v57 = vld [vmem:[%s3628_s6 + $0x4d8] sm:$0xff]  ;;  %v1345_v58 = vmul.f32 %v3635_v1, %v319_v55 }
  0x84   : > { %2346 = vst [vmem:[%s3651_s21 + $0x410] sm:$0xff] %v1322_v11  ;;  %2347 = vst [vmem:[%s3651_s21 + $0x418] sm:$0xff] %v1323_v12  ;;  %v1346_v59 = vmul.f32 %v3635_v1, %v320_v56  ;;  %v1347_v60 = vmul.f32 %v3635_v1, %v321_v57  ;;  %v322_v61 = vld [vmem:[%s3628_s6 + $0x4e0] sm:$0xff]  ;;  %v323_v62 = vld [vmem:[%s3628_s6 + $0x4e8] sm:$0xff] }
  0x85   : > { %2348 = vst [vmem:[%s3651_s21 + $0x420] sm:$0xff] %v1324_v16  ;;  %2349 = vst [vmem:[%s3651_s21 + $0x428] sm:$0xff] %v1325_v17  ;;  %v324_v63 = vld [vmem:[%s3628_s6 + $0x4f0] sm:$0xff]  ;;  %v1348_v0 = vmul.f32 %v3635_v1, %v322_v61  ;;  %v1349_v2 = vmul.f32 %v3635_v1, %v323_v62  ;;  %v325_v4 = vld [vmem:[%s3628_s6 + $0x4f8] sm:$0xff] }
  0x86   : > { %2350 = vst [vmem:[%s3651_s21 + $0x430] sm:$0xff] %v1326_v18  ;;  %2351 = vst [vmem:[%s3651_s21 + $0x438] sm:$0xff] %v1327_v22  ;;  %v1350_v3 = vmul.f32 %v3635_v1, %v324_v63  ;;  %v326_v5 = vld [vmem:[%s3628_s6 + $0x500] sm:$0xff]  ;;  %v327_v6 = vld [vmem:[%s3628_s6 + $0x508] sm:$0xff]  ;;  %v1351_v7 = vmul.f32 %v3635_v1, %v325_v4 }
  0x87   : > { %2352 = vst [vmem:[%s3651_s21 + $0x440] sm:$0xff] %v1328_v23  ;;  %2353 = vst [vmem:[%s3651_s21 + $0x448] sm:$0xff] %v1329_v24  ;;  %v1352_v8 = vmul.f32 %v3635_v1, %v326_v5  ;;  %v1353_v9 = vmul.f32 %v3635_v1, %v327_v6  ;;  %v328_v10 = vld [vmem:[%s3628_s6 + $0x510] sm:$0xff]  ;;  %v329_v11 = vld [vmem:[%s3628_s6 + $0x518] sm:$0xff] }
  0x88   : > { %2354 = vst [vmem:[%s3651_s21 + $0x450] sm:$0xff] %v1330_v28  ;;  %2355 = vst [vmem:[%s3651_s21 + $0x458] sm:$0xff] %v1331_v29  ;;  %v330_v12 = vld [vmem:[%s3628_s6 + $0x520] sm:$0xff]  ;;  %v1354_v13 = vmul.f32 %v3635_v1, %v328_v10  ;;  %v1355_v14 = vmul.f32 %v3635_v1, %v329_v11  ;;  %v331_v16 = vld [vmem:[%s3628_s6 + $0x528] sm:$0xff] }
  0x89   : > { %2356 = vst [vmem:[%s3651_s21 + $0x460] sm:$0xff] %v1332_v30  ;;  %2357 = vst [vmem:[%s3651_s21 + $0x468] sm:$0xff] %v1333_v34  ;;  %v1356_v15 = vmul.f32 %v3635_v1, %v330_v12  ;;  %v332_v17 = vld [vmem:[%s3628_s6 + $0x530] sm:$0xff]  ;;  %v333_v18 = vld [vmem:[%s3628_s6 + $0x538] sm:$0xff]  ;;  %v1357_v19 = vmul.f32 %v3635_v1, %v331_v16 }
  0x8a   : > { %2358 = vst [vmem:[%s3651_s21 + $0x470] sm:$0xff] %v1334_v35  ;;  %2359 = vst [vmem:[%s3651_s21 + $0x478] sm:$0xff] %v1335_v36  ;;  %v1358_v20 = vmul.f32 %v3635_v1, %v332_v17  ;;  %v1359_v21 = vmul.f32 %v3635_v1, %v333_v18  ;;  %v334_v22 = vld [vmem:[%s3628_s6 + $0x540] sm:$0xff]  ;;  %v335_v23 = vld [vmem:[%s3628_s6 + $0x548] sm:$0xff] }
  0x8b   : > { %2360 = vst [vmem:[%s3651_s21 + $0x480] sm:$0xff] %v1336_v40  ;;  %2361 = vst [vmem:[%s3651_s21 + $0x488] sm:$0xff] %v1337_v41  ;;  %v336_v24 = vld [vmem:[%s3628_s6 + $0x550] sm:$0xff]  ;;  %v1360_v25 = vmul.f32 %v3635_v1, %v334_v22  ;;  %v1361_v26 = vmul.f32 %v3635_v1, %v335_v23  ;;  %v337_v28 = vld [vmem:[%s3628_s6 + $0x558] sm:$0xff] }
  0x8c   : > { %2362 = vst [vmem:[%s3651_s21 + $0x490] sm:$0xff] %v1338_v42  ;;  %2363 = vst [vmem:[%s3651_s21 + $0x498] sm:$0xff] %v1339_v46  ;;  %v1362_v27 = vmul.f32 %v3635_v1, %v336_v24  ;;  %v338_v29 = vld [vmem:[%s3628_s6 + $0x560] sm:$0xff]  ;;  %v339_v30 = vld [vmem:[%s3628_s6 + $0x568] sm:$0xff]  ;;  %v1363_v31 = vmul.f32 %v3635_v1, %v337_v28 }
  0x8d   : > { %2364 = vst [vmem:[%s3651_s21 + $0x4a0] sm:$0xff] %v1340_v47  ;;  %2365 = vst [vmem:[%s3651_s21 + $0x4a8] sm:$0xff] %v1341_v48  ;;  %v1364_v32 = vmul.f32 %v3635_v1, %v338_v29  ;;  %v1365_v33 = vmul.f32 %v3635_v1, %v339_v30  ;;  %v340_v34 = vld [vmem:[%s3628_s6 + $0x570] sm:$0xff]  ;;  %v341_v35 = vld [vmem:[%s3628_s6 + $0x578] sm:$0xff] }
  0x8e   : > { %2366 = vst [vmem:[%s3651_s21 + $0x4b0] sm:$0xff] %v1342_v52  ;;  %2367 = vst [vmem:[%s3651_s21 + $0x4b8] sm:$0xff] %v1343_v53  ;;  %v342_v36 = vld [vmem:[%s3628_s6 + $0x580] sm:$0xff]  ;;  %v1366_v37 = vmul.f32 %v3635_v1, %v340_v34  ;;  %v1367_v38 = vmul.f32 %v3635_v1, %v341_v35  ;;  %v343_v40 = vld [vmem:[%s3628_s6 + $0x588] sm:$0xff] }
  0x8f   : > { %2368 = vst [vmem:[%s3651_s21 + $0x4c0] sm:$0xff] %v1344_v54  ;;  %2369 = vst [vmem:[%s3651_s21 + $0x4c8] sm:$0xff] %v1345_v58  ;;  %v1368_v39 = vmul.f32 %v3635_v1, %v342_v36  ;;  %v344_v41 = vld [vmem:[%s3628_s6 + $0x590] sm:$0xff]  ;;  %v345_v42 = vld [vmem:[%s3628_s6 + $0x598] sm:$0xff]  ;;  %v1369_v43 = vmul.f32 %v3635_v1, %v343_v40 }
  0x90   : > { %2370 = vst [vmem:[%s3651_s21 + $0x4d0] sm:$0xff] %v1346_v59  ;;  %2371 = vst [vmem:[%s3651_s21 + $0x4d8] sm:$0xff] %v1347_v60  ;;  %v1370_v44 = vmul.f32 %v3635_v1, %v344_v41  ;;  %v1371_v45 = vmul.f32 %v3635_v1, %v345_v42  ;;  %v346_v46 = vld [vmem:[%s3628_s6 + $0x5a0] sm:$0xff]  ;;  %v347_v47 = vld [vmem:[%s3628_s6 + $0x5a8] sm:$0xff] }
  0x91   : > { %2372 = vst [vmem:[%s3651_s21 + $0x4e0] sm:$0xff] %v1348_v0  ;;  %2373 = vst [vmem:[%s3651_s21 + $0x4e8] sm:$0xff] %v1349_v2  ;;  %v348_v48 = vld [vmem:[%s3628_s6 + $0x5b0] sm:$0xff]  ;;  %v1372_v49 = vmul.f32 %v3635_v1, %v346_v46  ;;  %v1373_v50 = vmul.f32 %v3635_v1, %v347_v47  ;;  %v349_v52 = vld [vmem:[%s3628_s6 + $0x5b8] sm:$0xff] }
  0x92   : > { %2374 = vst [vmem:[%s3651_s21 + $0x4f0] sm:$0xff] %v1350_v3  ;;  %2375 = vst [vmem:[%s3651_s21 + $0x4f8] sm:$0xff] %v1351_v7  ;;  %v1374_v51 = vmul.f32 %v3635_v1, %v348_v48  ;;  %v350_v53 = vld [vmem:[%s3628_s6 + $0x5c0] sm:$0xff]  ;;  %v351_v54 = vld [vmem:[%s3628_s6 + $0x5c8] sm:$0xff]  ;;  %v1375_v55 = vmul.f32 %v3635_v1, %v349_v52 }
  0x93   : > { %2376 = vst [vmem:[%s3651_s21 + $0x500] sm:$0xff] %v1352_v8  ;;  %2377 = vst [vmem:[%s3651_s21 + $0x508] sm:$0xff] %v1353_v9  ;;  %v1376_v56 = vmul.f32 %v3635_v1, %v350_v53  ;;  %v1377_v57 = vmul.f32 %v3635_v1, %v351_v54  ;;  %v352_v58 = vld [vmem:[%s3628_s6 + $0x5d0] sm:$0xff]  ;;  %v353_v59 = vld [vmem:[%s3628_s6 + $0x5d8] sm:$0xff] }
  0x94   : > { %2378 = vst [vmem:[%s3651_s21 + $0x510] sm:$0xff] %v1354_v13  ;;  %2379 = vst [vmem:[%s3651_s21 + $0x518] sm:$0xff] %v1355_v14  ;;  %v354_v60 = vld [vmem:[%s3628_s6 + $0x5e0] sm:$0xff]  ;;  %v1378_v61 = vmul.f32 %v3635_v1, %v352_v58  ;;  %v1379_v62 = vmul.f32 %v3635_v1, %v353_v59  ;;  %v355_v0 = vld [vmem:[%s3628_s6 + $0x5e8] sm:$0xff] }
  0x95   : > { %2380 = vst [vmem:[%s3651_s21 + $0x520] sm:$0xff] %v1356_v15  ;;  %2381 = vst [vmem:[%s3651_s21 + $0x528] sm:$0xff] %v1357_v19  ;;  %v1380_v63 = vmul.f32 %v3635_v1, %v354_v60  ;;  %v356_v2 = vld [vmem:[%s3628_s6 + $0x5f0] sm:$0xff]  ;;  %v357_v3 = vld [vmem:[%s3628_s6 + $0x5f8] sm:$0xff]  ;;  %v1381_v4 = vmul.f32 %v3635_v1, %v355_v0 }
  0x96   : > { %2382 = vst [vmem:[%s3651_s21 + $0x530] sm:$0xff] %v1358_v20  ;;  %2383 = vst [vmem:[%s3651_s21 + $0x538] sm:$0xff] %v1359_v21  ;;  %v1382_v5 = vmul.f32 %v3635_v1, %v356_v2  ;;  %v1383_v6 = vmul.f32 %v3635_v1, %v357_v3  ;;  %v358_v7 = vld [vmem:[%s3628_s6 + $0x600] sm:$0xff]  ;;  %v359_v8 = vld [vmem:[%s3628_s6 + $0x608] sm:$0xff] }
  0x97   : > { %2384 = vst [vmem:[%s3651_s21 + $0x540] sm:$0xff] %v1360_v25  ;;  %2385 = vst [vmem:[%s3651_s21 + $0x548] sm:$0xff] %v1361_v26  ;;  %v360_v9 = vld [vmem:[%s3628_s6 + $0x610] sm:$0xff]  ;;  %v1384_v10 = vmul.f32 %v3635_v1, %v358_v7  ;;  %v1385_v11 = vmul.f32 %v3635_v1, %v359_v8  ;;  %v361_v13 = vld [vmem:[%s3628_s6 + $0x618] sm:$0xff] }
  0x98   : > { %2386 = vst [vmem:[%s3651_s21 + $0x550] sm:$0xff] %v1362_v27  ;;  %2387 = vst [vmem:[%s3651_s21 + $0x558] sm:$0xff] %v1363_v31  ;;  %v1386_v12 = vmul.f32 %v3635_v1, %v360_v9  ;;  %v362_v14 = vld [vmem:[%s3628_s6 + $0x620] sm:$0xff]  ;;  %v363_v15 = vld [vmem:[%s3628_s6 + $0x628] sm:$0xff]  ;;  %v1387_v16 = vmul.f32 %v3635_v1, %v361_v13 }
  0x99   : > { %2388 = vst [vmem:[%s3651_s21 + $0x560] sm:$0xff] %v1364_v32  ;;  %2389 = vst [vmem:[%s3651_s21 + $0x568] sm:$0xff] %v1365_v33  ;;  %v1388_v17 = vmul.f32 %v3635_v1, %v362_v14  ;;  %v1389_v18 = vmul.f32 %v3635_v1, %v363_v15  ;;  %v364_v19 = vld [vmem:[%s3628_s6 + $0x630] sm:$0xff]  ;;  %v365_v20 = vld [vmem:[%s3628_s6 + $0x638] sm:$0xff] }
  0x9a   : > { %2390 = vst [vmem:[%s3651_s21 + $0x570] sm:$0xff] %v1366_v37  ;;  %2391 = vst [vmem:[%s3651_s21 + $0x578] sm:$0xff] %v1367_v38  ;;  %v366_v21 = vld [vmem:[%s3628_s6 + $0x640] sm:$0xff]  ;;  %v1390_v22 = vmul.f32 %v3635_v1, %v364_v19  ;;  %v1391_v23 = vmul.f32 %v3635_v1, %v365_v20  ;;  %v367_v25 = vld [vmem:[%s3628_s6 + $0x648] sm:$0xff] }
  0x9b   : > { %2392 = vst [vmem:[%s3651_s21 + $0x580] sm:$0xff] %v1368_v39  ;;  %2393 = vst [vmem:[%s3651_s21 + $0x588] sm:$0xff] %v1369_v43  ;;  %v1392_v24 = vmul.f32 %v3635_v1, %v366_v21  ;;  %v368_v26 = vld [vmem:[%s3628_s6 + $0x650] sm:$0xff]  ;;  %v369_v27 = vld [vmem:[%s3628_s6 + $0x658] sm:$0xff]  ;;  %v1393_v28 = vmul.f32 %v3635_v1, %v367_v25 }
  0x9c   : > { %2394 = vst [vmem:[%s3651_s21 + $0x590] sm:$0xff] %v1370_v44  ;;  %2395 = vst [vmem:[%s3651_s21 + $0x598] sm:$0xff] %v1371_v45  ;;  %v1394_v29 = vmul.f32 %v3635_v1, %v368_v26  ;;  %v1395_v30 = vmul.f32 %v3635_v1, %v369_v27  ;;  %v370_v31 = vld [vmem:[%s3628_s6 + $0x660] sm:$0xff]  ;;  %v371_v32 = vld [vmem:[%s3628_s6 + $0x668] sm:$0xff] }
  0x9d   : > { %2396 = vst [vmem:[%s3651_s21 + $0x5a0] sm:$0xff] %v1372_v49  ;;  %2397 = vst [vmem:[%s3651_s21 + $0x5a8] sm:$0xff] %v1373_v50  ;;  %v372_v33 = vld [vmem:[%s3628_s6 + $0x670] sm:$0xff]  ;;  %v1396_v34 = vmul.f32 %v3635_v1, %v370_v31  ;;  %v1397_v35 = vmul.f32 %v3635_v1, %v371_v32  ;;  %v373_v37 = vld [vmem:[%s3628_s6 + $0x678] sm:$0xff] }
  0x9e   : > { %2398 = vst [vmem:[%s3651_s21 + $0x5b0] sm:$0xff] %v1374_v51  ;;  %2399 = vst [vmem:[%s3651_s21 + $0x5b8] sm:$0xff] %v1375_v55  ;;  %v1398_v36 = vmul.f32 %v3635_v1, %v372_v33  ;;  %v374_v38 = vld [vmem:[%s3628_s6 + $0x680] sm:$0xff]  ;;  %v375_v39 = vld [vmem:[%s3628_s6 + $0x688] sm:$0xff]  ;;  %v1399_v40 = vmul.f32 %v3635_v1, %v373_v37 }
  0x9f   : > { %2400 = vst [vmem:[%s3651_s21 + $0x5c0] sm:$0xff] %v1376_v56  ;;  %2401 = vst [vmem:[%s3651_s21 + $0x5c8] sm:$0xff] %v1377_v57  ;;  %v1400_v41 = vmul.f32 %v3635_v1, %v374_v38  ;;  %v1401_v42 = vmul.f32 %v3635_v1, %v375_v39  ;;  %v376_v43 = vld [vmem:[%s3628_s6 + $0x690] sm:$0xff]  ;;  %v377_v44 = vld [vmem:[%s3628_s6 + $0x698] sm:$0xff] }
  0xa0   : > { %2402 = vst [vmem:[%s3651_s21 + $0x5d0] sm:$0xff] %v1378_v61  ;;  %2403 = vst [vmem:[%s3651_s21 + $0x5d8] sm:$0xff] %v1379_v62  ;;  %v378_v45 = vld [vmem:[%s3628_s6 + $0x6a0] sm:$0xff]  ;;  %v1402_v46 = vmul.f32 %v3635_v1, %v376_v43  ;;  %v1403_v47 = vmul.f32 %v3635_v1, %v377_v44  ;;  %v379_v49 = vld [vmem:[%s3628_s6 + $0x6a8] sm:$0xff] }
  0xa1   : > { %2404 = vst [vmem:[%s3651_s21 + $0x5e0] sm:$0xff] %v1380_v63  ;;  %2405 = vst [vmem:[%s3651_s21 + $0x5e8] sm:$0xff] %v1381_v4  ;;  %v1404_v48 = vmul.f32 %v3635_v1, %v378_v45  ;;  %v380_v50 = vld [vmem:[%s3628_s6 + $0x6b0] sm:$0xff]  ;;  %v381_v51 = vld [vmem:[%s3628_s6 + $0x6b8] sm:$0xff]  ;;  %v1405_v52 = vmul.f32 %v3635_v1, %v379_v49 }
  0xa2   : > { %2406 = vst [vmem:[%s3651_s21 + $0x5f0] sm:$0xff] %v1382_v5  ;;  %2407 = vst [vmem:[%s3651_s21 + $0x5f8] sm:$0xff] %v1383_v6  ;;  %v1406_v53 = vmul.f32 %v3635_v1, %v380_v50  ;;  %v1407_v54 = vmul.f32 %v3635_v1, %v381_v51  ;;  %v382_v55 = vld [vmem:[%s3628_s6 + $0x6c0] sm:$0xff]  ;;  %v383_v56 = vld [vmem:[%s3628_s6 + $0x6c8] sm:$0xff] }
  0xa3   : > { %2408 = vst [vmem:[%s3651_s21 + $0x600] sm:$0xff] %v1384_v10  ;;  %2409 = vst [vmem:[%s3651_s21 + $0x608] sm:$0xff] %v1385_v11  ;;  %v384_v57 = vld [vmem:[%s3628_s6 + $0x6d0] sm:$0xff]  ;;  %v1408_v58 = vmul.f32 %v3635_v1, %v382_v55  ;;  %v1409_v59 = vmul.f32 %v3635_v1, %v383_v56  ;;  %v385_v61 = vld [vmem:[%s3628_s6 + $0x6d8] sm:$0xff] }
  0xa4   : > { %2410 = vst [vmem:[%s3651_s21 + $0x610] sm:$0xff] %v1386_v12  ;;  %2411 = vst [vmem:[%s3651_s21 + $0x618] sm:$0xff] %v1387_v16  ;;  %v1410_v60 = vmul.f32 %v3635_v1, %v384_v57  ;;  %v386_v62 = vld [vmem:[%s3628_s6 + $0x6e0] sm:$0xff]  ;;  %v387_v63 = vld [vmem:[%s3628_s6 + $0x6e8] sm:$0xff]  ;;  %v1411_v0 = vmul.f32 %v3635_v1, %v385_v61 }
  0xa5   : > { %2412 = vst [vmem:[%s3651_s21 + $0x620] sm:$0xff] %v1388_v17  ;;  %2413 = vst [vmem:[%s3651_s21 + $0x628] sm:$0xff] %v1389_v18  ;;  %v1412_v2 = vmul.f32 %v3635_v1, %v386_v62  ;;  %v1413_v3 = vmul.f32 %v3635_v1, %v387_v63  ;;  %v388_v4 = vld [vmem:[%s3628_s6 + $0x6f0] sm:$0xff]  ;;  %v389_v5 = vld [vmem:[%s3628_s6 + $0x6f8] sm:$0xff] }
  0xa6   : > { %2414 = vst [vmem:[%s3651_s21 + $0x630] sm:$0xff] %v1390_v22  ;;  %2415 = vst [vmem:[%s3651_s21 + $0x638] sm:$0xff] %v1391_v23  ;;  %v390_v6 = vld [vmem:[%s3628_s6 + $0x700] sm:$0xff]  ;;  %v1414_v7 = vmul.f32 %v3635_v1, %v388_v4  ;;  %v1415_v8 = vmul.f32 %v3635_v1, %v389_v5  ;;  %v391_v10 = vld [vmem:[%s3628_s6 + $0x708] sm:$0xff] }
  0xa7   : > { %2416 = vst [vmem:[%s3651_s21 + $0x640] sm:$0xff] %v1392_v24  ;;  %2417 = vst [vmem:[%s3651_s21 + $0x648] sm:$0xff] %v1393_v28  ;;  %v1416_v9 = vmul.f32 %v3635_v1, %v390_v6  ;;  %v392_v11 = vld [vmem:[%s3628_s6 + $0x710] sm:$0xff]  ;;  %v393_v12 = vld [vmem:[%s3628_s6 + $0x718] sm:$0xff]  ;;  %v1417_v13 = vmul.f32 %v3635_v1, %v391_v10 }
  0xa8   : > { %2418 = vst [vmem:[%s3651_s21 + $0x650] sm:$0xff] %v1394_v29  ;;  %2419 = vst [vmem:[%s3651_s21 + $0x658] sm:$0xff] %v1395_v30  ;;  %v1418_v14 = vmul.f32 %v3635_v1, %v392_v11  ;;  %v1419_v15 = vmul.f32 %v3635_v1, %v393_v12  ;;  %v394_v16 = vld [vmem:[%s3628_s6 + $0x720] sm:$0xff]  ;;  %v395_v17 = vld [vmem:[%s3628_s6 + $0x728] sm:$0xff] }
  0xa9   : > { %2420 = vst [vmem:[%s3651_s21 + $0x660] sm:$0xff] %v1396_v34  ;;  %2421 = vst [vmem:[%s3651_s21 + $0x668] sm:$0xff] %v1397_v35  ;;  %v396_v18 = vld [vmem:[%s3628_s6 + $0x730] sm:$0xff]  ;;  %v1420_v19 = vmul.f32 %v3635_v1, %v394_v16  ;;  %v1421_v20 = vmul.f32 %v3635_v1, %v395_v17  ;;  %v397_v22 = vld [vmem:[%s3628_s6 + $0x738] sm:$0xff] }
  0xaa   : > { %2422 = vst [vmem:[%s3651_s21 + $0x670] sm:$0xff] %v1398_v36  ;;  %2423 = vst [vmem:[%s3651_s21 + $0x678] sm:$0xff] %v1399_v40  ;;  %v1422_v21 = vmul.f32 %v3635_v1, %v396_v18  ;;  %v398_v23 = vld [vmem:[%s3628_s6 + $0x740] sm:$0xff]  ;;  %v399_v24 = vld [vmem:[%s3628_s6 + $0x748] sm:$0xff]  ;;  %v1423_v25 = vmul.f32 %v3635_v1, %v397_v22 }
  0xab   : > { %2424 = vst [vmem:[%s3651_s21 + $0x680] sm:$0xff] %v1400_v41  ;;  %2425 = vst [vmem:[%s3651_s21 + $0x688] sm:$0xff] %v1401_v42  ;;  %v1424_v26 = vmul.f32 %v3635_v1, %v398_v23  ;;  %v1425_v27 = vmul.f32 %v3635_v1, %v399_v24  ;;  %v400_v28 = vld [vmem:[%s3628_s6 + $0x750] sm:$0xff]  ;;  %v401_v29 = vld [vmem:[%s3628_s6 + $0x758] sm:$0xff] }
  0xac   : > { %2426 = vst [vmem:[%s3651_s21 + $0x690] sm:$0xff] %v1402_v46  ;;  %2427 = vst [vmem:[%s3651_s21 + $0x698] sm:$0xff] %v1403_v47  ;;  %v402_v30 = vld [vmem:[%s3628_s6 + $0x760] sm:$0xff]  ;;  %v1426_v31 = vmul.f32 %v3635_v1, %v400_v28  ;;  %v1427_v32 = vmul.f32 %v3635_v1, %v401_v29  ;;  %v403_v34 = vld [vmem:[%s3628_s6 + $0x768] sm:$0xff] }
  0xad   : > { %2428 = vst [vmem:[%s3651_s21 + $0x6a0] sm:$0xff] %v1404_v48  ;;  %2429 = vst [vmem:[%s3651_s21 + $0x6a8] sm:$0xff] %v1405_v52  ;;  %v1428_v33 = vmul.f32 %v3635_v1, %v402_v30  ;;  %v404_v35 = vld [vmem:[%s3628_s6 + $0x770] sm:$0xff]  ;;  %v405_v36 = vld [vmem:[%s3628_s6 + $0x778] sm:$0xff]  ;;  %v1429_v37 = vmul.f32 %v3635_v1, %v403_v34 }
  0xae   : > { %2430 = vst [vmem:[%s3651_s21 + $0x6b0] sm:$0xff] %v1406_v53  ;;  %2431 = vst [vmem:[%s3651_s21 + $0x6b8] sm:$0xff] %v1407_v54  ;;  %v1430_v38 = vmul.f32 %v3635_v1, %v404_v35  ;;  %v1431_v39 = vmul.f32 %v3635_v1, %v405_v36  ;;  %v406_v40 = vld [vmem:[%s3628_s6 + $0x780] sm:$0xff]  ;;  %v407_v41 = vld [vmem:[%s3628_s6 + $0x788] sm:$0xff] }
  0xaf   : > { %2432 = vst [vmem:[%s3651_s21 + $0x6c0] sm:$0xff] %v1408_v58  ;;  %2433 = vst [vmem:[%s3651_s21 + $0x6c8] sm:$0xff] %v1409_v59  ;;  %v408_v42 = vld [vmem:[%s3628_s6 + $0x790] sm:$0xff]  ;;  %v1432_v43 = vmul.f32 %v3635_v1, %v406_v40  ;;  %v1433_v44 = vmul.f32 %v3635_v1, %v407_v41  ;;  %v409_v46 = vld [vmem:[%s3628_s6 + $0x798] sm:$0xff] }
  0xb0   : > { %2434 = vst [vmem:[%s3651_s21 + $0x6d0] sm:$0xff] %v1410_v60  ;;  %2435 = vst [vmem:[%s3651_s21 + $0x6d8] sm:$0xff] %v1411_v0  ;;  %v1434_v45 = vmul.f32 %v3635_v1, %v408_v42  ;;  %v410_v47 = vld [vmem:[%s3628_s6 + $0x7a0] sm:$0xff]  ;;  %v411_v48 = vld [vmem:[%s3628_s6 + $0x7a8] sm:$0xff]  ;;  %v1435_v49 = vmul.f32 %v3635_v1, %v409_v46 }
  0xb1   : > { %2436 = vst [vmem:[%s3651_s21 + $0x6e0] sm:$0xff] %v1412_v2  ;;  %2437 = vst [vmem:[%s3651_s21 + $0x6e8] sm:$0xff] %v1413_v3  ;;  %v1436_v50 = vmul.f32 %v3635_v1, %v410_v47  ;;  %v1437_v51 = vmul.f32 %v3635_v1, %v411_v48  ;;  %v412_v52 = vld [vmem:[%s3628_s6 + $0x7b0] sm:$0xff]  ;;  %v413_v53 = vld [vmem:[%s3628_s6 + $0x7b8] sm:$0xff] }
  0xb2   : > { %2438 = vst [vmem:[%s3651_s21 + $0x6f0] sm:$0xff] %v1414_v7  ;;  %2439 = vst [vmem:[%s3651_s21 + $0x6f8] sm:$0xff] %v1415_v8  ;;  %v414_v54 = vld [vmem:[%s3628_s6 + $0x7c0] sm:$0xff]  ;;  %v1438_v55 = vmul.f32 %v3635_v1, %v412_v52  ;;  %v1439_v56 = vmul.f32 %v3635_v1, %v413_v53  ;;  %v415_v58 = vld [vmem:[%s3628_s6 + $0x7c8] sm:$0xff] }
  0xb3   : > { %2440 = vst [vmem:[%s3651_s21 + $0x700] sm:$0xff] %v1416_v9  ;;  %2441 = vst [vmem:[%s3651_s21 + $0x708] sm:$0xff] %v1417_v13  ;;  %v1440_v57 = vmul.f32 %v3635_v1, %v414_v54  ;;  %v416_v59 = vld [vmem:[%s3628_s6 + $0x7d0] sm:$0xff]  ;;  %v417_v60 = vld [vmem:[%s3628_s6 + $0x7d8] sm:$0xff]  ;;  %v1441_v61 = vmul.f32 %v3635_v1, %v415_v58 }
  0xb4   : > { %2442 = vst [vmem:[%s3651_s21 + $0x710] sm:$0xff] %v1418_v14  ;;  %2443 = vst [vmem:[%s3651_s21 + $0x718] sm:$0xff] %v1419_v15  ;;  %v1442_v62 = vmul.f32 %v3635_v1, %v416_v59  ;;  %v1443_v63 = vmul.f32 %v3635_v1, %v417_v60  ;;  %v418_v0 = vld [vmem:[%s3628_s6 + $0x7e0] sm:$0xff]  ;;  %v419_v2 = vld [vmem:[%s3628_s6 + $0x7e8] sm:$0xff] }
  0xb5   : > { %2444 = vst [vmem:[%s3651_s21 + $0x720] sm:$0xff] %v1420_v19  ;;  %2445 = vst [vmem:[%s3651_s21 + $0x728] sm:$0xff] %v1421_v20  ;;  %v420_v3 = vld [vmem:[%s3628_s6 + $0x7f0] sm:$0xff]  ;;  %v1444_v4 = vmul.f32 %v3635_v1, %v418_v0  ;;  %v1445_v5 = vmul.f32 %v3635_v1, %v419_v2  ;;  %v421_v7 = vld [vmem:[%s3628_s6 + $0x7f8] sm:$0xff] }
  0xb6   : > { %2446 = vst [vmem:[%s3651_s21 + $0x730] sm:$0xff] %v1422_v21  ;;  %2447 = vst [vmem:[%s3651_s21 + $0x738] sm:$0xff] %v1423_v25  ;;  %v1446_v6 = vmul.f32 %v3635_v1, %v420_v3  ;;  %v422_v8 = vld [vmem:[%s3628_s6 + $0x800] sm:$0xff]  ;;  %v423_v9 = vld [vmem:[%s3628_s6 + $0x808] sm:$0xff]  ;;  %v1447_v10 = vmul.f32 %v3635_v1, %v421_v7 }
  0xb7   : > { %2448 = vst [vmem:[%s3651_s21 + $0x740] sm:$0xff] %v1424_v26  ;;  %2449 = vst [vmem:[%s3651_s21 + $0x748] sm:$0xff] %v1425_v27  ;;  %v1448_v11 = vmul.f32 %v3635_v1, %v422_v8  ;;  %v1449_v12 = vmul.f32 %v3635_v1, %v423_v9  ;;  %v424_v13 = vld [vmem:[%s3628_s6 + $0x810] sm:$0xff]  ;;  %v425_v14 = vld [vmem:[%s3628_s6 + $0x818] sm:$0xff] }
  0xb8   : > { %2450 = vst [vmem:[%s3651_s21 + $0x750] sm:$0xff] %v1426_v31  ;;  %2451 = vst [vmem:[%s3651_s21 + $0x758] sm:$0xff] %v1427_v32  ;;  %v426_v15 = vld [vmem:[%s3628_s6 + $0x820] sm:$0xff]  ;;  %v1450_v16 = vmul.f32 %v3635_v1, %v424_v13  ;;  %v1451_v17 = vmul.f32 %v3635_v1, %v425_v14  ;;  %v427_v19 = vld [vmem:[%s3628_s6 + $0x828] sm:$0xff] }
  0xb9   : > { %2452 = vst [vmem:[%s3651_s21 + $0x760] sm:$0xff] %v1428_v33  ;;  %2453 = vst [vmem:[%s3651_s21 + $0x768] sm:$0xff] %v1429_v37  ;;  %v1452_v18 = vmul.f32 %v3635_v1, %v426_v15  ;;  %v428_v20 = vld [vmem:[%s3628_s6 + $0x830] sm:$0xff]  ;;  %v429_v21 = vld [vmem:[%s3628_s6 + $0x838] sm:$0xff]  ;;  %v1453_v22 = vmul.f32 %v3635_v1, %v427_v19 }
  0xba   : > { %2454 = vst [vmem:[%s3651_s21 + $0x770] sm:$0xff] %v1430_v38  ;;  %2455 = vst [vmem:[%s3651_s21 + $0x778] sm:$0xff] %v1431_v39  ;;  %v1454_v23 = vmul.f32 %v3635_v1, %v428_v20  ;;  %v1455_v24 = vmul.f32 %v3635_v1, %v429_v21  ;;  %v430_v25 = vld [vmem:[%s3628_s6 + $0x840] sm:$0xff]  ;;  %v431_v26 = vld [vmem:[%s3628_s6 + $0x848] sm:$0xff] }
  0xbb   : > { %2456 = vst [vmem:[%s3651_s21 + $0x780] sm:$0xff] %v1432_v43  ;;  %2457 = vst [vmem:[%s3651_s21 + $0x788] sm:$0xff] %v1433_v44  ;;  %v432_v27 = vld [vmem:[%s3628_s6 + $0x850] sm:$0xff]  ;;  %v1456_v28 = vmul.f32 %v3635_v1, %v430_v25  ;;  %v1457_v29 = vmul.f32 %v3635_v1, %v431_v26  ;;  %v433_v31 = vld [vmem:[%s3628_s6 + $0x858] sm:$0xff] }
  0xbc   : > { %2458 = vst [vmem:[%s3651_s21 + $0x790] sm:$0xff] %v1434_v45  ;;  %2459 = vst [vmem:[%s3651_s21 + $0x798] sm:$0xff] %v1435_v49  ;;  %v1458_v30 = vmul.f32 %v3635_v1, %v432_v27  ;;  %v434_v32 = vld [vmem:[%s3628_s6 + $0x860] sm:$0xff]  ;;  %v435_v33 = vld [vmem:[%s3628_s6 + $0x868] sm:$0xff]  ;;  %v1459_v34 = vmul.f32 %v3635_v1, %v433_v31 }
  0xbd   : > { %2460 = vst [vmem:[%s3651_s21 + $0x7a0] sm:$0xff] %v1436_v50  ;;  %2461 = vst [vmem:[%s3651_s21 + $0x7a8] sm:$0xff] %v1437_v51  ;;  %v1460_v35 = vmul.f32 %v3635_v1, %v434_v32  ;;  %v1461_v36 = vmul.f32 %v3635_v1, %v435_v33  ;;  %v436_v37 = vld [vmem:[%s3628_s6 + $0x870] sm:$0xff]  ;;  %v437_v38 = vld [vmem:[%s3628_s6 + $0x878] sm:$0xff] }
  0xbe   : > { %2462 = vst [vmem:[%s3651_s21 + $0x7b0] sm:$0xff] %v1438_v55  ;;  %2463 = vst [vmem:[%s3651_s21 + $0x7b8] sm:$0xff] %v1439_v56  ;;  %v438_v39 = vld [vmem:[%s3628_s6 + $0x880] sm:$0xff]  ;;  %v1462_v40 = vmul.f32 %v3635_v1, %v436_v37  ;;  %v1463_v41 = vmul.f32 %v3635_v1, %v437_v38  ;;  %v439_v43 = vld [vmem:[%s3628_s6 + $0x888] sm:$0xff] }
  0xbf   : > { %2464 = vst [vmem:[%s3651_s21 + $0x7c0] sm:$0xff] %v1440_v57  ;;  %2465 = vst [vmem:[%s3651_s21 + $0x7c8] sm:$0xff] %v1441_v61  ;;  %v1464_v42 = vmul.f32 %v3635_v1, %v438_v39  ;;  %v440_v44 = vld [vmem:[%s3628_s6 + $0x890] sm:$0xff]  ;;  %v441_v45 = vld [vmem:[%s3628_s6 + $0x898] sm:$0xff]  ;;  %v1465_v46 = vmul.f32 %v3635_v1, %v439_v43 }
  0xc0   : > { %2466 = vst [vmem:[%s3651_s21 + $0x7d0] sm:$0xff] %v1442_v62  ;;  %2467 = vst [vmem:[%s3651_s21 + $0x7d8] sm:$0xff] %v1443_v63  ;;  %v1466_v47 = vmul.f32 %v3635_v1, %v440_v44  ;;  %v1467_v48 = vmul.f32 %v3635_v1, %v441_v45  ;;  %v442_v49 = vld [vmem:[%s3628_s6 + $0x8a0] sm:$0xff]  ;;  %v443_v50 = vld [vmem:[%s3628_s6 + $0x8a8] sm:$0xff] }
  0xc1   : > { %2468 = vst [vmem:[%s3651_s21 + $0x7e0] sm:$0xff] %v1444_v4  ;;  %2469 = vst [vmem:[%s3651_s21 + $0x7e8] sm:$0xff] %v1445_v5  ;;  %v444_v51 = vld [vmem:[%s3628_s6 + $0x8b0] sm:$0xff]  ;;  %v1468_v52 = vmul.f32 %v3635_v1, %v442_v49  ;;  %v1469_v53 = vmul.f32 %v3635_v1, %v443_v50  ;;  %v445_v55 = vld [vmem:[%s3628_s6 + $0x8b8] sm:$0xff] }
  0xc2   : > { %2470 = vst [vmem:[%s3651_s21 + $0x7f0] sm:$0xff] %v1446_v6  ;;  %2471 = vst [vmem:[%s3651_s21 + $0x7f8] sm:$0xff] %v1447_v10  ;;  %v1470_v54 = vmul.f32 %v3635_v1, %v444_v51  ;;  %v446_v56 = vld [vmem:[%s3628_s6 + $0x8c0] sm:$0xff]  ;;  %v447_v57 = vld [vmem:[%s3628_s6 + $0x8c8] sm:$0xff]  ;;  %v1471_v58 = vmul.f32 %v3635_v1, %v445_v55 }
  0xc3   : > { %2472 = vst [vmem:[%s3651_s21 + $0x800] sm:$0xff] %v1448_v11  ;;  %2473 = vst [vmem:[%s3651_s21 + $0x808] sm:$0xff] %v1449_v12  ;;  %v1472_v59 = vmul.f32 %v3635_v1, %v446_v56  ;;  %v1473_v60 = vmul.f32 %v3635_v1, %v447_v57  ;;  %v448_v61 = vld [vmem:[%s3628_s6 + $0x8d0] sm:$0xff]  ;;  %v449_v62 = vld [vmem:[%s3628_s6 + $0x8d8] sm:$0xff] }
  0xc4   : > { %2474 = vst [vmem:[%s3651_s21 + $0x810] sm:$0xff] %v1450_v16  ;;  %2475 = vst [vmem:[%s3651_s21 + $0x818] sm:$0xff] %v1451_v17  ;;  %v450_v63 = vld [vmem:[%s3628_s6 + $0x8e0] sm:$0xff]  ;;  %v1474_v0 = vmul.f32 %v3635_v1, %v448_v61  ;;  %v1475_v2 = vmul.f32 %v3635_v1, %v449_v62  ;;  %v451_v4 = vld [vmem:[%s3628_s6 + $0x8e8] sm:$0xff] }
  0xc5   : > { %2476 = vst [vmem:[%s3651_s21 + $0x820] sm:$0xff] %v1452_v18  ;;  %2477 = vst [vmem:[%s3651_s21 + $0x828] sm:$0xff] %v1453_v22  ;;  %v1476_v3 = vmul.f32 %v3635_v1, %v450_v63  ;;  %v452_v5 = vld [vmem:[%s3628_s6 + $0x8f0] sm:$0xff]  ;;  %v453_v6 = vld [vmem:[%s3628_s6 + $0x8f8] sm:$0xff]  ;;  %v1477_v7 = vmul.f32 %v3635_v1, %v451_v4 }
  0xc6   : > { %2478 = vst [vmem:[%s3651_s21 + $0x830] sm:$0xff] %v1454_v23  ;;  %2479 = vst [vmem:[%s3651_s21 + $0x838] sm:$0xff] %v1455_v24  ;;  %v1478_v8 = vmul.f32 %v3635_v1, %v452_v5  ;;  %v1479_v9 = vmul.f32 %v3635_v1, %v453_v6  ;;  %v454_v10 = vld [vmem:[%s3628_s6 + $0x900] sm:$0xff]  ;;  %v455_v11 = vld [vmem:[%s3628_s6 + $0x908] sm:$0xff] }
  0xc7   : > { %2480 = vst [vmem:[%s3651_s21 + $0x840] sm:$0xff] %v1456_v28  ;;  %2481 = vst [vmem:[%s3651_s21 + $0x848] sm:$0xff] %v1457_v29  ;;  %v456_v12 = vld [vmem:[%s3628_s6 + $0x910] sm:$0xff]  ;;  %v1480_v13 = vmul.f32 %v3635_v1, %v454_v10  ;;  %v1481_v14 = vmul.f32 %v3635_v1, %v455_v11  ;;  %v457_v16 = vld [vmem:[%s3628_s6 + $0x918] sm:$0xff] }
  0xc8   : > { %2482 = vst [vmem:[%s3651_s21 + $0x850] sm:$0xff] %v1458_v30  ;;  %2483 = vst [vmem:[%s3651_s21 + $0x858] sm:$0xff] %v1459_v34  ;;  %v1482_v15 = vmul.f32 %v3635_v1, %v456_v12  ;;  %v458_v17 = vld [vmem:[%s3628_s6 + $0x920] sm:$0xff]  ;;  %v459_v18 = vld [vmem:[%s3628_s6 + $0x928] sm:$0xff]  ;;  %v1483_v19 = vmul.f32 %v3635_v1, %v457_v16 }
  0xc9   : > { %2484 = vst [vmem:[%s3651_s21 + $0x860] sm:$0xff] %v1460_v35  ;;  %2485 = vst [vmem:[%s3651_s21 + $0x868] sm:$0xff] %v1461_v36  ;;  %v1484_v20 = vmul.f32 %v3635_v1, %v458_v17  ;;  %v1485_v21 = vmul.f32 %v3635_v1, %v459_v18  ;;  %v460_v22 = vld [vmem:[%s3628_s6 + $0x930] sm:$0xff]  ;;  %v461_v23 = vld [vmem:[%s3628_s6 + $0x938] sm:$0xff] }
  0xca   : > { %2486 = vst [vmem:[%s3651_s21 + $0x870] sm:$0xff] %v1462_v40  ;;  %2487 = vst [vmem:[%s3651_s21 + $0x878] sm:$0xff] %v1463_v41  ;;  %v462_v24 = vld [vmem:[%s3628_s6 + $0x940] sm:$0xff]  ;;  %v1486_v25 = vmul.f32 %v3635_v1, %v460_v22  ;;  %v1487_v26 = vmul.f32 %v3635_v1, %v461_v23  ;;  %v463_v28 = vld [vmem:[%s3628_s6 + $0x948] sm:$0xff] }
  0xcb   : > { %2488 = vst [vmem:[%s3651_s21 + $0x880] sm:$0xff] %v1464_v42  ;;  %2489 = vst [vmem:[%s3651_s21 + $0x888] sm:$0xff] %v1465_v46  ;;  %v1488_v27 = vmul.f32 %v3635_v1, %v462_v24  ;;  %v464_v29 = vld [vmem:[%s3628_s6 + $0x950] sm:$0xff]  ;;  %v465_v30 = vld [vmem:[%s3628_s6 + $0x958] sm:$0xff]  ;;  %v1489_v31 = vmul.f32 %v3635_v1, %v463_v28 }
  0xcc   : > { %2490 = vst [vmem:[%s3651_s21 + $0x890] sm:$0xff] %v1466_v47  ;;  %2491 = vst [vmem:[%s3651_s21 + $0x898] sm:$0xff] %v1467_v48  ;;  %v1490_v32 = vmul.f32 %v3635_v1, %v464_v29  ;;  %v1491_v33 = vmul.f32 %v3635_v1, %v465_v30  ;;  %v466_v34 = vld [vmem:[%s3628_s6 + $0x960] sm:$0xff]  ;;  %v467_v35 = vld [vmem:[%s3628_s6 + $0x968] sm:$0xff] }
  0xcd   : > { %2492 = vst [vmem:[%s3651_s21 + $0x8a0] sm:$0xff] %v1468_v52  ;;  %2493 = vst [vmem:[%s3651_s21 + $0x8a8] sm:$0xff] %v1469_v53  ;;  %v468_v36 = vld [vmem:[%s3628_s6 + $0x970] sm:$0xff]  ;;  %v1492_v37 = vmul.f32 %v3635_v1, %v466_v34  ;;  %v1493_v38 = vmul.f32 %v3635_v1, %v467_v35  ;;  %v469_v40 = vld [vmem:[%s3628_s6 + $0x978] sm:$0xff] }
  0xce   : > { %2494 = vst [vmem:[%s3651_s21 + $0x8b0] sm:$0xff] %v1470_v54  ;;  %2495 = vst [vmem:[%s3651_s21 + $0x8b8] sm:$0xff] %v1471_v58  ;;  %v1494_v39 = vmul.f32 %v3635_v1, %v468_v36  ;;  %v470_v41 = vld [vmem:[%s3628_s6 + $0x980] sm:$0xff]  ;;  %v471_v42 = vld [vmem:[%s3628_s6 + $0x988] sm:$0xff]  ;;  %v1495_v43 = vmul.f32 %v3635_v1, %v469_v40 }
  0xcf   : > { %2496 = vst [vmem:[%s3651_s21 + $0x8c0] sm:$0xff] %v1472_v59  ;;  %2497 = vst [vmem:[%s3651_s21 + $0x8c8] sm:$0xff] %v1473_v60  ;;  %v1496_v44 = vmul.f32 %v3635_v1, %v470_v41  ;;  %v1497_v45 = vmul.f32 %v3635_v1, %v471_v42  ;;  %v472_v46 = vld [vmem:[%s3628_s6 + $0x990] sm:$0xff]  ;;  %v473_v47 = vld [vmem:[%s3628_s6 + $0x998] sm:$0xff] }
  0xd0   : > { %2498 = vst [vmem:[%s3651_s21 + $0x8d0] sm:$0xff] %v1474_v0  ;;  %2499 = vst [vmem:[%s3651_s21 + $0x8d8] sm:$0xff] %v1475_v2  ;;  %v474_v48 = vld [vmem:[%s3628_s6 + $0x9a0] sm:$0xff]  ;;  %v1498_v49 = vmul.f32 %v3635_v1, %v472_v46  ;;  %v1499_v50 = vmul.f32 %v3635_v1, %v473_v47  ;;  %v475_v52 = vld [vmem:[%s3628_s6 + $0x9a8] sm:$0xff] }
  0xd1   : > { %2500 = vst [vmem:[%s3651_s21 + $0x8e0] sm:$0xff] %v1476_v3  ;;  %2501 = vst [vmem:[%s3651_s21 + $0x8e8] sm:$0xff] %v1477_v7  ;;  %v1500_v51 = vmul.f32 %v3635_v1, %v474_v48  ;;  %v476_v53 = vld [vmem:[%s3628_s6 + $0x9b0] sm:$0xff]  ;;  %v477_v54 = vld [vmem:[%s3628_s6 + $0x9b8] sm:$0xff]  ;;  %v1501_v55 = vmul.f32 %v3635_v1, %v475_v52 }
  0xd2   : > { %2502 = vst [vmem:[%s3651_s21 + $0x8f0] sm:$0xff] %v1478_v8  ;;  %2503 = vst [vmem:[%s3651_s21 + $0x8f8] sm:$0xff] %v1479_v9  ;;  %v1502_v56 = vmul.f32 %v3635_v1, %v476_v53  ;;  %v1503_v57 = vmul.f32 %v3635_v1, %v477_v54  ;;  %v478_v58 = vld [vmem:[%s3628_s6 + $0x9c0] sm:$0xff]  ;;  %v479_v59 = vld [vmem:[%s3628_s6 + $0x9c8] sm:$0xff] }
  0xd3   : > { %2504 = vst [vmem:[%s3651_s21 + $0x900] sm:$0xff] %v1480_v13  ;;  %2505 = vst [vmem:[%s3651_s21 + $0x908] sm:$0xff] %v1481_v14  ;;  %v480_v60 = vld [vmem:[%s3628_s6 + $0x9d0] sm:$0xff]  ;;  %v1504_v61 = vmul.f32 %v3635_v1, %v478_v58  ;;  %v1505_v62 = vmul.f32 %v3635_v1, %v479_v59  ;;  %v481_v0 = vld [vmem:[%s3628_s6 + $0x9d8] sm:$0xff] }
  0xd4   : > { %2506 = vst [vmem:[%s3651_s21 + $0x910] sm:$0xff] %v1482_v15  ;;  %2507 = vst [vmem:[%s3651_s21 + $0x918] sm:$0xff] %v1483_v19  ;;  %v1506_v63 = vmul.f32 %v3635_v1, %v480_v60  ;;  %v482_v2 = vld [vmem:[%s3628_s6 + $0x9e0] sm:$0xff]  ;;  %v483_v3 = vld [vmem:[%s3628_s6 + $0x9e8] sm:$0xff]  ;;  %v1507_v4 = vmul.f32 %v3635_v1, %v481_v0 }
  0xd5   : > { %2508 = vst [vmem:[%s3651_s21 + $0x920] sm:$0xff] %v1484_v20  ;;  %2509 = vst [vmem:[%s3651_s21 + $0x928] sm:$0xff] %v1485_v21  ;;  %v1508_v5 = vmul.f32 %v3635_v1, %v482_v2  ;;  %v1509_v6 = vmul.f32 %v3635_v1, %v483_v3  ;;  %v484_v7 = vld [vmem:[%s3628_s6 + $0x9f0] sm:$0xff]  ;;  %v485_v8 = vld [vmem:[%s3628_s6 + $0x9f8] sm:$0xff] }
  0xd6   : > { %2510 = vst [vmem:[%s3651_s21 + $0x930] sm:$0xff] %v1486_v25  ;;  %2511 = vst [vmem:[%s3651_s21 + $0x938] sm:$0xff] %v1487_v26  ;;  %v486_v9 = vld [vmem:[%s3628_s6 + $0xa00] sm:$0xff]  ;;  %v1510_v10 = vmul.f32 %v3635_v1, %v484_v7  ;;  %v1511_v11 = vmul.f32 %v3635_v1, %v485_v8  ;;  %v487_v13 = vld [vmem:[%s3628_s6 + $0xa08] sm:$0xff] }
  0xd7   : > { %2512 = vst [vmem:[%s3651_s21 + $0x940] sm:$0xff] %v1488_v27  ;;  %2513 = vst [vmem:[%s3651_s21 + $0x948] sm:$0xff] %v1489_v31  ;;  %v1512_v12 = vmul.f32 %v3635_v1, %v486_v9  ;;  %v488_v14 = vld [vmem:[%s3628_s6 + $0xa10] sm:$0xff]  ;;  %v489_v15 = vld [vmem:[%s3628_s6 + $0xa18] sm:$0xff]  ;;  %v1513_v16 = vmul.f32 %v3635_v1, %v487_v13 }
  0xd8   : > { %2514 = vst [vmem:[%s3651_s21 + $0x950] sm:$0xff] %v1490_v32  ;;  %2515 = vst [vmem:[%s3651_s21 + $0x958] sm:$0xff] %v1491_v33  ;;  %v1514_v17 = vmul.f32 %v3635_v1, %v488_v14  ;;  %v1515_v18 = vmul.f32 %v3635_v1, %v489_v15  ;;  %v490_v19 = vld [vmem:[%s3628_s6 + $0xa20] sm:$0xff]  ;;  %v491_v20 = vld [vmem:[%s3628_s6 + $0xa28] sm:$0xff] }
  0xd9   : > { %2516 = vst [vmem:[%s3651_s21 + $0x960] sm:$0xff] %v1492_v37  ;;  %2517 = vst [vmem:[%s3651_s21 + $0x968] sm:$0xff] %v1493_v38  ;;  %v492_v21 = vld [vmem:[%s3628_s6 + $0xa30] sm:$0xff]  ;;  %v1516_v22 = vmul.f32 %v3635_v1, %v490_v19  ;;  %v1517_v23 = vmul.f32 %v3635_v1, %v491_v20  ;;  %v493_v25 = vld [vmem:[%s3628_s6 + $0xa38] sm:$0xff] }
  0xda   : > { %2518 = vst [vmem:[%s3651_s21 + $0x970] sm:$0xff] %v1494_v39  ;;  %2519 = vst [vmem:[%s3651_s21 + $0x978] sm:$0xff] %v1495_v43  ;;  %v1518_v24 = vmul.f32 %v3635_v1, %v492_v21  ;;  %v494_v26 = vld [vmem:[%s3628_s6 + $0xa40] sm:$0xff]  ;;  %v495_v27 = vld [vmem:[%s3628_s6 + $0xa48] sm:$0xff]  ;;  %v1519_v28 = vmul.f32 %v3635_v1, %v493_v25 }
  0xdb   : > { %2520 = vst [vmem:[%s3651_s21 + $0x980] sm:$0xff] %v1496_v44  ;;  %2521 = vst [vmem:[%s3651_s21 + $0x988] sm:$0xff] %v1497_v45  ;;  %v1520_v29 = vmul.f32 %v3635_v1, %v494_v26  ;;  %v1521_v30 = vmul.f32 %v3635_v1, %v495_v27  ;;  %v496_v31 = vld [vmem:[%s3628_s6 + $0xa50] sm:$0xff]  ;;  %v497_v32 = vld [vmem:[%s3628_s6 + $0xa58] sm:$0xff] }
  0xdc   : > { %2522 = vst [vmem:[%s3651_s21 + $0x990] sm:$0xff] %v1498_v49  ;;  %2523 = vst [vmem:[%s3651_s21 + $0x998] sm:$0xff] %v1499_v50  ;;  %v498_v33 = vld [vmem:[%s3628_s6 + $0xa60] sm:$0xff]  ;;  %v1522_v34 = vmul.f32 %v3635_v1, %v496_v31  ;;  %v1523_v35 = vmul.f32 %v3635_v1, %v497_v32  ;;  %v499_v37 = vld [vmem:[%s3628_s6 + $0xa68] sm:$0xff] }
  0xdd   : > { %2524 = vst [vmem:[%s3651_s21 + $0x9a0] sm:$0xff] %v1500_v51  ;;  %2525 = vst [vmem:[%s3651_s21 + $0x9a8] sm:$0xff] %v1501_v55  ;;  %v1524_v36 = vmul.f32 %v3635_v1, %v498_v33  ;;  %v500_v38 = vld [vmem:[%s3628_s6 + $0xa70] sm:$0xff]  ;;  %v501_v39 = vld [vmem:[%s3628_s6 + $0xa78] sm:$0xff]  ;;  %v1525_v40 = vmul.f32 %v3635_v1, %v499_v37 }
  0xde   : > { %2526 = vst [vmem:[%s3651_s21 + $0x9b0] sm:$0xff] %v1502_v56  ;;  %2527 = vst [vmem:[%s3651_s21 + $0x9b8] sm:$0xff] %v1503_v57  ;;  %v1526_v41 = vmul.f32 %v3635_v1, %v500_v38  ;;  %v1527_v42 = vmul.f32 %v3635_v1, %v501_v39  ;;  %v502_v43 = vld [vmem:[%s3628_s6 + $0xa80] sm:$0xff]  ;;  %v503_v44 = vld [vmem:[%s3628_s6 + $0xa88] sm:$0xff] }
  0xdf   : > { %2528 = vst [vmem:[%s3651_s21 + $0x9c0] sm:$0xff] %v1504_v61  ;;  %2529 = vst [vmem:[%s3651_s21 + $0x9c8] sm:$0xff] %v1505_v62  ;;  %v504_v45 = vld [vmem:[%s3628_s6 + $0xa90] sm:$0xff]  ;;  %v1528_v46 = vmul.f32 %v3635_v1, %v502_v43  ;;  %v1529_v47 = vmul.f32 %v3635_v1, %v503_v44  ;;  %v505_v49 = vld [vmem:[%s3628_s6 + $0xa98] sm:$0xff] }
  0xe0   : > { %2530 = vst [vmem:[%s3651_s21 + $0x9d0] sm:$0xff] %v1506_v63  ;;  %2531 = vst [vmem:[%s3651_s21 + $0x9d8] sm:$0xff] %v1507_v4  ;;  %v1530_v48 = vmul.f32 %v3635_v1, %v504_v45  ;;  %v506_v50 = vld [vmem:[%s3628_s6 + $0xaa0] sm:$0xff]  ;;  %v507_v51 = vld [vmem:[%s3628_s6 + $0xaa8] sm:$0xff]  ;;  %v1531_v52 = vmul.f32 %v3635_v1, %v505_v49 }
  0xe1   : > { %2532 = vst [vmem:[%s3651_s21 + $0x9e0] sm:$0xff] %v1508_v5  ;;  %2533 = vst [vmem:[%s3651_s21 + $0x9e8] sm:$0xff] %v1509_v6  ;;  %v1532_v53 = vmul.f32 %v3635_v1, %v506_v50  ;;  %v1533_v54 = vmul.f32 %v3635_v1, %v507_v51  ;;  %v508_v55 = vld [vmem:[%s3628_s6 + $0xab0] sm:$0xff]  ;;  %v509_v56 = vld [vmem:[%s3628_s6 + $0xab8] sm:$0xff] }
  0xe2   : > { %2534 = vst [vmem:[%s3651_s21 + $0x9f0] sm:$0xff] %v1510_v10  ;;  %2535 = vst [vmem:[%s3651_s21 + $0x9f8] sm:$0xff] %v1511_v11  ;;  %v510_v57 = vld [vmem:[%s3628_s6 + $0xac0] sm:$0xff]  ;;  %v1534_v58 = vmul.f32 %v3635_v1, %v508_v55  ;;  %v1535_v59 = vmul.f32 %v3635_v1, %v509_v56  ;;  %v511_v61 = vld [vmem:[%s3628_s6 + $0xac8] sm:$0xff] }
  0xe3   : > { %2536 = vst [vmem:[%s3651_s21 + $0xa00] sm:$0xff] %v1512_v12  ;;  %2537 = vst [vmem:[%s3651_s21 + $0xa08] sm:$0xff] %v1513_v16  ;;  %v1536_v60 = vmul.f32 %v3635_v1, %v510_v57  ;;  %v512_v62 = vld [vmem:[%s3628_s6 + $0xad0] sm:$0xff]  ;;  %v513_v63 = vld [vmem:[%s3628_s6 + $0xad8] sm:$0xff]  ;;  %v1537_v0 = vmul.f32 %v3635_v1, %v511_v61 }
  0xe4   : > { %2538 = vst [vmem:[%s3651_s21 + $0xa10] sm:$0xff] %v1514_v17  ;;  %2539 = vst [vmem:[%s3651_s21 + $0xa18] sm:$0xff] %v1515_v18  ;;  %v1538_v2 = vmul.f32 %v3635_v1, %v512_v62  ;;  %v1539_v3 = vmul.f32 %v3635_v1, %v513_v63  ;;  %v514_v4 = vld [vmem:[%s3628_s6 + $0xae0] sm:$0xff]  ;;  %v515_v5 = vld [vmem:[%s3628_s6 + $0xae8] sm:$0xff] }
  0xe5   : > { %2540 = vst [vmem:[%s3651_s21 + $0xa20] sm:$0xff] %v1516_v22  ;;  %2541 = vst [vmem:[%s3651_s21 + $0xa28] sm:$0xff] %v1517_v23  ;;  %v516_v6 = vld [vmem:[%s3628_s6 + $0xaf0] sm:$0xff]  ;;  %v1540_v7 = vmul.f32 %v3635_v1, %v514_v4  ;;  %v1541_v8 = vmul.f32 %v3635_v1, %v515_v5  ;;  %v517_v10 = vld [vmem:[%s3628_s6 + $0xaf8] sm:$0xff] }
  0xe6   : > { %2542 = vst [vmem:[%s3651_s21 + $0xa30] sm:$0xff] %v1518_v24  ;;  %2543 = vst [vmem:[%s3651_s21 + $0xa38] sm:$0xff] %v1519_v28  ;;  %v1542_v9 = vmul.f32 %v3635_v1, %v516_v6  ;;  %v518_v11 = vld [vmem:[%s3628_s6 + $0xb00] sm:$0xff]  ;;  %v519_v12 = vld [vmem:[%s3628_s6 + $0xb08] sm:$0xff]  ;;  %v1543_v13 = vmul.f32 %v3635_v1, %v517_v10 }
  0xe7   : > { %2544 = vst [vmem:[%s3651_s21 + $0xa40] sm:$0xff] %v1520_v29  ;;  %2545 = vst [vmem:[%s3651_s21 + $0xa48] sm:$0xff] %v1521_v30  ;;  %v1544_v14 = vmul.f32 %v3635_v1, %v518_v11  ;;  %v1545_v15 = vmul.f32 %v3635_v1, %v519_v12  ;;  %v520_v16 = vld [vmem:[%s3628_s6 + $0xb10] sm:$0xff]  ;;  %v521_v17 = vld [vmem:[%s3628_s6 + $0xb18] sm:$0xff] }
  0xe8   : > { %2546 = vst [vmem:[%s3651_s21 + $0xa50] sm:$0xff] %v1522_v34  ;;  %2547 = vst [vmem:[%s3651_s21 + $0xa58] sm:$0xff] %v1523_v35  ;;  %v522_v18 = vld [vmem:[%s3628_s6 + $0xb20] sm:$0xff]  ;;  %v1546_v19 = vmul.f32 %v3635_v1, %v520_v16  ;;  %v1547_v20 = vmul.f32 %v3635_v1, %v521_v17  ;;  %v523_v22 = vld [vmem:[%s3628_s6 + $0xb28] sm:$0xff] }
  0xe9   : > { %2548 = vst [vmem:[%s3651_s21 + $0xa60] sm:$0xff] %v1524_v36  ;;  %2549 = vst [vmem:[%s3651_s21 + $0xa68] sm:$0xff] %v1525_v40  ;;  %v1548_v21 = vmul.f32 %v3635_v1, %v522_v18  ;;  %v524_v23 = vld [vmem:[%s3628_s6 + $0xb30] sm:$0xff]  ;;  %v525_v24 = vld [vmem:[%s3628_s6 + $0xb38] sm:$0xff]  ;;  %v1549_v25 = vmul.f32 %v3635_v1, %v523_v22 }
  0xea   : > { %2550 = vst [vmem:[%s3651_s21 + $0xa70] sm:$0xff] %v1526_v41  ;;  %2551 = vst [vmem:[%s3651_s21 + $0xa78] sm:$0xff] %v1527_v42  ;;  %v1550_v26 = vmul.f32 %v3635_v1, %v524_v23  ;;  %v1551_v27 = vmul.f32 %v3635_v1, %v525_v24  ;;  %v526_v28 = vld [vmem:[%s3628_s6 + $0xb40] sm:$0xff]  ;;  %v527_v29 = vld [vmem:[%s3628_s6 + $0xb48] sm:$0xff] }
  0xeb   : > { %2552 = vst [vmem:[%s3651_s21 + $0xa80] sm:$0xff] %v1528_v46  ;;  %2553 = vst [vmem:[%s3651_s21 + $0xa88] sm:$0xff] %v1529_v47  ;;  %v528_v30 = vld [vmem:[%s3628_s6 + $0xb50] sm:$0xff]  ;;  %v1552_v31 = vmul.f32 %v3635_v1, %v526_v28  ;;  %v1553_v32 = vmul.f32 %v3635_v1, %v527_v29  ;;  %v529_v34 = vld [vmem:[%s3628_s6 + $0xb58] sm:$0xff] }
  0xec   : > { %2554 = vst [vmem:[%s3651_s21 + $0xa90] sm:$0xff] %v1530_v48  ;;  %2555 = vst [vmem:[%s3651_s21 + $0xa98] sm:$0xff] %v1531_v52  ;;  %v1554_v33 = vmul.f32 %v3635_v1, %v528_v30  ;;  %v530_v35 = vld [vmem:[%s3628_s6 + $0xb60] sm:$0xff]  ;;  %v531_v36 = vld [vmem:[%s3628_s6 + $0xb68] sm:$0xff]  ;;  %v1555_v37 = vmul.f32 %v3635_v1, %v529_v34 }
  0xed   : > { %2556 = vst [vmem:[%s3651_s21 + $0xaa0] sm:$0xff] %v1532_v53  ;;  %2557 = vst [vmem:[%s3651_s21 + $0xaa8] sm:$0xff] %v1533_v54  ;;  %v1556_v38 = vmul.f32 %v3635_v1, %v530_v35  ;;  %v1557_v39 = vmul.f32 %v3635_v1, %v531_v36  ;;  %v532_v40 = vld [vmem:[%s3628_s6 + $0xb70] sm:$0xff]  ;;  %v533_v41 = vld [vmem:[%s3628_s6 + $0xb78] sm:$0xff] }
  0xee   : > { %2558 = vst [vmem:[%s3651_s21 + $0xab0] sm:$0xff] %v1534_v58  ;;  %2559 = vst [vmem:[%s3651_s21 + $0xab8] sm:$0xff] %v1535_v59  ;;  %v534_v42 = vld [vmem:[%s3628_s6 + $0xb80] sm:$0xff]  ;;  %v1558_v43 = vmul.f32 %v3635_v1, %v532_v40  ;;  %v1559_v44 = vmul.f32 %v3635_v1, %v533_v41  ;;  %v535_v46 = vld [vmem:[%s3628_s6 + $0xb88] sm:$0xff] }
  0xef   : > { %2560 = vst [vmem:[%s3651_s21 + $0xac0] sm:$0xff] %v1536_v60  ;;  %2561 = vst [vmem:[%s3651_s21 + $0xac8] sm:$0xff] %v1537_v0  ;;  %v1560_v45 = vmul.f32 %v3635_v1, %v534_v42  ;;  %v536_v47 = vld [vmem:[%s3628_s6 + $0xb90] sm:$0xff]  ;;  %v537_v48 = vld [vmem:[%s3628_s6 + $0xb98] sm:$0xff]  ;;  %v1561_v49 = vmul.f32 %v3635_v1, %v535_v46 }
  0xf0   : > { %2562 = vst [vmem:[%s3651_s21 + $0xad0] sm:$0xff] %v1538_v2  ;;  %2563 = vst [vmem:[%s3651_s21 + $0xad8] sm:$0xff] %v1539_v3  ;;  %v1562_v50 = vmul.f32 %v3635_v1, %v536_v47  ;;  %v1563_v51 = vmul.f32 %v3635_v1, %v537_v48  ;;  %v538_v52 = vld [vmem:[%s3628_s6 + $0xba0] sm:$0xff]  ;;  %v539_v53 = vld [vmem:[%s3628_s6 + $0xba8] sm:$0xff] }
  0xf1   : > { %2564 = vst [vmem:[%s3651_s21 + $0xae0] sm:$0xff] %v1540_v7  ;;  %2565 = vst [vmem:[%s3651_s21 + $0xae8] sm:$0xff] %v1541_v8  ;;  %v540_v54 = vld [vmem:[%s3628_s6 + $0xbb0] sm:$0xff]  ;;  %v1564_v55 = vmul.f32 %v3635_v1, %v538_v52  ;;  %v1565_v56 = vmul.f32 %v3635_v1, %v539_v53  ;;  %v541_v58 = vld [vmem:[%s3628_s6 + $0xbb8] sm:$0xff] }
  0xf2   : > { %2566 = vst [vmem:[%s3651_s21 + $0xaf0] sm:$0xff] %v1542_v9  ;;  %2567 = vst [vmem:[%s3651_s21 + $0xaf8] sm:$0xff] %v1543_v13  ;;  %v1566_v57 = vmul.f32 %v3635_v1, %v540_v54  ;;  %v542_v59 = vld [vmem:[%s3628_s6 + $0xbc0] sm:$0xff]  ;;  %v543_v60 = vld [vmem:[%s3628_s6 + $0xbc8] sm:$0xff]  ;;  %v1567_v61 = vmul.f32 %v3635_v1, %v541_v58 }
  0xf3   : > { %2568 = vst [vmem:[%s3651_s21 + $0xb00] sm:$0xff] %v1544_v14  ;;  %2569 = vst [vmem:[%s3651_s21 + $0xb08] sm:$0xff] %v1545_v15  ;;  %v1568_v62 = vmul.f32 %v3635_v1, %v542_v59  ;;  %v1569_v63 = vmul.f32 %v3635_v1, %v543_v60  ;;  %v544_v0 = vld [vmem:[%s3628_s6 + $0xbd0] sm:$0xff]  ;;  %v545_v2 = vld [vmem:[%s3628_s6 + $0xbd8] sm:$0xff] }
  0xf4   : > { %2570 = vst [vmem:[%s3651_s21 + $0xb10] sm:$0xff] %v1546_v19  ;;  %2571 = vst [vmem:[%s3651_s21 + $0xb18] sm:$0xff] %v1547_v20  ;;  %v546_v3 = vld [vmem:[%s3628_s6 + $0xbe0] sm:$0xff]  ;;  %v1570_v4 = vmul.f32 %v3635_v1, %v544_v0  ;;  %v1571_v5 = vmul.f32 %v3635_v1, %v545_v2  ;;  %v547_v7 = vld [vmem:[%s3628_s6 + $0xbe8] sm:$0xff] }
  0xf5   : > { %2572 = vst [vmem:[%s3651_s21 + $0xb20] sm:$0xff] %v1548_v21  ;;  %2573 = vst [vmem:[%s3651_s21 + $0xb28] sm:$0xff] %v1549_v25  ;;  %v1572_v6 = vmul.f32 %v3635_v1, %v546_v3  ;;  %v548_v8 = vld [vmem:[%s3628_s6 + $0xbf0] sm:$0xff]  ;;  %v549_v9 = vld [vmem:[%s3628_s6 + $0xbf8] sm:$0xff]  ;;  %v1573_v10 = vmul.f32 %v3635_v1, %v547_v7 }
  0xf6   : > { %2574 = vst [vmem:[%s3651_s21 + $0xb30] sm:$0xff] %v1550_v26  ;;  %2575 = vst [vmem:[%s3651_s21 + $0xb38] sm:$0xff] %v1551_v27  ;;  %v1574_v11 = vmul.f32 %v3635_v1, %v548_v8  ;;  %v1575_v12 = vmul.f32 %v3635_v1, %v549_v9  ;;  %v550_v13 = vld [vmem:[%s3628_s6 + $0xc00] sm:$0xff]  ;;  %v551_v14 = vld [vmem:[%s3628_s6 + $0xc08] sm:$0xff] }
  0xf7   : > { %2576 = vst [vmem:[%s3651_s21 + $0xb40] sm:$0xff] %v1552_v31  ;;  %2577 = vst [vmem:[%s3651_s21 + $0xb48] sm:$0xff] %v1553_v32  ;;  %v552_v15 = vld [vmem:[%s3628_s6 + $0xc10] sm:$0xff]  ;;  %v1576_v16 = vmul.f32 %v3635_v1, %v550_v13  ;;  %v1577_v17 = vmul.f32 %v3635_v1, %v551_v14  ;;  %v553_v19 = vld [vmem:[%s3628_s6 + $0xc18] sm:$0xff] }
  0xf8   : > { %2578 = vst [vmem:[%s3651_s21 + $0xb50] sm:$0xff] %v1554_v33  ;;  %2579 = vst [vmem:[%s3651_s21 + $0xb58] sm:$0xff] %v1555_v37  ;;  %v1578_v18 = vmul.f32 %v3635_v1, %v552_v15  ;;  %v554_v20 = vld [vmem:[%s3628_s6 + $0xc20] sm:$0xff]  ;;  %v555_v21 = vld [vmem:[%s3628_s6 + $0xc28] sm:$0xff]  ;;  %v1579_v22 = vmul.f32 %v3635_v1, %v553_v19 }
  0xf9   : > { %2580 = vst [vmem:[%s3651_s21 + $0xb60] sm:$0xff] %v1556_v38  ;;  %2581 = vst [vmem:[%s3651_s21 + $0xb68] sm:$0xff] %v1557_v39  ;;  %v1580_v23 = vmul.f32 %v3635_v1, %v554_v20  ;;  %v1581_v24 = vmul.f32 %v3635_v1, %v555_v21  ;;  %v556_v25 = vld [vmem:[%s3628_s6 + $0xc30] sm:$0xff]  ;;  %v557_v26 = vld [vmem:[%s3628_s6 + $0xc38] sm:$0xff] }
  0xfa   : > { %2582 = vst [vmem:[%s3651_s21 + $0xb70] sm:$0xff] %v1558_v43  ;;  %2583 = vst [vmem:[%s3651_s21 + $0xb78] sm:$0xff] %v1559_v44  ;;  %v558_v27 = vld [vmem:[%s3628_s6 + $0xc40] sm:$0xff]  ;;  %v1582_v28 = vmul.f32 %v3635_v1, %v556_v25  ;;  %v1583_v29 = vmul.f32 %v3635_v1, %v557_v26  ;;  %v559_v31 = vld [vmem:[%s3628_s6 + $0xc48] sm:$0xff] }
  0xfb   : > { %2584 = vst [vmem:[%s3651_s21 + $0xb80] sm:$0xff] %v1560_v45  ;;  %2585 = vst [vmem:[%s3651_s21 + $0xb88] sm:$0xff] %v1561_v49  ;;  %v1584_v30 = vmul.f32 %v3635_v1, %v558_v27  ;;  %v560_v32 = vld [vmem:[%s3628_s6 + $0xc50] sm:$0xff]  ;;  %v561_v33 = vld [vmem:[%s3628_s6 + $0xc58] sm:$0xff]  ;;  %v1585_v34 = vmul.f32 %v3635_v1, %v559_v31 }
  0xfc   : > { %2586 = vst [vmem:[%s3651_s21 + $0xb90] sm:$0xff] %v1562_v50  ;;  %2587 = vst [vmem:[%s3651_s21 + $0xb98] sm:$0xff] %v1563_v51  ;;  %v1586_v35 = vmul.f32 %v3635_v1, %v560_v32  ;;  %v1587_v36 = vmul.f32 %v3635_v1, %v561_v33  ;;  %v562_v37 = vld [vmem:[%s3628_s6 + $0xc60] sm:$0xff]  ;;  %v563_v38 = vld [vmem:[%s3628_s6 + $0xc68] sm:$0xff] }
  0xfd   : > { %2588 = vst [vmem:[%s3651_s21 + $0xba0] sm:$0xff] %v1564_v55  ;;  %2589 = vst [vmem:[%s3651_s21 + $0xba8] sm:$0xff] %v1565_v56  ;;  %v564_v39 = vld [vmem:[%s3628_s6 + $0xc70] sm:$0xff]  ;;  %v1588_v40 = vmul.f32 %v3635_v1, %v562_v37  ;;  %v1589_v41 = vmul.f32 %v3635_v1, %v563_v38  ;;  %v565_v43 = vld [vmem:[%s3628_s6 + $0xc78] sm:$0xff] }
  0xfe   : > { %2590 = vst [vmem:[%s3651_s21 + $0xbb0] sm:$0xff] %v1566_v57  ;;  %2591 = vst [vmem:[%s3651_s21 + $0xbb8] sm:$0xff] %v1567_v61  ;;  %v1590_v42 = vmul.f32 %v3635_v1, %v564_v39  ;;  %v566_v44 = vld [vmem:[%s3628_s6 + $0xc80] sm:$0xff]  ;;  %v567_v45 = vld [vmem:[%s3628_s6 + $0xc88] sm:$0xff]  ;;  %v1591_v46 = vmul.f32 %v3635_v1, %v565_v43 }
  0xff   : > { %2592 = vst [vmem:[%s3651_s21 + $0xbc0] sm:$0xff] %v1568_v62  ;;  %2593 = vst [vmem:[%s3651_s21 + $0xbc8] sm:$0xff] %v1569_v63  ;;  %v1592_v47 = vmul.f32 %v3635_v1, %v566_v44  ;;  %v1593_v48 = vmul.f32 %v3635_v1, %v567_v45  ;;  %v568_v49 = vld [vmem:[%s3628_s6 + $0xc90] sm:$0xff]  ;;  %v569_v50 = vld [vmem:[%s3628_s6 + $0xc98] sm:$0xff] }
 0x100   : > { %2594 = vst [vmem:[%s3651_s21 + $0xbd0] sm:$0xff] %v1570_v4  ;;  %2595 = vst [vmem:[%s3651_s21 + $0xbd8] sm:$0xff] %v1571_v5  ;;  %v570_v51 = vld [vmem:[%s3628_s6 + $0xca0] sm:$0xff]  ;;  %v1594_v52 = vmul.f32 %v3635_v1, %v568_v49  ;;  %v1595_v53 = vmul.f32 %v3635_v1, %v569_v50  ;;  %v571_v55 = vld [vmem:[%s3628_s6 + $0xca8] sm:$0xff] }
 0x101   : > { %2596 = vst [vmem:[%s3651_s21 + $0xbe0] sm:$0xff] %v1572_v6  ;;  %2597 = vst [vmem:[%s3651_s21 + $0xbe8] sm:$0xff] %v1573_v10  ;;  %v1596_v54 = vmul.f32 %v3635_v1, %v570_v51  ;;  %v572_v56 = vld [vmem:[%s3628_s6 + $0xcb0] sm:$0xff]  ;;  %v573_v57 = vld [vmem:[%s3628_s6 + $0xcb8] sm:$0xff]  ;;  %v1597_v58 = vmul.f32 %v3635_v1, %v571_v55 }
 0x102   : > { %2598 = vst [vmem:[%s3651_s21 + $0xbf0] sm:$0xff] %v1574_v11  ;;  %2599 = vst [vmem:[%s3651_s21 + $0xbf8] sm:$0xff] %v1575_v12  ;;  %v1598_v59 = vmul.f32 %v3635_v1, %v572_v56  ;;  %v1599_v60 = vmul.f32 %v3635_v1, %v573_v57  ;;  %v574_v61 = vld [vmem:[%s3628_s6 + $0xcc0] sm:$0xff]  ;;  %v575_v62 = vld [vmem:[%s3628_s6 + $0xcc8] sm:$0xff] }
 0x103   : > { %2600 = vst [vmem:[%s3651_s21 + $0xc00] sm:$0xff] %v1576_v16  ;;  %2601 = vst [vmem:[%s3651_s21 + $0xc08] sm:$0xff] %v1577_v17  ;;  %v576_v63 = vld [vmem:[%s3628_s6 + $0xcd0] sm:$0xff]  ;;  %v1600_v0 = vmul.f32 %v3635_v1, %v574_v61  ;;  %v1601_v2 = vmul.f32 %v3635_v1, %v575_v62  ;;  %v577_v4 = vld [vmem:[%s3628_s6 + $0xcd8] sm:$0xff] }
 0x104   : > { %2602 = vst [vmem:[%s3651_s21 + $0xc10] sm:$0xff] %v1578_v18  ;;  %2603 = vst [vmem:[%s3651_s21 + $0xc18] sm:$0xff] %v1579_v22  ;;  %v1602_v3 = vmul.f32 %v3635_v1, %v576_v63  ;;  %v578_v5 = vld [vmem:[%s3628_s6 + $0xce0] sm:$0xff]  ;;  %v579_v6 = vld [vmem:[%s3628_s6 + $0xce8] sm:$0xff]  ;;  %v1603_v7 = vmul.f32 %v3635_v1, %v577_v4 }
 0x105   : > { %2604 = vst [vmem:[%s3651_s21 + $0xc20] sm:$0xff] %v1580_v23  ;;  %2605 = vst [vmem:[%s3651_s21 + $0xc28] sm:$0xff] %v1581_v24  ;;  %v1604_v8 = vmul.f32 %v3635_v1, %v578_v5  ;;  %v1605_v9 = vmul.f32 %v3635_v1, %v579_v6  ;;  %v580_v10 = vld [vmem:[%s3628_s6 + $0xcf0] sm:$0xff]  ;;  %v581_v11 = vld [vmem:[%s3628_s6 + $0xcf8] sm:$0xff] }
 0x106   : > { %2606 = vst [vmem:[%s3651_s21 + $0xc30] sm:$0xff] %v1582_v28  ;;  %2607 = vst [vmem:[%s3651_s21 + $0xc38] sm:$0xff] %v1583_v29  ;;  %v582_v12 = vld [vmem:[%s3628_s6 + $0xd00] sm:$0xff]  ;;  %v1606_v13 = vmul.f32 %v3635_v1, %v580_v10  ;;  %v1607_v14 = vmul.f32 %v3635_v1, %v581_v11  ;;  %v583_v16 = vld [vmem:[%s3628_s6 + $0xd08] sm:$0xff] }
 0x107   : > { %2608 = vst [vmem:[%s3651_s21 + $0xc40] sm:$0xff] %v1584_v30  ;;  %2609 = vst [vmem:[%s3651_s21 + $0xc48] sm:$0xff] %v1585_v34  ;;  %v1608_v15 = vmul.f32 %v3635_v1, %v582_v12  ;;  %v584_v17 = vld [vmem:[%s3628_s6 + $0xd10] sm:$0xff]  ;;  %v585_v18 = vld [vmem:[%s3628_s6 + $0xd18] sm:$0xff]  ;;  %v1609_v19 = vmul.f32 %v3635_v1, %v583_v16 }
 0x108   : > { %2610 = vst [vmem:[%s3651_s21 + $0xc50] sm:$0xff] %v1586_v35  ;;  %2611 = vst [vmem:[%s3651_s21 + $0xc58] sm:$0xff] %v1587_v36  ;;  %v1610_v20 = vmul.f32 %v3635_v1, %v584_v17  ;;  %v1611_v21 = vmul.f32 %v3635_v1, %v585_v18  ;;  %v586_v22 = vld [vmem:[%s3628_s6 + $0xd20] sm:$0xff]  ;;  %v587_v23 = vld [vmem:[%s3628_s6 + $0xd28] sm:$0xff] }
 0x109   : > { %2612 = vst [vmem:[%s3651_s21 + $0xc60] sm:$0xff] %v1588_v40  ;;  %2613 = vst [vmem:[%s3651_s21 + $0xc68] sm:$0xff] %v1589_v41  ;;  %v588_v24 = vld [vmem:[%s3628_s6 + $0xd30] sm:$0xff]  ;;  %v1612_v25 = vmul.f32 %v3635_v1, %v586_v22  ;;  %v1613_v26 = vmul.f32 %v3635_v1, %v587_v23  ;;  %v589_v28 = vld [vmem:[%s3628_s6 + $0xd38] sm:$0xff] }
 0x10a   : > { %2614 = vst [vmem:[%s3651_s21 + $0xc70] sm:$0xff] %v1590_v42  ;;  %2615 = vst [vmem:[%s3651_s21 + $0xc78] sm:$0xff] %v1591_v46  ;;  %v1614_v27 = vmul.f32 %v3635_v1, %v588_v24  ;;  %v590_v29 = vld [vmem:[%s3628_s6 + $0xd40] sm:$0xff]  ;;  %v591_v30 = vld [vmem:[%s3628_s6 + $0xd48] sm:$0xff]  ;;  %v1615_v31 = vmul.f32 %v3635_v1, %v589_v28 }
 0x10b   : > { %2616 = vst [vmem:[%s3651_s21 + $0xc80] sm:$0xff] %v1592_v47  ;;  %2617 = vst [vmem:[%s3651_s21 + $0xc88] sm:$0xff] %v1593_v48  ;;  %v1616_v32 = vmul.f32 %v3635_v1, %v590_v29  ;;  %v1617_v33 = vmul.f32 %v3635_v1, %v591_v30  ;;  %v592_v34 = vld [vmem:[%s3628_s6 + $0xd50] sm:$0xff]  ;;  %v593_v35 = vld [vmem:[%s3628_s6 + $0xd58] sm:$0xff] }
 0x10c   : > { %2618 = vst [vmem:[%s3651_s21 + $0xc90] sm:$0xff] %v1594_v52  ;;  %2619 = vst [vmem:[%s3651_s21 + $0xc98] sm:$0xff] %v1595_v53  ;;  %v594_v36 = vld [vmem:[%s3628_s6 + $0xd60] sm:$0xff]  ;;  %v1618_v37 = vmul.f32 %v3635_v1, %v592_v34  ;;  %v1619_v38 = vmul.f32 %v3635_v1, %v593_v35  ;;  %v595_v40 = vld [vmem:[%s3628_s6 + $0xd68] sm:$0xff] }
 0x10d   : > { %2620 = vst [vmem:[%s3651_s21 + $0xca0] sm:$0xff] %v1596_v54  ;;  %2621 = vst [vmem:[%s3651_s21 + $0xca8] sm:$0xff] %v1597_v58  ;;  %v1620_v39 = vmul.f32 %v3635_v1, %v594_v36  ;;  %v596_v41 = vld [vmem:[%s3628_s6 + $0xd70] sm:$0xff]  ;;  %v597_v42 = vld [vmem:[%s3628_s6 + $0xd78] sm:$0xff]  ;;  %v1621_v43 = vmul.f32 %v3635_v1, %v595_v40 }
 0x10e   : > { %2622 = vst [vmem:[%s3651_s21 + $0xcb0] sm:$0xff] %v1598_v59  ;;  %2623 = vst [vmem:[%s3651_s21 + $0xcb8] sm:$0xff] %v1599_v60  ;;  %v1622_v44 = vmul.f32 %v3635_v1, %v596_v41  ;;  %v1623_v45 = vmul.f32 %v3635_v1, %v597_v42  ;;  %v598_v46 = vld [vmem:[%s3628_s6 + $0xd80] sm:$0xff]  ;;  %v599_v47 = vld [vmem:[%s3628_s6 + $0xd88] sm:$0xff] }
 0x10f   : > { %2624 = vst [vmem:[%s3651_s21 + $0xcc0] sm:$0xff] %v1600_v0  ;;  %2625 = vst [vmem:[%s3651_s21 + $0xcc8] sm:$0xff] %v1601_v2  ;;  %v600_v48 = vld [vmem:[%s3628_s6 + $0xd90] sm:$0xff]  ;;  %v1624_v49 = vmul.f32 %v3635_v1, %v598_v46  ;;  %v1625_v50 = vmul.f32 %v3635_v1, %v599_v47  ;;  %v601_v52 = vld [vmem:[%s3628_s6 + $0xd98] sm:$0xff] }
 0x110   : > { %2626 = vst [vmem:[%s3651_s21 + $0xcd0] sm:$0xff] %v1602_v3  ;;  %2627 = vst [vmem:[%s3651_s21 + $0xcd8] sm:$0xff] %v1603_v7  ;;  %v1626_v51 = vmul.f32 %v3635_v1, %v600_v48  ;;  %v602_v53 = vld [vmem:[%s3628_s6 + $0xda0] sm:$0xff]  ;;  %v603_v54 = vld [vmem:[%s3628_s6 + $0xda8] sm:$0xff]  ;;  %v1627_v55 = vmul.f32 %v3635_v1, %v601_v52 }
 0x111   : > { %2628 = vst [vmem:[%s3651_s21 + $0xce0] sm:$0xff] %v1604_v8  ;;  %2629 = vst [vmem:[%s3651_s21 + $0xce8] sm:$0xff] %v1605_v9  ;;  %v1628_v56 = vmul.f32 %v3635_v1, %v602_v53  ;;  %v1629_v57 = vmul.f32 %v3635_v1, %v603_v54  ;;  %v604_v58 = vld [vmem:[%s3628_s6 + $0xdb0] sm:$0xff]  ;;  %v605_v59 = vld [vmem:[%s3628_s6 + $0xdb8] sm:$0xff] }
 0x112   : > { %2630 = vst [vmem:[%s3651_s21 + $0xcf0] sm:$0xff] %v1606_v13  ;;  %2631 = vst [vmem:[%s3651_s21 + $0xcf8] sm:$0xff] %v1607_v14  ;;  %v606_v60 = vld [vmem:[%s3628_s6 + $0xdc0] sm:$0xff]  ;;  %v1630_v61 = vmul.f32 %v3635_v1, %v604_v58  ;;  %v1631_v62 = vmul.f32 %v3635_v1, %v605_v59  ;;  %v607_v0 = vld [vmem:[%s3628_s6 + $0xdc8] sm:$0xff] }
 0x113   : > { %2632 = vst [vmem:[%s3651_s21 + $0xd00] sm:$0xff] %v1608_v15  ;;  %2633 = vst [vmem:[%s3651_s21 + $0xd08] sm:$0xff] %v1609_v19  ;;  %v1632_v63 = vmul.f32 %v3635_v1, %v606_v60  ;;  %v608_v2 = vld [vmem:[%s3628_s6 + $0xdd0] sm:$0xff]  ;;  %v609_v3 = vld [vmem:[%s3628_s6 + $0xdd8] sm:$0xff]  ;;  %v1633_v4 = vmul.f32 %v3635_v1, %v607_v0 }
 0x114   : > { %2634 = vst [vmem:[%s3651_s21 + $0xd10] sm:$0xff] %v1610_v20  ;;  %2635 = vst [vmem:[%s3651_s21 + $0xd18] sm:$0xff] %v1611_v21  ;;  %v1634_v5 = vmul.f32 %v3635_v1, %v608_v2  ;;  %v1635_v6 = vmul.f32 %v3635_v1, %v609_v3  ;;  %v610_v7 = vld [vmem:[%s3628_s6 + $0xde0] sm:$0xff]  ;;  %v611_v8 = vld [vmem:[%s3628_s6 + $0xde8] sm:$0xff] }
 0x115   : > { %2636 = vst [vmem:[%s3651_s21 + $0xd20] sm:$0xff] %v1612_v25  ;;  %2637 = vst [vmem:[%s3651_s21 + $0xd28] sm:$0xff] %v1613_v26  ;;  %v612_v9 = vld [vmem:[%s3628_s6 + $0xdf0] sm:$0xff]  ;;  %v1636_v10 = vmul.f32 %v3635_v1, %v610_v7  ;;  %v1637_v11 = vmul.f32 %v3635_v1, %v611_v8  ;;  %v613_v13 = vld [vmem:[%s3628_s6 + $0xdf8] sm:$0xff] }
 0x116   : > { %2638 = vst [vmem:[%s3651_s21 + $0xd30] sm:$0xff] %v1614_v27  ;;  %2639 = vst [vmem:[%s3651_s21 + $0xd38] sm:$0xff] %v1615_v31  ;;  %v1638_v12 = vmul.f32 %v3635_v1, %v612_v9  ;;  %v614_v14 = vld [vmem:[%s3628_s6 + $0xe00] sm:$0xff]  ;;  %v615_v15 = vld [vmem:[%s3628_s6 + $0xe08] sm:$0xff]  ;;  %v1639_v16 = vmul.f32 %v3635_v1, %v613_v13 }
 0x117   : > { %2640 = vst [vmem:[%s3651_s21 + $0xd40] sm:$0xff] %v1616_v32  ;;  %2641 = vst [vmem:[%s3651_s21 + $0xd48] sm:$0xff] %v1617_v33  ;;  %v1640_v17 = vmul.f32 %v3635_v1, %v614_v14  ;;  %v1641_v18 = vmul.f32 %v3635_v1, %v615_v15  ;;  %v616_v19 = vld [vmem:[%s3628_s6 + $0xe10] sm:$0xff]  ;;  %v617_v20 = vld [vmem:[%s3628_s6 + $0xe18] sm:$0xff] }
 0x118   : > { %2642 = vst [vmem:[%s3651_s21 + $0xd50] sm:$0xff] %v1618_v37  ;;  %2643 = vst [vmem:[%s3651_s21 + $0xd58] sm:$0xff] %v1619_v38  ;;  %v618_v21 = vld [vmem:[%s3628_s6 + $0xe20] sm:$0xff]  ;;  %v1642_v22 = vmul.f32 %v3635_v1, %v616_v19  ;;  %v1643_v23 = vmul.f32 %v3635_v1, %v617_v20  ;;  %v619_v25 = vld [vmem:[%s3628_s6 + $0xe28] sm:$0xff] }
 0x119   : > { %2644 = vst [vmem:[%s3651_s21 + $0xd60] sm:$0xff] %v1620_v39  ;;  %2645 = vst [vmem:[%s3651_s21 + $0xd68] sm:$0xff] %v1621_v43  ;;  %v1644_v24 = vmul.f32 %v3635_v1, %v618_v21  ;;  %v620_v26 = vld [vmem:[%s3628_s6 + $0xe30] sm:$0xff]  ;;  %v621_v27 = vld [vmem:[%s3628_s6 + $0xe38] sm:$0xff]  ;;  %v1645_v28 = vmul.f32 %v3635_v1, %v619_v25 }
 0x11a   : > { %2646 = vst [vmem:[%s3651_s21 + $0xd70] sm:$0xff] %v1622_v44  ;;  %2647 = vst [vmem:[%s3651_s21 + $0xd78] sm:$0xff] %v1623_v45  ;;  %v1646_v29 = vmul.f32 %v3635_v1, %v620_v26  ;;  %v1647_v30 = vmul.f32 %v3635_v1, %v621_v27  ;;  %v622_v31 = vld [vmem:[%s3628_s6 + $0xe40] sm:$0xff]  ;;  %v623_v32 = vld [vmem:[%s3628_s6 + $0xe48] sm:$0xff] }
 0x11b   : > { %2648 = vst [vmem:[%s3651_s21 + $0xd80] sm:$0xff] %v1624_v49  ;;  %2649 = vst [vmem:[%s3651_s21 + $0xd88] sm:$0xff] %v1625_v50  ;;  %v624_v33 = vld [vmem:[%s3628_s6 + $0xe50] sm:$0xff]  ;;  %v1648_v34 = vmul.f32 %v3635_v1, %v622_v31  ;;  %v1649_v35 = vmul.f32 %v3635_v1, %v623_v32  ;;  %v625_v37 = vld [vmem:[%s3628_s6 + $0xe58] sm:$0xff] }
 0x11c   : > { %2650 = vst [vmem:[%s3651_s21 + $0xd90] sm:$0xff] %v1626_v51  ;;  %2651 = vst [vmem:[%s3651_s21 + $0xd98] sm:$0xff] %v1627_v55  ;;  %v1650_v36 = vmul.f32 %v3635_v1, %v624_v33  ;;  %v626_v38 = vld [vmem:[%s3628_s6 + $0xe60] sm:$0xff]  ;;  %v627_v39 = vld [vmem:[%s3628_s6 + $0xe68] sm:$0xff]  ;;  %v1651_v40 = vmul.f32 %v3635_v1, %v625_v37 }
 0x11d   : > { %2652 = vst [vmem:[%s3651_s21 + $0xda0] sm:$0xff] %v1628_v56  ;;  %2653 = vst [vmem:[%s3651_s21 + $0xda8] sm:$0xff] %v1629_v57  ;;  %v1652_v41 = vmul.f32 %v3635_v1, %v626_v38  ;;  %v1653_v42 = vmul.f32 %v3635_v1, %v627_v39  ;;  %v628_v43 = vld [vmem:[%s3628_s6 + $0xe70] sm:$0xff]  ;;  %v629_v44 = vld [vmem:[%s3628_s6 + $0xe78] sm:$0xff] }
 0x11e   : > { %2654 = vst [vmem:[%s3651_s21 + $0xdb0] sm:$0xff] %v1630_v61  ;;  %2655 = vst [vmem:[%s3651_s21 + $0xdb8] sm:$0xff] %v1631_v62  ;;  %v630_v45 = vld [vmem:[%s3628_s6 + $0xe80] sm:$0xff]  ;;  %v1654_v46 = vmul.f32 %v3635_v1, %v628_v43  ;;  %v1655_v47 = vmul.f32 %v3635_v1, %v629_v44  ;;  %v631_v49 = vld [vmem:[%s3628_s6 + $0xe88] sm:$0xff] }
 0x11f   : > { %2656 = vst [vmem:[%s3651_s21 + $0xdc0] sm:$0xff] %v1632_v63  ;;  %2657 = vst [vmem:[%s3651_s21 + $0xdc8] sm:$0xff] %v1633_v4  ;;  %v1656_v48 = vmul.f32 %v3635_v1, %v630_v45  ;;  %v632_v50 = vld [vmem:[%s3628_s6 + $0xe90] sm:$0xff]  ;;  %v633_v51 = vld [vmem:[%s3628_s6 + $0xe98] sm:$0xff]  ;;  %v1657_v52 = vmul.f32 %v3635_v1, %v631_v49 }
 0x120   : > { %2658 = vst [vmem:[%s3651_s21 + $0xdd0] sm:$0xff] %v1634_v5  ;;  %2659 = vst [vmem:[%s3651_s21 + $0xdd8] sm:$0xff] %v1635_v6  ;;  %v1658_v53 = vmul.f32 %v3635_v1, %v632_v50  ;;  %v1659_v54 = vmul.f32 %v3635_v1, %v633_v51  ;;  %v634_v55 = vld [vmem:[%s3628_s6 + $0xea0] sm:$0xff]  ;;  %v635_v56 = vld [vmem:[%s3628_s6 + $0xea8] sm:$0xff] }
 0x121   : > { %2660 = vst [vmem:[%s3651_s21 + $0xde0] sm:$0xff] %v1636_v10  ;;  %2661 = vst [vmem:[%s3651_s21 + $0xde8] sm:$0xff] %v1637_v11  ;;  %v636_v57 = vld [vmem:[%s3628_s6 + $0xeb0] sm:$0xff]  ;;  %v1660_v58 = vmul.f32 %v3635_v1, %v634_v55  ;;  %v1661_v59 = vmul.f32 %v3635_v1, %v635_v56  ;;  %v637_v61 = vld [vmem:[%s3628_s6 + $0xeb8] sm:$0xff] }
 0x122   : > { %2662 = vst [vmem:[%s3651_s21 + $0xdf0] sm:$0xff] %v1638_v12  ;;  %2663 = vst [vmem:[%s3651_s21 + $0xdf8] sm:$0xff] %v1639_v16  ;;  %v1662_v60 = vmul.f32 %v3635_v1, %v636_v57  ;;  %v638_v62 = vld [vmem:[%s3628_s6 + $0xec0] sm:$0xff]  ;;  %v639_v63 = vld [vmem:[%s3628_s6 + $0xec8] sm:$0xff]  ;;  %v1663_v0 = vmul.f32 %v3635_v1, %v637_v61 }
 0x123   : > { %2664 = vst [vmem:[%s3651_s21 + $0xe00] sm:$0xff] %v1640_v17  ;;  %2665 = vst [vmem:[%s3651_s21 + $0xe08] sm:$0xff] %v1641_v18  ;;  %v1664_v2 = vmul.f32 %v3635_v1, %v638_v62  ;;  %v1665_v3 = vmul.f32 %v3635_v1, %v639_v63  ;;  %v640_v4 = vld [vmem:[%s3628_s6 + $0xed0] sm:$0xff]  ;;  %v641_v5 = vld [vmem:[%s3628_s6 + $0xed8] sm:$0xff] }
 0x124   : > { %2666 = vst [vmem:[%s3651_s21 + $0xe10] sm:$0xff] %v1642_v22  ;;  %2667 = vst [vmem:[%s3651_s21 + $0xe18] sm:$0xff] %v1643_v23  ;;  %v642_v6 = vld [vmem:[%s3628_s6 + $0xee0] sm:$0xff]  ;;  %v1666_v7 = vmul.f32 %v3635_v1, %v640_v4  ;;  %v1667_v8 = vmul.f32 %v3635_v1, %v641_v5  ;;  %v643_v10 = vld [vmem:[%s3628_s6 + $0xee8] sm:$0xff] }
 0x125   : > { %2668 = vst [vmem:[%s3651_s21 + $0xe20] sm:$0xff] %v1644_v24  ;;  %2669 = vst [vmem:[%s3651_s21 + $0xe28] sm:$0xff] %v1645_v28  ;;  %v1668_v9 = vmul.f32 %v3635_v1, %v642_v6  ;;  %v644_v11 = vld [vmem:[%s3628_s6 + $0xef0] sm:$0xff]  ;;  %v645_v12 = vld [vmem:[%s3628_s6 + $0xef8] sm:$0xff]  ;;  %v1669_v13 = vmul.f32 %v3635_v1, %v643_v10 }
 0x126   : > { %2670 = vst [vmem:[%s3651_s21 + $0xe30] sm:$0xff] %v1646_v29  ;;  %2671 = vst [vmem:[%s3651_s21 + $0xe38] sm:$0xff] %v1647_v30  ;;  %v1670_v14 = vmul.f32 %v3635_v1, %v644_v11  ;;  %v1671_v15 = vmul.f32 %v3635_v1, %v645_v12  ;;  %v646_v16 = vld [vmem:[%s3628_s6 + $0xf00] sm:$0xff]  ;;  %v647_v17 = vld [vmem:[%s3628_s6 + $0xf08] sm:$0xff] }
 0x127   : > { %2672 = vst [vmem:[%s3651_s21 + $0xe40] sm:$0xff] %v1648_v34  ;;  %2673 = vst [vmem:[%s3651_s21 + $0xe48] sm:$0xff] %v1649_v35  ;;  %v648_v18 = vld [vmem:[%s3628_s6 + $0xf10] sm:$0xff]  ;;  %v1672_v19 = vmul.f32 %v3635_v1, %v646_v16  ;;  %v1673_v20 = vmul.f32 %v3635_v1, %v647_v17  ;;  %v649_v22 = vld [vmem:[%s3628_s6 + $0xf18] sm:$0xff] }
 0x128   : > { %2674 = vst [vmem:[%s3651_s21 + $0xe50] sm:$0xff] %v1650_v36  ;;  %2675 = vst [vmem:[%s3651_s21 + $0xe58] sm:$0xff] %v1651_v40  ;;  %v1674_v21 = vmul.f32 %v3635_v1, %v648_v18  ;;  %v650_v23 = vld [vmem:[%s3628_s6 + $0xf20] sm:$0xff]  ;;  %v651_v24 = vld [vmem:[%s3628_s6 + $0xf28] sm:$0xff]  ;;  %v1675_v25 = vmul.f32 %v3635_v1, %v649_v22 }
 0x129   : > { %2676 = vst [vmem:[%s3651_s21 + $0xe60] sm:$0xff] %v1652_v41  ;;  %2677 = vst [vmem:[%s3651_s21 + $0xe68] sm:$0xff] %v1653_v42  ;;  %v1676_v26 = vmul.f32 %v3635_v1, %v650_v23  ;;  %v1677_v27 = vmul.f32 %v3635_v1, %v651_v24  ;;  %v652_v28 = vld [vmem:[%s3628_s6 + $0xf30] sm:$0xff]  ;;  %v653_v29 = vld [vmem:[%s3628_s6 + $0xf38] sm:$0xff] }
 0x12a   : > { %2678 = vst [vmem:[%s3651_s21 + $0xe70] sm:$0xff] %v1654_v46  ;;  %2679 = vst [vmem:[%s3651_s21 + $0xe78] sm:$0xff] %v1655_v47  ;;  %v654_v30 = vld [vmem:[%s3628_s6 + $0xf40] sm:$0xff]  ;;  %v1678_v31 = vmul.f32 %v3635_v1, %v652_v28  ;;  %v1679_v32 = vmul.f32 %v3635_v1, %v653_v29  ;;  %v655_v34 = vld [vmem:[%s3628_s6 + $0xf48] sm:$0xff] }
 0x12b   : > { %2680 = vst [vmem:[%s3651_s21 + $0xe80] sm:$0xff] %v1656_v48  ;;  %2681 = vst [vmem:[%s3651_s21 + $0xe88] sm:$0xff] %v1657_v52  ;;  %v1680_v33 = vmul.f32 %v3635_v1, %v654_v30  ;;  %v656_v35 = vld [vmem:[%s3628_s6 + $0xf50] sm:$0xff]  ;;  %v657_v36 = vld [vmem:[%s3628_s6 + $0xf58] sm:$0xff]  ;;  %v1681_v37 = vmul.f32 %v3635_v1, %v655_v34 }
 0x12c   : > { %2682 = vst [vmem:[%s3651_s21 + $0xe90] sm:$0xff] %v1658_v53  ;;  %2683 = vst [vmem:[%s3651_s21 + $0xe98] sm:$0xff] %v1659_v54  ;;  %v1682_v38 = vmul.f32 %v3635_v1, %v656_v35  ;;  %v1683_v39 = vmul.f32 %v3635_v1, %v657_v36  ;;  %v658_v40 = vld [vmem:[%s3628_s6 + $0xf60] sm:$0xff]  ;;  %v659_v41 = vld [vmem:[%s3628_s6 + $0xf68] sm:$0xff] }
 0x12d   : > { %2684 = vst [vmem:[%s3651_s21 + $0xea0] sm:$0xff] %v1660_v58  ;;  %2685 = vst [vmem:[%s3651_s21 + $0xea8] sm:$0xff] %v1661_v59  ;;  %v660_v42 = vld [vmem:[%s3628_s6 + $0xf70] sm:$0xff]  ;;  %v1684_v43 = vmul.f32 %v3635_v1, %v658_v40  ;;  %v1685_v44 = vmul.f32 %v3635_v1, %v659_v41  ;;  %v661_v46 = vld [vmem:[%s3628_s6 + $0xf78] sm:$0xff] }
 0x12e   : > { %2686 = vst [vmem:[%s3651_s21 + $0xeb0] sm:$0xff] %v1662_v60  ;;  %2687 = vst [vmem:[%s3651_s21 + $0xeb8] sm:$0xff] %v1663_v0  ;;  %v1686_v45 = vmul.f32 %v3635_v1, %v660_v42  ;;  %v662_v47 = vld [vmem:[%s3628_s6 + $0xf80] sm:$0xff]  ;;  %v663_v48 = vld [vmem:[%s3628_s6 + $0xf88] sm:$0xff]  ;;  %v1687_v49 = vmul.f32 %v3635_v1, %v661_v46 }
 0x12f   : > { %2688 = vst [vmem:[%s3651_s21 + $0xec0] sm:$0xff] %v1664_v2  ;;  %2689 = vst [vmem:[%s3651_s21 + $0xec8] sm:$0xff] %v1665_v3  ;;  %v1688_v50 = vmul.f32 %v3635_v1, %v662_v47  ;;  %v1689_v51 = vmul.f32 %v3635_v1, %v663_v48  ;;  %v664_v52 = vld [vmem:[%s3628_s6 + $0xf90] sm:$0xff]  ;;  %v665_v53 = vld [vmem:[%s3628_s6 + $0xf98] sm:$0xff] }
 0x130   : > { %2690 = vst [vmem:[%s3651_s21 + $0xed0] sm:$0xff] %v1666_v7  ;;  %2691 = vst [vmem:[%s3651_s21 + $0xed8] sm:$0xff] %v1667_v8  ;;  %v666_v54 = vld [vmem:[%s3628_s6 + $0xfa0] sm:$0xff]  ;;  %v1690_v55 = vmul.f32 %v3635_v1, %v664_v52  ;;  %v1691_v56 = vmul.f32 %v3635_v1, %v665_v53  ;;  %v667_v58 = vld [vmem:[%s3628_s6 + $0xfa8] sm:$0xff] }
 0x131   : > { %2692 = vst [vmem:[%s3651_s21 + $0xee0] sm:$0xff] %v1668_v9  ;;  %2693 = vst [vmem:[%s3651_s21 + $0xee8] sm:$0xff] %v1669_v13  ;;  %v1692_v57 = vmul.f32 %v3635_v1, %v666_v54  ;;  %v668_v59 = vld [vmem:[%s3628_s6 + $0xfb0] sm:$0xff]  ;;  %v669_v60 = vld [vmem:[%s3628_s6 + $0xfb8] sm:$0xff]  ;;  %v1693_v61 = vmul.f32 %v3635_v1, %v667_v58 }
 0x132   : > { %2694 = vst [vmem:[%s3651_s21 + $0xef0] sm:$0xff] %v1670_v14  ;;  %2695 = vst [vmem:[%s3651_s21 + $0xef8] sm:$0xff] %v1671_v15  ;;  %v1694_v62 = vmul.f32 %v3635_v1, %v668_v59  ;;  %v1695_v63 = vmul.f32 %v3635_v1, %v669_v60  ;;  %v670_v0 = vld [vmem:[%s3628_s6 + $0xfc0] sm:$0xff]  ;;  %v671_v2 = vld [vmem:[%s3628_s6 + $0xfc8] sm:$0xff] }
 0x133   : > { %2696 = vst [vmem:[%s3651_s21 + $0xf00] sm:$0xff] %v1672_v19  ;;  %2697 = vst [vmem:[%s3651_s21 + $0xf08] sm:$0xff] %v1673_v20  ;;  %v672_v3 = vld [vmem:[%s3628_s6 + $0xfd0] sm:$0xff]  ;;  %v1696_v4 = vmul.f32 %v3635_v1, %v670_v0  ;;  %v1697_v5 = vmul.f32 %v3635_v1, %v671_v2  ;;  %v673_v7 = vld [vmem:[%s3628_s6 + $0xfd8] sm:$0xff] }
 0x134   : > { %2698 = vst [vmem:[%s3651_s21 + $0xf10] sm:$0xff] %v1674_v21  ;;  %2699 = vst [vmem:[%s3651_s21 + $0xf18] sm:$0xff] %v1675_v25  ;;  %v1698_v6 = vmul.f32 %v3635_v1, %v672_v3  ;;  %v674_v8 = vld [vmem:[%s3628_s6 + $0xfe0] sm:$0xff]  ;;  %v675_v9 = vld [vmem:[%s3628_s6 + $0xfe8] sm:$0xff]  ;;  %v1699_v10 = vmul.f32 %v3635_v1, %v673_v7 }
 0x135   : > { %2700 = vst [vmem:[%s3651_s21 + $0xf20] sm:$0xff] %v1676_v26  ;;  %2701 = vst [vmem:[%s3651_s21 + $0xf28] sm:$0xff] %v1677_v27  ;;  %v1700_v11 = vmul.f32 %v3635_v1, %v674_v8  ;;  %v1701_v12 = vmul.f32 %v3635_v1, %v675_v9  ;;  %v676_v13 = vld [vmem:[%s3628_s6 + $0xff0] sm:$0xff]  ;;  %v677_v14 = vld [vmem:[%s3628_s6 + $0xff8] sm:$0xff] }
 0x136   : > { %2702 = vst [vmem:[%s3651_s21 + $0xf30] sm:$0xff] %v1678_v31  ;;  %2703 = vst [vmem:[%s3651_s21 + $0xf38] sm:$0xff] %v1679_v32  ;;  %v678_v15 = vld [vmem:[%s3628_s6 + $0x1000] sm:$0xff]  ;;  %v1702_v16 = vmul.f32 %v3635_v1, %v676_v13  ;;  %v1703_v17 = vmul.f32 %v3635_v1, %v677_v14  ;;  %v679_v19 = vld [vmem:[%s3628_s6 + $0x1008] sm:$0xff] }
 0x137   : > { %2704 = vst [vmem:[%s3651_s21 + $0xf40] sm:$0xff] %v1680_v33  ;;  %2705 = vst [vmem:[%s3651_s21 + $0xf48] sm:$0xff] %v1681_v37  ;;  %v1704_v18 = vmul.f32 %v3635_v1, %v678_v15  ;;  %v680_v20 = vld [vmem:[%s3628_s6 + $0x1010] sm:$0xff]  ;;  %v681_v21 = vld [vmem:[%s3628_s6 + $0x1018] sm:$0xff]  ;;  %v1705_v22 = vmul.f32 %v3635_v1, %v679_v19 }
 0x138   : > { %2706 = vst [vmem:[%s3651_s21 + $0xf50] sm:$0xff] %v1682_v38  ;;  %2707 = vst [vmem:[%s3651_s21 + $0xf58] sm:$0xff] %v1683_v39  ;;  %v1706_v23 = vmul.f32 %v3635_v1, %v680_v20  ;;  %v1707_v24 = vmul.f32 %v3635_v1, %v681_v21  ;;  %v682_v25 = vld [vmem:[%s3628_s6 + $0x1020] sm:$0xff]  ;;  %v683_v26 = vld [vmem:[%s3628_s6 + $0x1028] sm:$0xff] }
 0x139   : > { %2708 = vst [vmem:[%s3651_s21 + $0xf60] sm:$0xff] %v1684_v43  ;;  %2709 = vst [vmem:[%s3651_s21 + $0xf68] sm:$0xff] %v1685_v44  ;;  %v684_v27 = vld [vmem:[%s3628_s6 + $0x1030] sm:$0xff]  ;;  %v1708_v28 = vmul.f32 %v3635_v1, %v682_v25  ;;  %v1709_v29 = vmul.f32 %v3635_v1, %v683_v26  ;;  %v685_v31 = vld [vmem:[%s3628_s6 + $0x1038] sm:$0xff] }
 0x13a   : > { %2710 = vst [vmem:[%s3651_s21 + $0xf70] sm:$0xff] %v1686_v45  ;;  %2711 = vst [vmem:[%s3651_s21 + $0xf78] sm:$0xff] %v1687_v49  ;;  %v1710_v30 = vmul.f32 %v3635_v1, %v684_v27  ;;  %v686_v32 = vld [vmem:[%s3628_s6 + $0x1040] sm:$0xff]  ;;  %v687_v33 = vld [vmem:[%s3628_s6 + $0x1048] sm:$0xff]  ;;  %v1711_v34 = vmul.f32 %v3635_v1, %v685_v31 }
 0x13b   : > { %2712 = vst [vmem:[%s3651_s21 + $0xf80] sm:$0xff] %v1688_v50  ;;  %2713 = vst [vmem:[%s3651_s21 + $0xf88] sm:$0xff] %v1689_v51  ;;  %v1712_v35 = vmul.f32 %v3635_v1, %v686_v32  ;;  %v1713_v36 = vmul.f32 %v3635_v1, %v687_v33  ;;  %v688_v37 = vld [vmem:[%s3628_s6 + $0x1050] sm:$0xff]  ;;  %v689_v38 = vld [vmem:[%s3628_s6 + $0x1058] sm:$0xff] }
 0x13c   : > { %2714 = vst [vmem:[%s3651_s21 + $0xf90] sm:$0xff] %v1690_v55  ;;  %2715 = vst [vmem:[%s3651_s21 + $0xf98] sm:$0xff] %v1691_v56  ;;  %v690_v39 = vld [vmem:[%s3628_s6 + $0x1060] sm:$0xff]  ;;  %v1714_v40 = vmul.f32 %v3635_v1, %v688_v37  ;;  %v1715_v41 = vmul.f32 %v3635_v1, %v689_v38  ;;  %v691_v43 = vld [vmem:[%s3628_s6 + $0x1068] sm:$0xff] }
 0x13d   : > { %2716 = vst [vmem:[%s3651_s21 + $0xfa0] sm:$0xff] %v1692_v57  ;;  %2717 = vst [vmem:[%s3651_s21 + $0xfa8] sm:$0xff] %v1693_v61  ;;  %v1716_v42 = vmul.f32 %v3635_v1, %v690_v39  ;;  %v692_v44 = vld [vmem:[%s3628_s6 + $0x1070] sm:$0xff]  ;;  %v693_v45 = vld [vmem:[%s3628_s6 + $0x1078] sm:$0xff]  ;;  %v1717_v46 = vmul.f32 %v3635_v1, %v691_v43 }
 0x13e   : > { %2718 = vst [vmem:[%s3651_s21 + $0xfb0] sm:$0xff] %v1694_v62  ;;  %2719 = vst [vmem:[%s3651_s21 + $0xfb8] sm:$0xff] %v1695_v63  ;;  %v1718_v47 = vmul.f32 %v3635_v1, %v692_v44  ;;  %v1719_v48 = vmul.f32 %v3635_v1, %v693_v45  ;;  %v694_v49 = vld [vmem:[%s3628_s6 + $0x1080] sm:$0xff]  ;;  %v695_v50 = vld [vmem:[%s3628_s6 + $0x1088] sm:$0xff] }
 0x13f   : > { %2720 = vst [vmem:[%s3651_s21 + $0xfc0] sm:$0xff] %v1696_v4  ;;  %2721 = vst [vmem:[%s3651_s21 + $0xfc8] sm:$0xff] %v1697_v5  ;;  %v696_v51 = vld [vmem:[%s3628_s6 + $0x1090] sm:$0xff]  ;;  %v1720_v52 = vmul.f32 %v3635_v1, %v694_v49  ;;  %v1721_v53 = vmul.f32 %v3635_v1, %v695_v50  ;;  %v697_v55 = vld [vmem:[%s3628_s6 + $0x1098] sm:$0xff] }
 0x140   : > { %2722 = vst [vmem:[%s3651_s21 + $0xfd0] sm:$0xff] %v1698_v6  ;;  %2723 = vst [vmem:[%s3651_s21 + $0xfd8] sm:$0xff] %v1699_v10  ;;  %v1722_v54 = vmul.f32 %v3635_v1, %v696_v51  ;;  %v698_v56 = vld [vmem:[%s3628_s6 + $0x10a0] sm:$0xff]  ;;  %v699_v57 = vld [vmem:[%s3628_s6 + $0x10a8] sm:$0xff]  ;;  %v1723_v58 = vmul.f32 %v3635_v1, %v697_v55 }
 0x141   : > { %2724 = vst [vmem:[%s3651_s21 + $0xfe0] sm:$0xff] %v1700_v11  ;;  %2725 = vst [vmem:[%s3651_s21 + $0xfe8] sm:$0xff] %v1701_v12  ;;  %v1724_v59 = vmul.f32 %v3635_v1, %v698_v56  ;;  %v1725_v60 = vmul.f32 %v3635_v1, %v699_v57  ;;  %v700_v61 = vld [vmem:[%s3628_s6 + $0x10b0] sm:$0xff]  ;;  %v701_v62 = vld [vmem:[%s3628_s6 + $0x10b8] sm:$0xff] }
 0x142   : > { %2726 = vst [vmem:[%s3651_s21 + $0xff0] sm:$0xff] %v1702_v16  ;;  %2727 = vst [vmem:[%s3651_s21 + $0xff8] sm:$0xff] %v1703_v17  ;;  %v702_v63 = vld [vmem:[%s3628_s6 + $0x10c0] sm:$0xff]  ;;  %v1726_v0 = vmul.f32 %v3635_v1, %v700_v61  ;;  %v1727_v2 = vmul.f32 %v3635_v1, %v701_v62  ;;  %v703_v4 = vld [vmem:[%s3628_s6 + $0x10c8] sm:$0xff] }
 0x143   : > { %2728 = vst [vmem:[%s3651_s21 + $0x1000] sm:$0xff] %v1704_v18  ;;  %2729 = vst [vmem:[%s3651_s21 + $0x1008] sm:$0xff] %v1705_v22  ;;  %v1728_v3 = vmul.f32 %v3635_v1, %v702_v63  ;;  %v704_v5 = vld [vmem:[%s3628_s6 + $0x10d0] sm:$0xff]  ;;  %v705_v6 = vld [vmem:[%s3628_s6 + $0x10d8] sm:$0xff]  ;;  %v1729_v7 = vmul.f32 %v3635_v1, %v703_v4 }
 0x144   : > { %2730 = vst [vmem:[%s3651_s21 + $0x1010] sm:$0xff] %v1706_v23  ;;  %2731 = vst [vmem:[%s3651_s21 + $0x1018] sm:$0xff] %v1707_v24  ;;  %v1730_v8 = vmul.f32 %v3635_v1, %v704_v5  ;;  %v1731_v9 = vmul.f32 %v3635_v1, %v705_v6  ;;  %v706_v10 = vld [vmem:[%s3628_s6 + $0x10e0] sm:$0xff]  ;;  %v707_v11 = vld [vmem:[%s3628_s6 + $0x10e8] sm:$0xff] }
 0x145   : > { %2732 = vst [vmem:[%s3651_s21 + $0x1020] sm:$0xff] %v1708_v28  ;;  %2733 = vst [vmem:[%s3651_s21 + $0x1028] sm:$0xff] %v1709_v29  ;;  %v708_v12 = vld [vmem:[%s3628_s6 + $0x10f0] sm:$0xff]  ;;  %v1732_v13 = vmul.f32 %v3635_v1, %v706_v10  ;;  %v1733_v14 = vmul.f32 %v3635_v1, %v707_v11  ;;  %v709_v16 = vld [vmem:[%s3628_s6 + $0x10f8] sm:$0xff] }
 0x146   : > { %2734 = vst [vmem:[%s3651_s21 + $0x1030] sm:$0xff] %v1710_v30  ;;  %2735 = vst [vmem:[%s3651_s21 + $0x1038] sm:$0xff] %v1711_v34  ;;  %v1734_v15 = vmul.f32 %v3635_v1, %v708_v12  ;;  %v710_v17 = vld [vmem:[%s3628_s6 + $0x1100] sm:$0xff]  ;;  %v711_v18 = vld [vmem:[%s3628_s6 + $0x1108] sm:$0xff]  ;;  %v1735_v19 = vmul.f32 %v3635_v1, %v709_v16 }
 0x147   : > { %2736 = vst [vmem:[%s3651_s21 + $0x1040] sm:$0xff] %v1712_v35  ;;  %2737 = vst [vmem:[%s3651_s21 + $0x1048] sm:$0xff] %v1713_v36  ;;  %v1736_v20 = vmul.f32 %v3635_v1, %v710_v17  ;;  %v1737_v21 = vmul.f32 %v3635_v1, %v711_v18  ;;  %v712_v22 = vld [vmem:[%s3628_s6 + $0x1110] sm:$0xff]  ;;  %v713_v23 = vld [vmem:[%s3628_s6 + $0x1118] sm:$0xff] }
 0x148   : > { %2738 = vst [vmem:[%s3651_s21 + $0x1050] sm:$0xff] %v1714_v40  ;;  %2739 = vst [vmem:[%s3651_s21 + $0x1058] sm:$0xff] %v1715_v41  ;;  %v714_v24 = vld [vmem:[%s3628_s6 + $0x1120] sm:$0xff]  ;;  %v1738_v25 = vmul.f32 %v3635_v1, %v712_v22  ;;  %v1739_v26 = vmul.f32 %v3635_v1, %v713_v23  ;;  %v715_v28 = vld [vmem:[%s3628_s6 + $0x1128] sm:$0xff] }
 0x149   : > { %2740 = vst [vmem:[%s3651_s21 + $0x1060] sm:$0xff] %v1716_v42  ;;  %2741 = vst [vmem:[%s3651_s21 + $0x1068] sm:$0xff] %v1717_v46  ;;  %v1740_v27 = vmul.f32 %v3635_v1, %v714_v24  ;;  %v716_v29 = vld [vmem:[%s3628_s6 + $0x1130] sm:$0xff]  ;;  %v717_v30 = vld [vmem:[%s3628_s6 + $0x1138] sm:$0xff]  ;;  %v1741_v31 = vmul.f32 %v3635_v1, %v715_v28 }
 0x14a   : > { %2742 = vst [vmem:[%s3651_s21 + $0x1070] sm:$0xff] %v1718_v47  ;;  %2743 = vst [vmem:[%s3651_s21 + $0x1078] sm:$0xff] %v1719_v48  ;;  %v1742_v32 = vmul.f32 %v3635_v1, %v716_v29  ;;  %v1743_v33 = vmul.f32 %v3635_v1, %v717_v30  ;;  %v718_v34 = vld [vmem:[%s3628_s6 + $0x1140] sm:$0xff]  ;;  %v719_v35 = vld [vmem:[%s3628_s6 + $0x1148] sm:$0xff] }
 0x14b   : > { %2744 = vst [vmem:[%s3651_s21 + $0x1080] sm:$0xff] %v1720_v52  ;;  %2745 = vst [vmem:[%s3651_s21 + $0x1088] sm:$0xff] %v1721_v53  ;;  %v720_v36 = vld [vmem:[%s3628_s6 + $0x1150] sm:$0xff]  ;;  %v1744_v37 = vmul.f32 %v3635_v1, %v718_v34  ;;  %v1745_v38 = vmul.f32 %v3635_v1, %v719_v35  ;;  %v721_v40 = vld [vmem:[%s3628_s6 + $0x1158] sm:$0xff] }
 0x14c   : > { %2746 = vst [vmem:[%s3651_s21 + $0x1090] sm:$0xff] %v1722_v54  ;;  %2747 = vst [vmem:[%s3651_s21 + $0x1098] sm:$0xff] %v1723_v58  ;;  %v1746_v39 = vmul.f32 %v3635_v1, %v720_v36  ;;  %v722_v41 = vld [vmem:[%s3628_s6 + $0x1160] sm:$0xff]  ;;  %v723_v42 = vld [vmem:[%s3628_s6 + $0x1168] sm:$0xff]  ;;  %v1747_v43 = vmul.f32 %v3635_v1, %v721_v40 }
 0x14d   : > { %2748 = vst [vmem:[%s3651_s21 + $0x10a0] sm:$0xff] %v1724_v59  ;;  %2749 = vst [vmem:[%s3651_s21 + $0x10a8] sm:$0xff] %v1725_v60  ;;  %v1748_v44 = vmul.f32 %v3635_v1, %v722_v41  ;;  %v1749_v45 = vmul.f32 %v3635_v1, %v723_v42  ;;  %v724_v46 = vld [vmem:[%s3628_s6 + $0x1170] sm:$0xff]  ;;  %v725_v47 = vld [vmem:[%s3628_s6 + $0x1178] sm:$0xff] }
 0x14e   : > { %2750 = vst [vmem:[%s3651_s21 + $0x10b0] sm:$0xff] %v1726_v0  ;;  %2751 = vst [vmem:[%s3651_s21 + $0x10b8] sm:$0xff] %v1727_v2  ;;  %v726_v48 = vld [vmem:[%s3628_s6 + $0x1180] sm:$0xff]  ;;  %v1750_v49 = vmul.f32 %v3635_v1, %v724_v46  ;;  %v1751_v50 = vmul.f32 %v3635_v1, %v725_v47  ;;  %v727_v52 = vld [vmem:[%s3628_s6 + $0x1188] sm:$0xff] }
 0x14f   : > { %2752 = vst [vmem:[%s3651_s21 + $0x10c0] sm:$0xff] %v1728_v3  ;;  %2753 = vst [vmem:[%s3651_s21 + $0x10c8] sm:$0xff] %v1729_v7  ;;  %v1752_v51 = vmul.f32 %v3635_v1, %v726_v48  ;;  %v728_v53 = vld [vmem:[%s3628_s6 + $0x1190] sm:$0xff]  ;;  %v729_v54 = vld [vmem:[%s3628_s6 + $0x1198] sm:$0xff]  ;;  %v1753_v55 = vmul.f32 %v3635_v1, %v727_v52 }
 0x150   : > { %2754 = vst [vmem:[%s3651_s21 + $0x10d0] sm:$0xff] %v1730_v8  ;;  %2755 = vst [vmem:[%s3651_s21 + $0x10d8] sm:$0xff] %v1731_v9  ;;  %v1754_v56 = vmul.f32 %v3635_v1, %v728_v53  ;;  %v1755_v57 = vmul.f32 %v3635_v1, %v729_v54  ;;  %v730_v58 = vld [vmem:[%s3628_s6 + $0x11a0] sm:$0xff]  ;;  %v731_v59 = vld [vmem:[%s3628_s6 + $0x11a8] sm:$0xff] }
 0x151   : > { %2756 = vst [vmem:[%s3651_s21 + $0x10e0] sm:$0xff] %v1732_v13  ;;  %2757 = vst [vmem:[%s3651_s21 + $0x10e8] sm:$0xff] %v1733_v14  ;;  %v732_v60 = vld [vmem:[%s3628_s6 + $0x11b0] sm:$0xff]  ;;  %v1756_v61 = vmul.f32 %v3635_v1, %v730_v58  ;;  %v1757_v62 = vmul.f32 %v3635_v1, %v731_v59  ;;  %v733_v0 = vld [vmem:[%s3628_s6 + $0x11b8] sm:$0xff] }
 0x152   : > { %2758 = vst [vmem:[%s3651_s21 + $0x10f0] sm:$0xff] %v1734_v15  ;;  %2759 = vst [vmem:[%s3651_s21 + $0x10f8] sm:$0xff] %v1735_v19  ;;  %v1758_v63 = vmul.f32 %v3635_v1, %v732_v60  ;;  %v734_v2 = vld [vmem:[%s3628_s6 + $0x11c0] sm:$0xff]  ;;  %v735_v3 = vld [vmem:[%s3628_s6 + $0x11c8] sm:$0xff]  ;;  %v1759_v4 = vmul.f32 %v3635_v1, %v733_v0 }
 0x153   : > { %2760 = vst [vmem:[%s3651_s21 + $0x1100] sm:$0xff] %v1736_v20  ;;  %2761 = vst [vmem:[%s3651_s21 + $0x1108] sm:$0xff] %v1737_v21  ;;  %v1760_v5 = vmul.f32 %v3635_v1, %v734_v2  ;;  %v1761_v6 = vmul.f32 %v3635_v1, %v735_v3  ;;  %v736_v7 = vld [vmem:[%s3628_s6 + $0x11d0] sm:$0xff]  ;;  %v737_v8 = vld [vmem:[%s3628_s6 + $0x11d8] sm:$0xff] }
 0x154   : > { %2762 = vst [vmem:[%s3651_s21 + $0x1110] sm:$0xff] %v1738_v25  ;;  %2763 = vst [vmem:[%s3651_s21 + $0x1118] sm:$0xff] %v1739_v26  ;;  %v738_v9 = vld [vmem:[%s3628_s6 + $0x11e0] sm:$0xff]  ;;  %v1762_v10 = vmul.f32 %v3635_v1, %v736_v7  ;;  %v1763_v11 = vmul.f32 %v3635_v1, %v737_v8  ;;  %v739_v13 = vld [vmem:[%s3628_s6 + $0x11e8] sm:$0xff] }
 0x155   : > { %2764 = vst [vmem:[%s3651_s21 + $0x1120] sm:$0xff] %v1740_v27  ;;  %2765 = vst [vmem:[%s3651_s21 + $0x1128] sm:$0xff] %v1741_v31  ;;  %v1764_v12 = vmul.f32 %v3635_v1, %v738_v9  ;;  %v740_v14 = vld [vmem:[%s3628_s6 + $0x11f0] sm:$0xff]  ;;  %v741_v15 = vld [vmem:[%s3628_s6 + $0x11f8] sm:$0xff]  ;;  %v1765_v16 = vmul.f32 %v3635_v1, %v739_v13 }
 0x156   : > { %2766 = vst [vmem:[%s3651_s21 + $0x1130] sm:$0xff] %v1742_v32  ;;  %2767 = vst [vmem:[%s3651_s21 + $0x1138] sm:$0xff] %v1743_v33  ;;  %v1766_v17 = vmul.f32 %v3635_v1, %v740_v14  ;;  %v1767_v18 = vmul.f32 %v3635_v1, %v741_v15  ;;  %v742_v19 = vld [vmem:[%s3628_s6 + $0x1200] sm:$0xff]  ;;  %v743_v20 = vld [vmem:[%s3628_s6 + $0x1208] sm:$0xff] }
 0x157   : > { %2768 = vst [vmem:[%s3651_s21 + $0x1140] sm:$0xff] %v1744_v37  ;;  %2769 = vst [vmem:[%s3651_s21 + $0x1148] sm:$0xff] %v1745_v38  ;;  %v744_v21 = vld [vmem:[%s3628_s6 + $0x1210] sm:$0xff]  ;;  %v1768_v22 = vmul.f32 %v3635_v1, %v742_v19  ;;  %v1769_v23 = vmul.f32 %v3635_v1, %v743_v20  ;;  %v745_v25 = vld [vmem:[%s3628_s6 + $0x1218] sm:$0xff] }
 0x158   : > { %2770 = vst [vmem:[%s3651_s21 + $0x1150] sm:$0xff] %v1746_v39  ;;  %2771 = vst [vmem:[%s3651_s21 + $0x1158] sm:$0xff] %v1747_v43  ;;  %v1770_v24 = vmul.f32 %v3635_v1, %v744_v21  ;;  %v746_v26 = vld [vmem:[%s3628_s6 + $0x1220] sm:$0xff]  ;;  %v747_v27 = vld [vmem:[%s3628_s6 + $0x1228] sm:$0xff]  ;;  %v1771_v28 = vmul.f32 %v3635_v1, %v745_v25 }
 0x159   : > { %2772 = vst [vmem:[%s3651_s21 + $0x1160] sm:$0xff] %v1748_v44  ;;  %2773 = vst [vmem:[%s3651_s21 + $0x1168] sm:$0xff] %v1749_v45  ;;  %v1772_v29 = vmul.f32 %v3635_v1, %v746_v26  ;;  %v1773_v30 = vmul.f32 %v3635_v1, %v747_v27  ;;  %v748_v31 = vld [vmem:[%s3628_s6 + $0x1230] sm:$0xff]  ;;  %v749_v32 = vld [vmem:[%s3628_s6 + $0x1238] sm:$0xff] }
 0x15a   : > { %2774 = vst [vmem:[%s3651_s21 + $0x1170] sm:$0xff] %v1750_v49  ;;  %2775 = vst [vmem:[%s3651_s21 + $0x1178] sm:$0xff] %v1751_v50  ;;  %v750_v33 = vld [vmem:[%s3628_s6 + $0x1240] sm:$0xff]  ;;  %v1774_v34 = vmul.f32 %v3635_v1, %v748_v31  ;;  %v1775_v35 = vmul.f32 %v3635_v1, %v749_v32  ;;  %v751_v37 = vld [vmem:[%s3628_s6 + $0x1248] sm:$0xff] }
 0x15b   : > { %2776 = vst [vmem:[%s3651_s21 + $0x1180] sm:$0xff] %v1752_v51  ;;  %2777 = vst [vmem:[%s3651_s21 + $0x1188] sm:$0xff] %v1753_v55  ;;  %v1776_v36 = vmul.f32 %v3635_v1, %v750_v33  ;;  %v752_v38 = vld [vmem:[%s3628_s6 + $0x1250] sm:$0xff]  ;;  %v753_v39 = vld [vmem:[%s3628_s6 + $0x1258] sm:$0xff]  ;;  %v1777_v40 = vmul.f32 %v3635_v1, %v751_v37 }
 0x15c   : > { %2778 = vst [vmem:[%s3651_s21 + $0x1190] sm:$0xff] %v1754_v56  ;;  %2779 = vst [vmem:[%s3651_s21 + $0x1198] sm:$0xff] %v1755_v57  ;;  %v1778_v41 = vmul.f32 %v3635_v1, %v752_v38  ;;  %v1779_v42 = vmul.f32 %v3635_v1, %v753_v39  ;;  %v754_v43 = vld [vmem:[%s3628_s6 + $0x1260] sm:$0xff]  ;;  %v755_v44 = vld [vmem:[%s3628_s6 + $0x1268] sm:$0xff] }
 0x15d   : > { %2780 = vst [vmem:[%s3651_s21 + $0x11a0] sm:$0xff] %v1756_v61  ;;  %2781 = vst [vmem:[%s3651_s21 + $0x11a8] sm:$0xff] %v1757_v62  ;;  %v756_v45 = vld [vmem:[%s3628_s6 + $0x1270] sm:$0xff]  ;;  %v1780_v46 = vmul.f32 %v3635_v1, %v754_v43  ;;  %v1781_v47 = vmul.f32 %v3635_v1, %v755_v44  ;;  %v757_v49 = vld [vmem:[%s3628_s6 + $0x1278] sm:$0xff] }
 0x15e   : > { %2782 = vst [vmem:[%s3651_s21 + $0x11b0] sm:$0xff] %v1758_v63  ;;  %2783 = vst [vmem:[%s3651_s21 + $0x11b8] sm:$0xff] %v1759_v4  ;;  %v1782_v48 = vmul.f32 %v3635_v1, %v756_v45  ;;  %v758_v50 = vld [vmem:[%s3628_s6 + $0x1280] sm:$0xff]  ;;  %v759_v51 = vld [vmem:[%s3628_s6 + $0x1288] sm:$0xff]  ;;  %v1783_v52 = vmul.f32 %v3635_v1, %v757_v49 }
 0x15f   : > { %2784 = vst [vmem:[%s3651_s21 + $0x11c0] sm:$0xff] %v1760_v5  ;;  %2785 = vst [vmem:[%s3651_s21 + $0x11c8] sm:$0xff] %v1761_v6  ;;  %v1784_v53 = vmul.f32 %v3635_v1, %v758_v50  ;;  %v1785_v54 = vmul.f32 %v3635_v1, %v759_v51  ;;  %v760_v55 = vld [vmem:[%s3628_s6 + $0x1290] sm:$0xff]  ;;  %v761_v56 = vld [vmem:[%s3628_s6 + $0x1298] sm:$0xff] }
 0x160   : > { %2786 = vst [vmem:[%s3651_s21 + $0x11d0] sm:$0xff] %v1762_v10  ;;  %2787 = vst [vmem:[%s3651_s21 + $0x11d8] sm:$0xff] %v1763_v11  ;;  %v762_v57 = vld [vmem:[%s3628_s6 + $0x12a0] sm:$0xff]  ;;  %v1786_v58 = vmul.f32 %v3635_v1, %v760_v55  ;;  %v1787_v59 = vmul.f32 %v3635_v1, %v761_v56  ;;  %v763_v61 = vld [vmem:[%s3628_s6 + $0x12a8] sm:$0xff] }
 0x161   : > { %2788 = vst [vmem:[%s3651_s21 + $0x11e0] sm:$0xff] %v1764_v12  ;;  %2789 = vst [vmem:[%s3651_s21 + $0x11e8] sm:$0xff] %v1765_v16  ;;  %v1788_v60 = vmul.f32 %v3635_v1, %v762_v57  ;;  %v764_v62 = vld [vmem:[%s3628_s6 + $0x12b0] sm:$0xff]  ;;  %v765_v63 = vld [vmem:[%s3628_s6 + $0x12b8] sm:$0xff]  ;;  %v1789_v0 = vmul.f32 %v3635_v1, %v763_v61 }
 0x162   : > { %2790 = vst [vmem:[%s3651_s21 + $0x11f0] sm:$0xff] %v1766_v17  ;;  %2791 = vst [vmem:[%s3651_s21 + $0x11f8] sm:$0xff] %v1767_v18  ;;  %v1790_v2 = vmul.f32 %v3635_v1, %v764_v62  ;;  %v1791_v3 = vmul.f32 %v3635_v1, %v765_v63  ;;  %v766_v4 = vld [vmem:[%s3628_s6 + $0x12c0] sm:$0xff]  ;;  %v767_v5 = vld [vmem:[%s3628_s6 + $0x12c8] sm:$0xff] }
 0x163   : > { %2792 = vst [vmem:[%s3651_s21 + $0x1200] sm:$0xff] %v1768_v22  ;;  %2793 = vst [vmem:[%s3651_s21 + $0x1208] sm:$0xff] %v1769_v23  ;;  %v768_v6 = vld [vmem:[%s3628_s6 + $0x12d0] sm:$0xff]  ;;  %v1792_v7 = vmul.f32 %v3635_v1, %v766_v4  ;;  %v1793_v8 = vmul.f32 %v3635_v1, %v767_v5  ;;  %v769_v10 = vld [vmem:[%s3628_s6 + $0x12d8] sm:$0xff] }
 0x164   : > { %2794 = vst [vmem:[%s3651_s21 + $0x1210] sm:$0xff] %v1770_v24  ;;  %2795 = vst [vmem:[%s3651_s21 + $0x1218] sm:$0xff] %v1771_v28  ;;  %v1794_v9 = vmul.f32 %v3635_v1, %v768_v6  ;;  %v770_v11 = vld [vmem:[%s3628_s6 + $0x12e0] sm:$0xff]  ;;  %v771_v12 = vld [vmem:[%s3628_s6 + $0x12e8] sm:$0xff]  ;;  %v1795_v13 = vmul.f32 %v3635_v1, %v769_v10 }
 0x165   : > { %2796 = vst [vmem:[%s3651_s21 + $0x1220] sm:$0xff] %v1772_v29  ;;  %2797 = vst [vmem:[%s3651_s21 + $0x1228] sm:$0xff] %v1773_v30  ;;  %v1796_v14 = vmul.f32 %v3635_v1, %v770_v11  ;;  %v1797_v15 = vmul.f32 %v3635_v1, %v771_v12  ;;  %v772_v16 = vld [vmem:[%s3628_s6 + $0x12f0] sm:$0xff]  ;;  %v773_v17 = vld [vmem:[%s3628_s6 + $0x12f8] sm:$0xff] }
 0x166   : > { %2798 = vst [vmem:[%s3651_s21 + $0x1230] sm:$0xff] %v1774_v34  ;;  %2799 = vst [vmem:[%s3651_s21 + $0x1238] sm:$0xff] %v1775_v35  ;;  %v774_v18 = vld [vmem:[%s3628_s6 + $0x1300] sm:$0xff]  ;;  %v1798_v19 = vmul.f32 %v3635_v1, %v772_v16  ;;  %v1799_v20 = vmul.f32 %v3635_v1, %v773_v17  ;;  %v775_v22 = vld [vmem:[%s3628_s6 + $0x1308] sm:$0xff] }
 0x167   : > { %2800 = vst [vmem:[%s3651_s21 + $0x1240] sm:$0xff] %v1776_v36  ;;  %2801 = vst [vmem:[%s3651_s21 + $0x1248] sm:$0xff] %v1777_v40  ;;  %v1800_v21 = vmul.f32 %v3635_v1, %v774_v18  ;;  %v776_v23 = vld [vmem:[%s3628_s6 + $0x1310] sm:$0xff]  ;;  %v777_v24 = vld [vmem:[%s3628_s6 + $0x1318] sm:$0xff]  ;;  %v1801_v25 = vmul.f32 %v3635_v1, %v775_v22 }
 0x168   : > { %2802 = vst [vmem:[%s3651_s21 + $0x1250] sm:$0xff] %v1778_v41  ;;  %2803 = vst [vmem:[%s3651_s21 + $0x1258] sm:$0xff] %v1779_v42  ;;  %v1802_v26 = vmul.f32 %v3635_v1, %v776_v23  ;;  %v1803_v27 = vmul.f32 %v3635_v1, %v777_v24  ;;  %v778_v28 = vld [vmem:[%s3628_s6 + $0x1320] sm:$0xff]  ;;  %v779_v29 = vld [vmem:[%s3628_s6 + $0x1328] sm:$0xff] }
 0x169   : > { %2804 = vst [vmem:[%s3651_s21 + $0x1260] sm:$0xff] %v1780_v46  ;;  %2805 = vst [vmem:[%s3651_s21 + $0x1268] sm:$0xff] %v1781_v47  ;;  %v780_v30 = vld [vmem:[%s3628_s6 + $0x1330] sm:$0xff]  ;;  %v1804_v31 = vmul.f32 %v3635_v1, %v778_v28  ;;  %v1805_v32 = vmul.f32 %v3635_v1, %v779_v29  ;;  %v781_v34 = vld [vmem:[%s3628_s6 + $0x1338] sm:$0xff] }
 0x16a   : > { %2806 = vst [vmem:[%s3651_s21 + $0x1270] sm:$0xff] %v1782_v48  ;;  %2807 = vst [vmem:[%s3651_s21 + $0x1278] sm:$0xff] %v1783_v52  ;;  %v1806_v33 = vmul.f32 %v3635_v1, %v780_v30  ;;  %v782_v35 = vld [vmem:[%s3628_s6 + $0x1340] sm:$0xff]  ;;  %v783_v36 = vld [vmem:[%s3628_s6 + $0x1348] sm:$0xff]  ;;  %v1807_v37 = vmul.f32 %v3635_v1, %v781_v34 }
 0x16b   : > { %2808 = vst [vmem:[%s3651_s21 + $0x1280] sm:$0xff] %v1784_v53  ;;  %2809 = vst [vmem:[%s3651_s21 + $0x1288] sm:$0xff] %v1785_v54  ;;  %v1808_v38 = vmul.f32 %v3635_v1, %v782_v35  ;;  %v1809_v39 = vmul.f32 %v3635_v1, %v783_v36  ;;  %v784_v40 = vld [vmem:[%s3628_s6 + $0x1350] sm:$0xff]  ;;  %v785_v41 = vld [vmem:[%s3628_s6 + $0x1358] sm:$0xff] }
 0x16c   : > { %2810 = vst [vmem:[%s3651_s21 + $0x1290] sm:$0xff] %v1786_v58  ;;  %2811 = vst [vmem:[%s3651_s21 + $0x1298] sm:$0xff] %v1787_v59  ;;  %v786_v42 = vld [vmem:[%s3628_s6 + $0x1360] sm:$0xff]  ;;  %v1810_v43 = vmul.f32 %v3635_v1, %v784_v40  ;;  %v1811_v44 = vmul.f32 %v3635_v1, %v785_v41  ;;  %v787_v46 = vld [vmem:[%s3628_s6 + $0x1368] sm:$0xff] }
 0x16d   : > { %2812 = vst [vmem:[%s3651_s21 + $0x12a0] sm:$0xff] %v1788_v60  ;;  %2813 = vst [vmem:[%s3651_s21 + $0x12a8] sm:$0xff] %v1789_v0  ;;  %v1812_v45 = vmul.f32 %v3635_v1, %v786_v42  ;;  %v788_v47 = vld [vmem:[%s3628_s6 + $0x1370] sm:$0xff]  ;;  %v789_v48 = vld [vmem:[%s3628_s6 + $0x1378] sm:$0xff]  ;;  %v1813_v49 = vmul.f32 %v3635_v1, %v787_v46 }
 0x16e   : > { %2814 = vst [vmem:[%s3651_s21 + $0x12b0] sm:$0xff] %v1790_v2  ;;  %2815 = vst [vmem:[%s3651_s21 + $0x12b8] sm:$0xff] %v1791_v3  ;;  %v1814_v50 = vmul.f32 %v3635_v1, %v788_v47  ;;  %v1815_v51 = vmul.f32 %v3635_v1, %v789_v48  ;;  %v790_v52 = vld [vmem:[%s3628_s6 + $0x1380] sm:$0xff]  ;;  %v791_v53 = vld [vmem:[%s3628_s6 + $0x1388] sm:$0xff] }
 0x16f   : > { %2816 = vst [vmem:[%s3651_s21 + $0x12c0] sm:$0xff] %v1792_v7  ;;  %2817 = vst [vmem:[%s3651_s21 + $0x12c8] sm:$0xff] %v1793_v8  ;;  %v792_v54 = vld [vmem:[%s3628_s6 + $0x1390] sm:$0xff]  ;;  %v1816_v55 = vmul.f32 %v3635_v1, %v790_v52  ;;  %v1817_v56 = vmul.f32 %v3635_v1, %v791_v53  ;;  %v793_v58 = vld [vmem:[%s3628_s6 + $0x1398] sm:$0xff] }
 0x170   : > { %2818 = vst [vmem:[%s3651_s21 + $0x12d0] sm:$0xff] %v1794_v9  ;;  %2819 = vst [vmem:[%s3651_s21 + $0x12d8] sm:$0xff] %v1795_v13  ;;  %v1818_v57 = vmul.f32 %v3635_v1, %v792_v54  ;;  %v794_v59 = vld [vmem:[%s3628_s6 + $0x13a0] sm:$0xff]  ;;  %v795_v60 = vld [vmem:[%s3628_s6 + $0x13a8] sm:$0xff]  ;;  %v1819_v61 = vmul.f32 %v3635_v1, %v793_v58 }
 0x171   : > { %2820 = vst [vmem:[%s3651_s21 + $0x12e0] sm:$0xff] %v1796_v14  ;;  %2821 = vst [vmem:[%s3651_s21 + $0x12e8] sm:$0xff] %v1797_v15  ;;  %v1820_v62 = vmul.f32 %v3635_v1, %v794_v59  ;;  %v1821_v63 = vmul.f32 %v3635_v1, %v795_v60  ;;  %v796_v0 = vld [vmem:[%s3628_s6 + $0x13b0] sm:$0xff]  ;;  %v797_v2 = vld [vmem:[%s3628_s6 + $0x13b8] sm:$0xff] }
 0x172   : > { %2822 = vst [vmem:[%s3651_s21 + $0x12f0] sm:$0xff] %v1798_v19  ;;  %2823 = vst [vmem:[%s3651_s21 + $0x12f8] sm:$0xff] %v1799_v20  ;;  %v798_v3 = vld [vmem:[%s3628_s6 + $0x13c0] sm:$0xff]  ;;  %v1822_v4 = vmul.f32 %v3635_v1, %v796_v0  ;;  %v1823_v5 = vmul.f32 %v3635_v1, %v797_v2  ;;  %v799_v7 = vld [vmem:[%s3628_s6 + $0x13c8] sm:$0xff] }
 0x173   : > { %2824 = vst [vmem:[%s3651_s21 + $0x1300] sm:$0xff] %v1800_v21  ;;  %2825 = vst [vmem:[%s3651_s21 + $0x1308] sm:$0xff] %v1801_v25  ;;  %v1824_v6 = vmul.f32 %v3635_v1, %v798_v3  ;;  %v800_v8 = vld [vmem:[%s3628_s6 + $0x13d0] sm:$0xff]  ;;  %v801_v9 = vld [vmem:[%s3628_s6 + $0x13d8] sm:$0xff]  ;;  %v1825_v10 = vmul.f32 %v3635_v1, %v799_v7 }
 0x174   : > { %2826 = vst [vmem:[%s3651_s21 + $0x1310] sm:$0xff] %v1802_v26  ;;  %2827 = vst [vmem:[%s3651_s21 + $0x1318] sm:$0xff] %v1803_v27  ;;  %v1826_v11 = vmul.f32 %v3635_v1, %v800_v8  ;;  %v1827_v12 = vmul.f32 %v3635_v1, %v801_v9  ;;  %v802_v13 = vld [vmem:[%s3628_s6 + $0x13e0] sm:$0xff]  ;;  %v803_v14 = vld [vmem:[%s3628_s6 + $0x13e8] sm:$0xff] }
 0x175   : > { %2828 = vst [vmem:[%s3651_s21 + $0x1320] sm:$0xff] %v1804_v31  ;;  %2829 = vst [vmem:[%s3651_s21 + $0x1328] sm:$0xff] %v1805_v32  ;;  %v804_v15 = vld [vmem:[%s3628_s6 + $0x13f0] sm:$0xff]  ;;  %v1828_v16 = vmul.f32 %v3635_v1, %v802_v13  ;;  %v1829_v17 = vmul.f32 %v3635_v1, %v803_v14  ;;  %v805_v19 = vld [vmem:[%s3628_s6 + $0x13f8] sm:$0xff] }
 0x176   : > { %2830 = vst [vmem:[%s3651_s21 + $0x1330] sm:$0xff] %v1806_v33  ;;  %2831 = vst [vmem:[%s3651_s21 + $0x1338] sm:$0xff] %v1807_v37  ;;  %v1830_v18 = vmul.f32 %v3635_v1, %v804_v15  ;;  %v806_v20 = vld [vmem:[%s3628_s6 + $0x1400] sm:$0xff]  ;;  %v807_v21 = vld [vmem:[%s3628_s6 + $0x1408] sm:$0xff]  ;;  %v1831_v22 = vmul.f32 %v3635_v1, %v805_v19 }
 0x177   : > { %2832 = vst [vmem:[%s3651_s21 + $0x1340] sm:$0xff] %v1808_v38  ;;  %2833 = vst [vmem:[%s3651_s21 + $0x1348] sm:$0xff] %v1809_v39  ;;  %v1832_v23 = vmul.f32 %v3635_v1, %v806_v20  ;;  %v1833_v24 = vmul.f32 %v3635_v1, %v807_v21  ;;  %v808_v25 = vld [vmem:[%s3628_s6 + $0x1410] sm:$0xff]  ;;  %v809_v26 = vld [vmem:[%s3628_s6 + $0x1418] sm:$0xff] }
 0x178   : > { %2834 = vst [vmem:[%s3651_s21 + $0x1350] sm:$0xff] %v1810_v43  ;;  %2835 = vst [vmem:[%s3651_s21 + $0x1358] sm:$0xff] %v1811_v44  ;;  %v810_v27 = vld [vmem:[%s3628_s6 + $0x1420] sm:$0xff]  ;;  %v1834_v28 = vmul.f32 %v3635_v1, %v808_v25  ;;  %v1835_v29 = vmul.f32 %v3635_v1, %v809_v26  ;;  %v811_v31 = vld [vmem:[%s3628_s6 + $0x1428] sm:$0xff] }
 0x179   : > { %2836 = vst [vmem:[%s3651_s21 + $0x1360] sm:$0xff] %v1812_v45  ;;  %2837 = vst [vmem:[%s3651_s21 + $0x1368] sm:$0xff] %v1813_v49  ;;  %v1836_v30 = vmul.f32 %v3635_v1, %v810_v27  ;;  %v812_v32 = vld [vmem:[%s3628_s6 + $0x1430] sm:$0xff]  ;;  %v813_v33 = vld [vmem:[%s3628_s6 + $0x1438] sm:$0xff]  ;;  %v1837_v34 = vmul.f32 %v3635_v1, %v811_v31 }
 0x17a   : > { %2838 = vst [vmem:[%s3651_s21 + $0x1370] sm:$0xff] %v1814_v50  ;;  %2839 = vst [vmem:[%s3651_s21 + $0x1378] sm:$0xff] %v1815_v51  ;;  %v1838_v35 = vmul.f32 %v3635_v1, %v812_v32  ;;  %v1839_v36 = vmul.f32 %v3635_v1, %v813_v33  ;;  %v814_v37 = vld [vmem:[%s3628_s6 + $0x1440] sm:$0xff]  ;;  %v815_v38 = vld [vmem:[%s3628_s6 + $0x1448] sm:$0xff] }
 0x17b   : > { %2840 = vst [vmem:[%s3651_s21 + $0x1380] sm:$0xff] %v1816_v55  ;;  %2841 = vst [vmem:[%s3651_s21 + $0x1388] sm:$0xff] %v1817_v56  ;;  %v816_v39 = vld [vmem:[%s3628_s6 + $0x1450] sm:$0xff]  ;;  %v1840_v40 = vmul.f32 %v3635_v1, %v814_v37  ;;  %v1841_v41 = vmul.f32 %v3635_v1, %v815_v38  ;;  %v817_v43 = vld [vmem:[%s3628_s6 + $0x1458] sm:$0xff] }
 0x17c   : > { %2842 = vst [vmem:[%s3651_s21 + $0x1390] sm:$0xff] %v1818_v57  ;;  %2843 = vst [vmem:[%s3651_s21 + $0x1398] sm:$0xff] %v1819_v61  ;;  %v1842_v42 = vmul.f32 %v3635_v1, %v816_v39  ;;  %v818_v44 = vld [vmem:[%s3628_s6 + $0x1460] sm:$0xff]  ;;  %v819_v45 = vld [vmem:[%s3628_s6 + $0x1468] sm:$0xff]  ;;  %v1843_v46 = vmul.f32 %v3635_v1, %v817_v43 }
 0x17d   : > { %2844 = vst [vmem:[%s3651_s21 + $0x13a0] sm:$0xff] %v1820_v62  ;;  %2845 = vst [vmem:[%s3651_s21 + $0x13a8] sm:$0xff] %v1821_v63  ;;  %v1844_v47 = vmul.f32 %v3635_v1, %v818_v44  ;;  %v1845_v48 = vmul.f32 %v3635_v1, %v819_v45  ;;  %v820_v49 = vld [vmem:[%s3628_s6 + $0x1470] sm:$0xff]  ;;  %v821_v50 = vld [vmem:[%s3628_s6 + $0x1478] sm:$0xff] }
 0x17e   : > { %2846 = vst [vmem:[%s3651_s21 + $0x13b0] sm:$0xff] %v1822_v4  ;;  %2847 = vst [vmem:[%s3651_s21 + $0x13b8] sm:$0xff] %v1823_v5  ;;  %v822_v51 = vld [vmem:[%s3628_s6 + $0x1480] sm:$0xff]  ;;  %v1846_v52 = vmul.f32 %v3635_v1, %v820_v49  ;;  %v1847_v53 = vmul.f32 %v3635_v1, %v821_v50  ;;  %v823_v55 = vld [vmem:[%s3628_s6 + $0x1488] sm:$0xff] }
 0x17f   : > { %2848 = vst [vmem:[%s3651_s21 + $0x13c0] sm:$0xff] %v1824_v6  ;;  %2849 = vst [vmem:[%s3651_s21 + $0x13c8] sm:$0xff] %v1825_v10  ;;  %v1848_v54 = vmul.f32 %v3635_v1, %v822_v51  ;;  %v824_v56 = vld [vmem:[%s3628_s6 + $0x1490] sm:$0xff]  ;;  %v825_v57 = vld [vmem:[%s3628_s6 + $0x1498] sm:$0xff]  ;;  %v1849_v58 = vmul.f32 %v3635_v1, %v823_v55 }
 0x180   : > { %2850 = vst [vmem:[%s3651_s21 + $0x13d0] sm:$0xff] %v1826_v11  ;;  %2851 = vst [vmem:[%s3651_s21 + $0x13d8] sm:$0xff] %v1827_v12  ;;  %v1850_v59 = vmul.f32 %v3635_v1, %v824_v56  ;;  %v1851_v60 = vmul.f32 %v3635_v1, %v825_v57  ;;  %v826_v61 = vld [vmem:[%s3628_s6 + $0x14a0] sm:$0xff]  ;;  %v827_v62 = vld [vmem:[%s3628_s6 + $0x14a8] sm:$0xff] }
 0x181   : > { %2852 = vst [vmem:[%s3651_s21 + $0x13e0] sm:$0xff] %v1828_v16  ;;  %2853 = vst [vmem:[%s3651_s21 + $0x13e8] sm:$0xff] %v1829_v17  ;;  %v828_v63 = vld [vmem:[%s3628_s6 + $0x14b0] sm:$0xff]  ;;  %v1852_v0 = vmul.f32 %v3635_v1, %v826_v61  ;;  %v1853_v2 = vmul.f32 %v3635_v1, %v827_v62  ;;  %v829_v4 = vld [vmem:[%s3628_s6 + $0x14b8] sm:$0xff] }
 0x182   : > { %2854 = vst [vmem:[%s3651_s21 + $0x13f0] sm:$0xff] %v1830_v18  ;;  %2855 = vst [vmem:[%s3651_s21 + $0x13f8] sm:$0xff] %v1831_v22  ;;  %v1854_v3 = vmul.f32 %v3635_v1, %v828_v63  ;;  %v830_v5 = vld [vmem:[%s3628_s6 + $0x14c0] sm:$0xff]  ;;  %v831_v6 = vld [vmem:[%s3628_s6 + $0x14c8] sm:$0xff]  ;;  %v1855_v7 = vmul.f32 %v3635_v1, %v829_v4 }
 0x183   : > { %2856 = vst [vmem:[%s3651_s21 + $0x1400] sm:$0xff] %v1832_v23  ;;  %2857 = vst [vmem:[%s3651_s21 + $0x1408] sm:$0xff] %v1833_v24  ;;  %v1856_v8 = vmul.f32 %v3635_v1, %v830_v5  ;;  %v1857_v9 = vmul.f32 %v3635_v1, %v831_v6  ;;  %v832_v10 = vld [vmem:[%s3628_s6 + $0x14d0] sm:$0xff]  ;;  %v833_v11 = vld [vmem:[%s3628_s6 + $0x14d8] sm:$0xff] }
 0x184   : > { %2858 = vst [vmem:[%s3651_s21 + $0x1410] sm:$0xff] %v1834_v28  ;;  %2859 = vst [vmem:[%s3651_s21 + $0x1418] sm:$0xff] %v1835_v29  ;;  %v834_v12 = vld [vmem:[%s3628_s6 + $0x14e0] sm:$0xff]  ;;  %v1858_v13 = vmul.f32 %v3635_v1, %v832_v10  ;;  %v1859_v14 = vmul.f32 %v3635_v1, %v833_v11  ;;  %v835_v16 = vld [vmem:[%s3628_s6 + $0x14e8] sm:$0xff] }
 0x185   : > { %2860 = vst [vmem:[%s3651_s21 + $0x1420] sm:$0xff] %v1836_v30  ;;  %2861 = vst [vmem:[%s3651_s21 + $0x1428] sm:$0xff] %v1837_v34  ;;  %v1860_v15 = vmul.f32 %v3635_v1, %v834_v12  ;;  %v836_v17 = vld [vmem:[%s3628_s6 + $0x14f0] sm:$0xff]  ;;  %v837_v18 = vld [vmem:[%s3628_s6 + $0x14f8] sm:$0xff]  ;;  %v1861_v19 = vmul.f32 %v3635_v1, %v835_v16 }
 0x186   : > { %2862 = vst [vmem:[%s3651_s21 + $0x1430] sm:$0xff] %v1838_v35  ;;  %2863 = vst [vmem:[%s3651_s21 + $0x1438] sm:$0xff] %v1839_v36  ;;  %v1862_v20 = vmul.f32 %v3635_v1, %v836_v17  ;;  %v1863_v21 = vmul.f32 %v3635_v1, %v837_v18  ;;  %v838_v22 = vld [vmem:[%s3628_s6 + $0x1500] sm:$0xff]  ;;  %v839_v23 = vld [vmem:[%s3628_s6 + $0x1508] sm:$0xff] }
 0x187   : > { %2864 = vst [vmem:[%s3651_s21 + $0x1440] sm:$0xff] %v1840_v40  ;;  %2865 = vst [vmem:[%s3651_s21 + $0x1448] sm:$0xff] %v1841_v41  ;;  %v840_v24 = vld [vmem:[%s3628_s6 + $0x1510] sm:$0xff]  ;;  %v1864_v25 = vmul.f32 %v3635_v1, %v838_v22  ;;  %v1865_v26 = vmul.f32 %v3635_v1, %v839_v23  ;;  %v841_v28 = vld [vmem:[%s3628_s6 + $0x1518] sm:$0xff] }
 0x188   : > { %2866 = vst [vmem:[%s3651_s21 + $0x1450] sm:$0xff] %v1842_v42  ;;  %2867 = vst [vmem:[%s3651_s21 + $0x1458] sm:$0xff] %v1843_v46  ;;  %v1866_v27 = vmul.f32 %v3635_v1, %v840_v24  ;;  %v842_v29 = vld [vmem:[%s3628_s6 + $0x1520] sm:$0xff]  ;;  %v843_v30 = vld [vmem:[%s3628_s6 + $0x1528] sm:$0xff]  ;;  %v1867_v31 = vmul.f32 %v3635_v1, %v841_v28 }
 0x189   : > { %2868 = vst [vmem:[%s3651_s21 + $0x1460] sm:$0xff] %v1844_v47  ;;  %2869 = vst [vmem:[%s3651_s21 + $0x1468] sm:$0xff] %v1845_v48  ;;  %v1868_v32 = vmul.f32 %v3635_v1, %v842_v29  ;;  %v1869_v33 = vmul.f32 %v3635_v1, %v843_v30  ;;  %v844_v34 = vld [vmem:[%s3628_s6 + $0x1530] sm:$0xff]  ;;  %v845_v35 = vld [vmem:[%s3628_s6 + $0x1538] sm:$0xff] }
 0x18a   : > { %2870 = vst [vmem:[%s3651_s21 + $0x1470] sm:$0xff] %v1846_v52  ;;  %2871 = vst [vmem:[%s3651_s21 + $0x1478] sm:$0xff] %v1847_v53  ;;  %v846_v36 = vld [vmem:[%s3628_s6 + $0x1540] sm:$0xff]  ;;  %v1870_v37 = vmul.f32 %v3635_v1, %v844_v34  ;;  %v1871_v38 = vmul.f32 %v3635_v1, %v845_v35  ;;  %v847_v40 = vld [vmem:[%s3628_s6 + $0x1548] sm:$0xff] }
 0x18b   : > { %2872 = vst [vmem:[%s3651_s21 + $0x1480] sm:$0xff] %v1848_v54  ;;  %2873 = vst [vmem:[%s3651_s21 + $0x1488] sm:$0xff] %v1849_v58  ;;  %v1872_v39 = vmul.f32 %v3635_v1, %v846_v36  ;;  %v848_v41 = vld [vmem:[%s3628_s6 + $0x1550] sm:$0xff]  ;;  %v849_v42 = vld [vmem:[%s3628_s6 + $0x1558] sm:$0xff]  ;;  %v1873_v43 = vmul.f32 %v3635_v1, %v847_v40 }
 0x18c   : > { %2874 = vst [vmem:[%s3651_s21 + $0x1490] sm:$0xff] %v1850_v59  ;;  %2875 = vst [vmem:[%s3651_s21 + $0x1498] sm:$0xff] %v1851_v60  ;;  %v1874_v44 = vmul.f32 %v3635_v1, %v848_v41  ;;  %v1875_v45 = vmul.f32 %v3635_v1, %v849_v42  ;;  %v850_v46 = vld [vmem:[%s3628_s6 + $0x1560] sm:$0xff]  ;;  %v851_v47 = vld [vmem:[%s3628_s6 + $0x1568] sm:$0xff] }
 0x18d   : > { %2876 = vst [vmem:[%s3651_s21 + $0x14a0] sm:$0xff] %v1852_v0  ;;  %2877 = vst [vmem:[%s3651_s21 + $0x14a8] sm:$0xff] %v1853_v2  ;;  %v852_v48 = vld [vmem:[%s3628_s6 + $0x1570] sm:$0xff]  ;;  %v1876_v49 = vmul.f32 %v3635_v1, %v850_v46  ;;  %v1877_v50 = vmul.f32 %v3635_v1, %v851_v47  ;;  %v853_v52 = vld [vmem:[%s3628_s6 + $0x1578] sm:$0xff] }
 0x18e   : > { %2878 = vst [vmem:[%s3651_s21 + $0x14b0] sm:$0xff] %v1854_v3  ;;  %2879 = vst [vmem:[%s3651_s21 + $0x14b8] sm:$0xff] %v1855_v7  ;;  %v1878_v51 = vmul.f32 %v3635_v1, %v852_v48  ;;  %v854_v53 = vld [vmem:[%s3628_s6 + $0x1580] sm:$0xff]  ;;  %v855_v54 = vld [vmem:[%s3628_s6 + $0x1588] sm:$0xff]  ;;  %v1879_v55 = vmul.f32 %v3635_v1, %v853_v52 }
 0x18f   : > { %2880 = vst [vmem:[%s3651_s21 + $0x14c0] sm:$0xff] %v1856_v8  ;;  %2881 = vst [vmem:[%s3651_s21 + $0x14c8] sm:$0xff] %v1857_v9  ;;  %v1880_v56 = vmul.f32 %v3635_v1, %v854_v53  ;;  %v1881_v57 = vmul.f32 %v3635_v1, %v855_v54  ;;  %v856_v58 = vld [vmem:[%s3628_s6 + $0x1590] sm:$0xff]  ;;  %v857_v59 = vld [vmem:[%s3628_s6 + $0x1598] sm:$0xff] }
 0x190   : > { %2882 = vst [vmem:[%s3651_s21 + $0x14d0] sm:$0xff] %v1858_v13  ;;  %2883 = vst [vmem:[%s3651_s21 + $0x14d8] sm:$0xff] %v1859_v14  ;;  %v858_v60 = vld [vmem:[%s3628_s6 + $0x15a0] sm:$0xff]  ;;  %v1882_v61 = vmul.f32 %v3635_v1, %v856_v58  ;;  %v1883_v62 = vmul.f32 %v3635_v1, %v857_v59  ;;  %v859_v0 = vld [vmem:[%s3628_s6 + $0x15a8] sm:$0xff] }
 0x191   : > { %2884 = vst [vmem:[%s3651_s21 + $0x14e0] sm:$0xff] %v1860_v15  ;;  %2885 = vst [vmem:[%s3651_s21 + $0x14e8] sm:$0xff] %v1861_v19  ;;  %v1884_v63 = vmul.f32 %v3635_v1, %v858_v60  ;;  %v860_v2 = vld [vmem:[%s3628_s6 + $0x15b0] sm:$0xff]  ;;  %v861_v3 = vld [vmem:[%s3628_s6 + $0x15b8] sm:$0xff]  ;;  %v1885_v4 = vmul.f32 %v3635_v1, %v859_v0 }
 0x192   : > { %2886 = vst [vmem:[%s3651_s21 + $0x14f0] sm:$0xff] %v1862_v20  ;;  %2887 = vst [vmem:[%s3651_s21 + $0x14f8] sm:$0xff] %v1863_v21  ;;  %v1886_v5 = vmul.f32 %v3635_v1, %v860_v2  ;;  %v1887_v6 = vmul.f32 %v3635_v1, %v861_v3  ;;  %v862_v7 = vld [vmem:[%s3628_s6 + $0x15c0] sm:$0xff]  ;;  %v863_v8 = vld [vmem:[%s3628_s6 + $0x15c8] sm:$0xff] }
 0x193   : > { %2888 = vst [vmem:[%s3651_s21 + $0x1500] sm:$0xff] %v1864_v25  ;;  %2889 = vst [vmem:[%s3651_s21 + $0x1508] sm:$0xff] %v1865_v26  ;;  %v864_v9 = vld [vmem:[%s3628_s6 + $0x15d0] sm:$0xff]  ;;  %v1888_v10 = vmul.f32 %v3635_v1, %v862_v7  ;;  %v1889_v11 = vmul.f32 %v3635_v1, %v863_v8  ;;  %v865_v13 = vld [vmem:[%s3628_s6 + $0x15d8] sm:$0xff] }
 0x194   : > { %2890 = vst [vmem:[%s3651_s21 + $0x1510] sm:$0xff] %v1866_v27  ;;  %2891 = vst [vmem:[%s3651_s21 + $0x1518] sm:$0xff] %v1867_v31  ;;  %v1890_v12 = vmul.f32 %v3635_v1, %v864_v9  ;;  %v866_v14 = vld [vmem:[%s3628_s6 + $0x15e0] sm:$0xff]  ;;  %v867_v15 = vld [vmem:[%s3628_s6 + $0x15e8] sm:$0xff]  ;;  %v1891_v16 = vmul.f32 %v3635_v1, %v865_v13 }
 0x195   : > { %2892 = vst [vmem:[%s3651_s21 + $0x1520] sm:$0xff] %v1868_v32  ;;  %2893 = vst [vmem:[%s3651_s21 + $0x1528] sm:$0xff] %v1869_v33  ;;  %v1892_v17 = vmul.f32 %v3635_v1, %v866_v14  ;;  %v1893_v18 = vmul.f32 %v3635_v1, %v867_v15  ;;  %v868_v19 = vld [vmem:[%s3628_s6 + $0x15f0] sm:$0xff]  ;;  %v869_v20 = vld [vmem:[%s3628_s6 + $0x15f8] sm:$0xff] }
 0x196   : > { %2894 = vst [vmem:[%s3651_s21 + $0x1530] sm:$0xff] %v1870_v37  ;;  %2895 = vst [vmem:[%s3651_s21 + $0x1538] sm:$0xff] %v1871_v38  ;;  %v870_v21 = vld [vmem:[%s3628_s6 + $0x1600] sm:$0xff]  ;;  %v1894_v22 = vmul.f32 %v3635_v1, %v868_v19  ;;  %v1895_v23 = vmul.f32 %v3635_v1, %v869_v20  ;;  %v871_v25 = vld [vmem:[%s3628_s6 + $0x1608] sm:$0xff] }
 0x197   : > { %2896 = vst [vmem:[%s3651_s21 + $0x1540] sm:$0xff] %v1872_v39  ;;  %2897 = vst [vmem:[%s3651_s21 + $0x1548] sm:$0xff] %v1873_v43  ;;  %v1896_v24 = vmul.f32 %v3635_v1, %v870_v21  ;;  %v872_v26 = vld [vmem:[%s3628_s6 + $0x1610] sm:$0xff]  ;;  %v873_v27 = vld [vmem:[%s3628_s6 + $0x1618] sm:$0xff]  ;;  %v1897_v28 = vmul.f32 %v3635_v1, %v871_v25 }
 0x198   : > { %2898 = vst [vmem:[%s3651_s21 + $0x1550] sm:$0xff] %v1874_v44  ;;  %2899 = vst [vmem:[%s3651_s21 + $0x1558] sm:$0xff] %v1875_v45  ;;  %v1898_v29 = vmul.f32 %v3635_v1, %v872_v26  ;;  %v1899_v30 = vmul.f32 %v3635_v1, %v873_v27  ;;  %v874_v31 = vld [vmem:[%s3628_s6 + $0x1620] sm:$0xff]  ;;  %v875_v32 = vld [vmem:[%s3628_s6 + $0x1628] sm:$0xff] }
 0x199   : > { %2900 = vst [vmem:[%s3651_s21 + $0x1560] sm:$0xff] %v1876_v49  ;;  %2901 = vst [vmem:[%s3651_s21 + $0x1568] sm:$0xff] %v1877_v50  ;;  %v876_v33 = vld [vmem:[%s3628_s6 + $0x1630] sm:$0xff]  ;;  %v1900_v34 = vmul.f32 %v3635_v1, %v874_v31  ;;  %v1901_v35 = vmul.f32 %v3635_v1, %v875_v32  ;;  %v877_v37 = vld [vmem:[%s3628_s6 + $0x1638] sm:$0xff] }
 0x19a   : > { %2902 = vst [vmem:[%s3651_s21 + $0x1570] sm:$0xff] %v1878_v51  ;;  %2903 = vst [vmem:[%s3651_s21 + $0x1578] sm:$0xff] %v1879_v55  ;;  %v1902_v36 = vmul.f32 %v3635_v1, %v876_v33  ;;  %v878_v38 = vld [vmem:[%s3628_s6 + $0x1640] sm:$0xff]  ;;  %v879_v39 = vld [vmem:[%s3628_s6 + $0x1648] sm:$0xff]  ;;  %v1903_v40 = vmul.f32 %v3635_v1, %v877_v37 }
 0x19b   : > { %2904 = vst [vmem:[%s3651_s21 + $0x1580] sm:$0xff] %v1880_v56  ;;  %2905 = vst [vmem:[%s3651_s21 + $0x1588] sm:$0xff] %v1881_v57  ;;  %v1904_v41 = vmul.f32 %v3635_v1, %v878_v38  ;;  %v1905_v42 = vmul.f32 %v3635_v1, %v879_v39  ;;  %v880_v43 = vld [vmem:[%s3628_s6 + $0x1650] sm:$0xff]  ;;  %v881_v44 = vld [vmem:[%s3628_s6 + $0x1658] sm:$0xff] }
 0x19c   : > { %2906 = vst [vmem:[%s3651_s21 + $0x1590] sm:$0xff] %v1882_v61  ;;  %2907 = vst [vmem:[%s3651_s21 + $0x1598] sm:$0xff] %v1883_v62  ;;  %v882_v45 = vld [vmem:[%s3628_s6 + $0x1660] sm:$0xff]  ;;  %v1906_v46 = vmul.f32 %v3635_v1, %v880_v43  ;;  %v1907_v47 = vmul.f32 %v3635_v1, %v881_v44  ;;  %v883_v49 = vld [vmem:[%s3628_s6 + $0x1668] sm:$0xff] }
 0x19d   : > { %2908 = vst [vmem:[%s3651_s21 + $0x15a0] sm:$0xff] %v1884_v63  ;;  %2909 = vst [vmem:[%s3651_s21 + $0x15a8] sm:$0xff] %v1885_v4  ;;  %v1908_v48 = vmul.f32 %v3635_v1, %v882_v45  ;;  %v884_v50 = vld [vmem:[%s3628_s6 + $0x1670] sm:$0xff]  ;;  %v885_v51 = vld [vmem:[%s3628_s6 + $0x1678] sm:$0xff]  ;;  %v1909_v52 = vmul.f32 %v3635_v1, %v883_v49 }
 0x19e   : > { %2910 = vst [vmem:[%s3651_s21 + $0x15b0] sm:$0xff] %v1886_v5  ;;  %2911 = vst [vmem:[%s3651_s21 + $0x15b8] sm:$0xff] %v1887_v6  ;;  %v1910_v53 = vmul.f32 %v3635_v1, %v884_v50  ;;  %v1911_v54 = vmul.f32 %v3635_v1, %v885_v51  ;;  %v886_v55 = vld [vmem:[%s3628_s6 + $0x1680] sm:$0xff]  ;;  %v887_v56 = vld [vmem:[%s3628_s6 + $0x1688] sm:$0xff] }
 0x19f   : > { %2912 = vst [vmem:[%s3651_s21 + $0x15c0] sm:$0xff] %v1888_v10  ;;  %2913 = vst [vmem:[%s3651_s21 + $0x15c8] sm:$0xff] %v1889_v11  ;;  %v888_v57 = vld [vmem:[%s3628_s6 + $0x1690] sm:$0xff]  ;;  %v1912_v58 = vmul.f32 %v3635_v1, %v886_v55  ;;  %v1913_v59 = vmul.f32 %v3635_v1, %v887_v56  ;;  %v889_v61 = vld [vmem:[%s3628_s6 + $0x1698] sm:$0xff] }
 0x1a0   : > { %2914 = vst [vmem:[%s3651_s21 + $0x15d0] sm:$0xff] %v1890_v12  ;;  %2915 = vst [vmem:[%s3651_s21 + $0x15d8] sm:$0xff] %v1891_v16  ;;  %v1914_v60 = vmul.f32 %v3635_v1, %v888_v57  ;;  %v890_v62 = vld [vmem:[%s3628_s6 + $0x16a0] sm:$0xff]  ;;  %v891_v63 = vld [vmem:[%s3628_s6 + $0x16a8] sm:$0xff]  ;;  %v1915_v0 = vmul.f32 %v3635_v1, %v889_v61 }
 0x1a1   : > { %2916 = vst [vmem:[%s3651_s21 + $0x15e0] sm:$0xff] %v1892_v17  ;;  %2917 = vst [vmem:[%s3651_s21 + $0x15e8] sm:$0xff] %v1893_v18  ;;  %v1916_v2 = vmul.f32 %v3635_v1, %v890_v62  ;;  %v1917_v3 = vmul.f32 %v3635_v1, %v891_v63  ;;  %v892_v4 = vld [vmem:[%s3628_s6 + $0x16b0] sm:$0xff]  ;;  %v893_v5 = vld [vmem:[%s3628_s6 + $0x16b8] sm:$0xff] }
 0x1a2   : > { %2918 = vst [vmem:[%s3651_s21 + $0x15f0] sm:$0xff] %v1894_v22  ;;  %2919 = vst [vmem:[%s3651_s21 + $0x15f8] sm:$0xff] %v1895_v23  ;;  %v894_v6 = vld [vmem:[%s3628_s6 + $0x16c0] sm:$0xff]  ;;  %v1918_v7 = vmul.f32 %v3635_v1, %v892_v4  ;;  %v1919_v8 = vmul.f32 %v3635_v1, %v893_v5  ;;  %v895_v10 = vld [vmem:[%s3628_s6 + $0x16c8] sm:$0xff] }
 0x1a3   : > { %2920 = vst [vmem:[%s3651_s21 + $0x1600] sm:$0xff] %v1896_v24  ;;  %2921 = vst [vmem:[%s3651_s21 + $0x1608] sm:$0xff] %v1897_v28  ;;  %v1920_v9 = vmul.f32 %v3635_v1, %v894_v6  ;;  %v896_v11 = vld [vmem:[%s3628_s6 + $0x16d0] sm:$0xff]  ;;  %v897_v12 = vld [vmem:[%s3628_s6 + $0x16d8] sm:$0xff]  ;;  %v1921_v13 = vmul.f32 %v3635_v1, %v895_v10 }
 0x1a4   : > { %2922 = vst [vmem:[%s3651_s21 + $0x1610] sm:$0xff] %v1898_v29  ;;  %2923 = vst [vmem:[%s3651_s21 + $0x1618] sm:$0xff] %v1899_v30  ;;  %v1922_v14 = vmul.f32 %v3635_v1, %v896_v11  ;;  %v1923_v15 = vmul.f32 %v3635_v1, %v897_v12  ;;  %v898_v16 = vld [vmem:[%s3628_s6 + $0x16e0] sm:$0xff]  ;;  %v899_v17 = vld [vmem:[%s3628_s6 + $0x16e8] sm:$0xff] }
 0x1a5   : > { %2924 = vst [vmem:[%s3651_s21 + $0x1620] sm:$0xff] %v1900_v34  ;;  %2925 = vst [vmem:[%s3651_s21 + $0x1628] sm:$0xff] %v1901_v35  ;;  %v900_v18 = vld [vmem:[%s3628_s6 + $0x16f0] sm:$0xff]  ;;  %v1924_v19 = vmul.f32 %v3635_v1, %v898_v16  ;;  %v1925_v20 = vmul.f32 %v3635_v1, %v899_v17  ;;  %v901_v22 = vld [vmem:[%s3628_s6 + $0x16f8] sm:$0xff] }
 0x1a6   : > { %2926 = vst [vmem:[%s3651_s21 + $0x1630] sm:$0xff] %v1902_v36  ;;  %2927 = vst [vmem:[%s3651_s21 + $0x1638] sm:$0xff] %v1903_v40  ;;  %v1926_v21 = vmul.f32 %v3635_v1, %v900_v18  ;;  %v902_v23 = vld [vmem:[%s3628_s6 + $0x1700] sm:$0xff]  ;;  %v903_v24 = vld [vmem:[%s3628_s6 + $0x1708] sm:$0xff]  ;;  %v1927_v25 = vmul.f32 %v3635_v1, %v901_v22 }
 0x1a7   : > { %2928 = vst [vmem:[%s3651_s21 + $0x1640] sm:$0xff] %v1904_v41  ;;  %2929 = vst [vmem:[%s3651_s21 + $0x1648] sm:$0xff] %v1905_v42  ;;  %v1928_v26 = vmul.f32 %v3635_v1, %v902_v23  ;;  %v1929_v27 = vmul.f32 %v3635_v1, %v903_v24  ;;  %v904_v28 = vld [vmem:[%s3628_s6 + $0x1710] sm:$0xff]  ;;  %v905_v29 = vld [vmem:[%s3628_s6 + $0x1718] sm:$0xff] }
 0x1a8   : > { %2930 = vst [vmem:[%s3651_s21 + $0x1650] sm:$0xff] %v1906_v46  ;;  %2931 = vst [vmem:[%s3651_s21 + $0x1658] sm:$0xff] %v1907_v47  ;;  %v906_v30 = vld [vmem:[%s3628_s6 + $0x1720] sm:$0xff]  ;;  %v1930_v31 = vmul.f32 %v3635_v1, %v904_v28  ;;  %v1931_v32 = vmul.f32 %v3635_v1, %v905_v29  ;;  %v907_v34 = vld [vmem:[%s3628_s6 + $0x1728] sm:$0xff] }
 0x1a9   : > { %2932 = vst [vmem:[%s3651_s21 + $0x1660] sm:$0xff] %v1908_v48  ;;  %2933 = vst [vmem:[%s3651_s21 + $0x1668] sm:$0xff] %v1909_v52  ;;  %v1932_v33 = vmul.f32 %v3635_v1, %v906_v30  ;;  %v908_v35 = vld [vmem:[%s3628_s6 + $0x1730] sm:$0xff]  ;;  %v909_v36 = vld [vmem:[%s3628_s6 + $0x1738] sm:$0xff]  ;;  %v1933_v37 = vmul.f32 %v3635_v1, %v907_v34 }
 0x1aa   : > { %2934 = vst [vmem:[%s3651_s21 + $0x1670] sm:$0xff] %v1910_v53  ;;  %2935 = vst [vmem:[%s3651_s21 + $0x1678] sm:$0xff] %v1911_v54  ;;  %v1934_v38 = vmul.f32 %v3635_v1, %v908_v35  ;;  %v1935_v39 = vmul.f32 %v3635_v1, %v909_v36  ;;  %v910_v40 = vld [vmem:[%s3628_s6 + $0x1740] sm:$0xff]  ;;  %v911_v41 = vld [vmem:[%s3628_s6 + $0x1748] sm:$0xff] }
 0x1ab   : > { %2936 = vst [vmem:[%s3651_s21 + $0x1680] sm:$0xff] %v1912_v58  ;;  %2937 = vst [vmem:[%s3651_s21 + $0x1688] sm:$0xff] %v1913_v59  ;;  %v912_v42 = vld [vmem:[%s3628_s6 + $0x1750] sm:$0xff]  ;;  %v1936_v43 = vmul.f32 %v3635_v1, %v910_v40  ;;  %v1937_v44 = vmul.f32 %v3635_v1, %v911_v41  ;;  %v913_v46 = vld [vmem:[%s3628_s6 + $0x1758] sm:$0xff] }
 0x1ac   : > { %2938 = vst [vmem:[%s3651_s21 + $0x1690] sm:$0xff] %v1914_v60  ;;  %2939 = vst [vmem:[%s3651_s21 + $0x1698] sm:$0xff] %v1915_v0  ;;  %v1938_v45 = vmul.f32 %v3635_v1, %v912_v42  ;;  %v914_v47 = vld [vmem:[%s3628_s6 + $0x1760] sm:$0xff]  ;;  %v915_v48 = vld [vmem:[%s3628_s6 + $0x1768] sm:$0xff]  ;;  %v1939_v49 = vmul.f32 %v3635_v1, %v913_v46 }
 0x1ad   : > { %2940 = vst [vmem:[%s3651_s21 + $0x16a0] sm:$0xff] %v1916_v2  ;;  %2941 = vst [vmem:[%s3651_s21 + $0x16a8] sm:$0xff] %v1917_v3  ;;  %v1940_v50 = vmul.f32 %v3635_v1, %v914_v47  ;;  %v1941_v51 = vmul.f32 %v3635_v1, %v915_v48  ;;  %v916_v52 = vld [vmem:[%s3628_s6 + $0x1770] sm:$0xff]  ;;  %v917_v53 = vld [vmem:[%s3628_s6 + $0x1778] sm:$0xff] }
 0x1ae   : > { %2942 = vst [vmem:[%s3651_s21 + $0x16b0] sm:$0xff] %v1918_v7  ;;  %2943 = vst [vmem:[%s3651_s21 + $0x16b8] sm:$0xff] %v1919_v8  ;;  %v918_v54 = vld [vmem:[%s3628_s6 + $0x1780] sm:$0xff]  ;;  %v1942_v55 = vmul.f32 %v3635_v1, %v916_v52  ;;  %v1943_v56 = vmul.f32 %v3635_v1, %v917_v53  ;;  %v919_v58 = vld [vmem:[%s3628_s6 + $0x1788] sm:$0xff] }
 0x1af   : > { %2944 = vst [vmem:[%s3651_s21 + $0x16c0] sm:$0xff] %v1920_v9  ;;  %2945 = vst [vmem:[%s3651_s21 + $0x16c8] sm:$0xff] %v1921_v13  ;;  %v1944_v57 = vmul.f32 %v3635_v1, %v918_v54  ;;  %v920_v59 = vld [vmem:[%s3628_s6 + $0x1790] sm:$0xff]  ;;  %v921_v60 = vld [vmem:[%s3628_s6 + $0x1798] sm:$0xff]  ;;  %v1945_v61 = vmul.f32 %v3635_v1, %v919_v58 }
 0x1b0   : > { %2946 = vst [vmem:[%s3651_s21 + $0x16d0] sm:$0xff] %v1922_v14  ;;  %2947 = vst [vmem:[%s3651_s21 + $0x16d8] sm:$0xff] %v1923_v15  ;;  %v1946_v62 = vmul.f32 %v3635_v1, %v920_v59  ;;  %v1947_v63 = vmul.f32 %v3635_v1, %v921_v60  ;;  %v922_v0 = vld [vmem:[%s3628_s6 + $0x17a0] sm:$0xff]  ;;  %v923_v2 = vld [vmem:[%s3628_s6 + $0x17a8] sm:$0xff] }
 0x1b1   : > { %2948 = vst [vmem:[%s3651_s21 + $0x16e0] sm:$0xff] %v1924_v19  ;;  %2949 = vst [vmem:[%s3651_s21 + $0x16e8] sm:$0xff] %v1925_v20  ;;  %v924_v3 = vld [vmem:[%s3628_s6 + $0x17b0] sm:$0xff]  ;;  %v1948_v4 = vmul.f32 %v3635_v1, %v922_v0  ;;  %v1949_v5 = vmul.f32 %v3635_v1, %v923_v2  ;;  %v925_v7 = vld [vmem:[%s3628_s6 + $0x17b8] sm:$0xff] }
 0x1b2   : > { %2950 = vst [vmem:[%s3651_s21 + $0x16f0] sm:$0xff] %v1926_v21  ;;  %2951 = vst [vmem:[%s3651_s21 + $0x16f8] sm:$0xff] %v1927_v25  ;;  %v1950_v6 = vmul.f32 %v3635_v1, %v924_v3  ;;  %v926_v8 = vld [vmem:[%s3628_s6 + $0x17c0] sm:$0xff]  ;;  %v927_v9 = vld [vmem:[%s3628_s6 + $0x17c8] sm:$0xff]  ;;  %v1951_v10 = vmul.f32 %v3635_v1, %v925_v7 }
 0x1b3   : > { %2952 = vst [vmem:[%s3651_s21 + $0x1700] sm:$0xff] %v1928_v26  ;;  %2953 = vst [vmem:[%s3651_s21 + $0x1708] sm:$0xff] %v1929_v27  ;;  %v1952_v11 = vmul.f32 %v3635_v1, %v926_v8  ;;  %v1953_v12 = vmul.f32 %v3635_v1, %v927_v9  ;;  %v928_v13 = vld [vmem:[%s3628_s6 + $0x17d0] sm:$0xff]  ;;  %v929_v14 = vld [vmem:[%s3628_s6 + $0x17d8] sm:$0xff] }
 0x1b4   : > { %2954 = vst [vmem:[%s3651_s21 + $0x1710] sm:$0xff] %v1930_v31  ;;  %2955 = vst [vmem:[%s3651_s21 + $0x1718] sm:$0xff] %v1931_v32  ;;  %v930_v15 = vld [vmem:[%s3628_s6 + $0x17e0] sm:$0xff]  ;;  %v1954_v16 = vmul.f32 %v3635_v1, %v928_v13  ;;  %v1955_v17 = vmul.f32 %v3635_v1, %v929_v14  ;;  %v931_v19 = vld [vmem:[%s3628_s6 + $0x17e8] sm:$0xff] }
 0x1b5   : > { %2956 = vst [vmem:[%s3651_s21 + $0x1720] sm:$0xff] %v1932_v33  ;;  %2957 = vst [vmem:[%s3651_s21 + $0x1728] sm:$0xff] %v1933_v37  ;;  %v1956_v18 = vmul.f32 %v3635_v1, %v930_v15  ;;  %v932_v20 = vld [vmem:[%s3628_s6 + $0x17f0] sm:$0xff]  ;;  %v933_v21 = vld [vmem:[%s3628_s6 + $0x17f8] sm:$0xff]  ;;  %v1957_v22 = vmul.f32 %v3635_v1, %v931_v19 }
 0x1b6   : > { %2958 = vst [vmem:[%s3651_s21 + $0x1730] sm:$0xff] %v1934_v38  ;;  %2959 = vst [vmem:[%s3651_s21 + $0x1738] sm:$0xff] %v1935_v39  ;;  %v1958_v23 = vmul.f32 %v3635_v1, %v932_v20  ;;  %v1959_v24 = vmul.f32 %v3635_v1, %v933_v21  ;;  %v934_v25 = vld [vmem:[%s3628_s6 + $0x1800] sm:$0xff]  ;;  %v935_v26 = vld [vmem:[%s3628_s6 + $0x1808] sm:$0xff] }
 0x1b7   : > { %2960 = vst [vmem:[%s3651_s21 + $0x1740] sm:$0xff] %v1936_v43  ;;  %2961 = vst [vmem:[%s3651_s21 + $0x1748] sm:$0xff] %v1937_v44  ;;  %v936_v27 = vld [vmem:[%s3628_s6 + $0x1810] sm:$0xff]  ;;  %v1960_v28 = vmul.f32 %v3635_v1, %v934_v25  ;;  %v1961_v29 = vmul.f32 %v3635_v1, %v935_v26  ;;  %v937_v31 = vld [vmem:[%s3628_s6 + $0x1818] sm:$0xff] }
 0x1b8   : > { %2962 = vst [vmem:[%s3651_s21 + $0x1750] sm:$0xff] %v1938_v45  ;;  %2963 = vst [vmem:[%s3651_s21 + $0x1758] sm:$0xff] %v1939_v49  ;;  %v1962_v30 = vmul.f32 %v3635_v1, %v936_v27  ;;  %v938_v32 = vld [vmem:[%s3628_s6 + $0x1820] sm:$0xff]  ;;  %v939_v33 = vld [vmem:[%s3628_s6 + $0x1828] sm:$0xff]  ;;  %v1963_v34 = vmul.f32 %v3635_v1, %v937_v31 }
 0x1b9   : > { %2964 = vst [vmem:[%s3651_s21 + $0x1760] sm:$0xff] %v1940_v50  ;;  %2965 = vst [vmem:[%s3651_s21 + $0x1768] sm:$0xff] %v1941_v51  ;;  %v1964_v35 = vmul.f32 %v3635_v1, %v938_v32  ;;  %v1965_v36 = vmul.f32 %v3635_v1, %v939_v33  ;;  %v940_v37 = vld [vmem:[%s3628_s6 + $0x1830] sm:$0xff]  ;;  %v941_v38 = vld [vmem:[%s3628_s6 + $0x1838] sm:$0xff] }
 0x1ba   : > { %2966 = vst [vmem:[%s3651_s21 + $0x1770] sm:$0xff] %v1942_v55  ;;  %2967 = vst [vmem:[%s3651_s21 + $0x1778] sm:$0xff] %v1943_v56  ;;  %v942_v39 = vld [vmem:[%s3628_s6 + $0x1840] sm:$0xff]  ;;  %v1966_v40 = vmul.f32 %v3635_v1, %v940_v37  ;;  %v1967_v41 = vmul.f32 %v3635_v1, %v941_v38  ;;  %v943_v43 = vld [vmem:[%s3628_s6 + $0x1848] sm:$0xff] }
 0x1bb   : > { %2968 = vst [vmem:[%s3651_s21 + $0x1780] sm:$0xff] %v1944_v57  ;;  %2969 = vst [vmem:[%s3651_s21 + $0x1788] sm:$0xff] %v1945_v61  ;;  %v1968_v42 = vmul.f32 %v3635_v1, %v942_v39  ;;  %v944_v44 = vld [vmem:[%s3628_s6 + $0x1850] sm:$0xff]  ;;  %v945_v45 = vld [vmem:[%s3628_s6 + $0x1858] sm:$0xff]  ;;  %v1969_v46 = vmul.f32 %v3635_v1, %v943_v43 }
 0x1bc   : > { %2970 = vst [vmem:[%s3651_s21 + $0x1790] sm:$0xff] %v1946_v62  ;;  %2971 = vst [vmem:[%s3651_s21 + $0x1798] sm:$0xff] %v1947_v63  ;;  %v1970_v47 = vmul.f32 %v3635_v1, %v944_v44  ;;  %v1971_v48 = vmul.f32 %v3635_v1, %v945_v45  ;;  %v946_v49 = vld [vmem:[%s3628_s6 + $0x1860] sm:$0xff]  ;;  %v947_v50 = vld [vmem:[%s3628_s6 + $0x1868] sm:$0xff] }
 0x1bd   : > { %2972 = vst [vmem:[%s3651_s21 + $0x17a0] sm:$0xff] %v1948_v4  ;;  %2973 = vst [vmem:[%s3651_s21 + $0x17a8] sm:$0xff] %v1949_v5  ;;  %v948_v51 = vld [vmem:[%s3628_s6 + $0x1870] sm:$0xff]  ;;  %v1972_v52 = vmul.f32 %v3635_v1, %v946_v49  ;;  %v1973_v53 = vmul.f32 %v3635_v1, %v947_v50  ;;  %v949_v55 = vld [vmem:[%s3628_s6 + $0x1878] sm:$0xff] }
 0x1be   : > { %2974 = vst [vmem:[%s3651_s21 + $0x17b0] sm:$0xff] %v1950_v6  ;;  %2975 = vst [vmem:[%s3651_s21 + $0x17b8] sm:$0xff] %v1951_v10  ;;  %v1974_v54 = vmul.f32 %v3635_v1, %v948_v51  ;;  %v950_v56 = vld [vmem:[%s3628_s6 + $0x1880] sm:$0xff]  ;;  %v951_v57 = vld [vmem:[%s3628_s6 + $0x1888] sm:$0xff]  ;;  %v1975_v58 = vmul.f32 %v3635_v1, %v949_v55 }
 0x1bf   : > { %2976 = vst [vmem:[%s3651_s21 + $0x17c0] sm:$0xff] %v1952_v11  ;;  %2977 = vst [vmem:[%s3651_s21 + $0x17c8] sm:$0xff] %v1953_v12  ;;  %v1976_v59 = vmul.f32 %v3635_v1, %v950_v56  ;;  %v1977_v60 = vmul.f32 %v3635_v1, %v951_v57  ;;  %v952_v61 = vld [vmem:[%s3628_s6 + $0x1890] sm:$0xff]  ;;  %v953_v62 = vld [vmem:[%s3628_s6 + $0x1898] sm:$0xff] }
 0x1c0   : > { %2978 = vst [vmem:[%s3651_s21 + $0x17d0] sm:$0xff] %v1954_v16  ;;  %2979 = vst [vmem:[%s3651_s21 + $0x17d8] sm:$0xff] %v1955_v17  ;;  %v954_v63 = vld [vmem:[%s3628_s6 + $0x18a0] sm:$0xff]  ;;  %v1978_v0 = vmul.f32 %v3635_v1, %v952_v61  ;;  %v1979_v2 = vmul.f32 %v3635_v1, %v953_v62  ;;  %v955_v4 = vld [vmem:[%s3628_s6 + $0x18a8] sm:$0xff] }
 0x1c1   : > { %2980 = vst [vmem:[%s3651_s21 + $0x17e0] sm:$0xff] %v1956_v18  ;;  %2981 = vst [vmem:[%s3651_s21 + $0x17e8] sm:$0xff] %v1957_v22  ;;  %v1980_v3 = vmul.f32 %v3635_v1, %v954_v63  ;;  %v956_v5 = vld [vmem:[%s3628_s6 + $0x18b0] sm:$0xff]  ;;  %v957_v6 = vld [vmem:[%s3628_s6 + $0x18b8] sm:$0xff]  ;;  %v1981_v7 = vmul.f32 %v3635_v1, %v955_v4 }
 0x1c2   : > { %2982 = vst [vmem:[%s3651_s21 + $0x17f0] sm:$0xff] %v1958_v23  ;;  %2983 = vst [vmem:[%s3651_s21 + $0x17f8] sm:$0xff] %v1959_v24  ;;  %v1982_v8 = vmul.f32 %v3635_v1, %v956_v5  ;;  %v1983_v9 = vmul.f32 %v3635_v1, %v957_v6  ;;  %v958_v10 = vld [vmem:[%s3628_s6 + $0x18c0] sm:$0xff]  ;;  %v959_v11 = vld [vmem:[%s3628_s6 + $0x18c8] sm:$0xff] }
 0x1c3   : > { %2984 = vst [vmem:[%s3651_s21 + $0x1800] sm:$0xff] %v1960_v28  ;;  %2985 = vst [vmem:[%s3651_s21 + $0x1808] sm:$0xff] %v1961_v29  ;;  %v960_v12 = vld [vmem:[%s3628_s6 + $0x18d0] sm:$0xff]  ;;  %v1984_v13 = vmul.f32 %v3635_v1, %v958_v10  ;;  %v1985_v14 = vmul.f32 %v3635_v1, %v959_v11  ;;  %v961_v16 = vld [vmem:[%s3628_s6 + $0x18d8] sm:$0xff] }
 0x1c4   : > { %2986 = vst [vmem:[%s3651_s21 + $0x1810] sm:$0xff] %v1962_v30  ;;  %2987 = vst [vmem:[%s3651_s21 + $0x1818] sm:$0xff] %v1963_v34  ;;  %v1986_v15 = vmul.f32 %v3635_v1, %v960_v12  ;;  %v962_v17 = vld [vmem:[%s3628_s6 + $0x18e0] sm:$0xff]  ;;  %v963_v18 = vld [vmem:[%s3628_s6 + $0x18e8] sm:$0xff]  ;;  %v1987_v19 = vmul.f32 %v3635_v1, %v961_v16 }
 0x1c5   : > { %2988 = vst [vmem:[%s3651_s21 + $0x1820] sm:$0xff] %v1964_v35  ;;  %2989 = vst [vmem:[%s3651_s21 + $0x1828] sm:$0xff] %v1965_v36  ;;  %v1988_v20 = vmul.f32 %v3635_v1, %v962_v17  ;;  %v1989_v21 = vmul.f32 %v3635_v1, %v963_v18  ;;  %v964_v22 = vld [vmem:[%s3628_s6 + $0x18f0] sm:$0xff]  ;;  %v965_v23 = vld [vmem:[%s3628_s6 + $0x18f8] sm:$0xff] }
 0x1c6   : > { %2990 = vst [vmem:[%s3651_s21 + $0x1830] sm:$0xff] %v1966_v40  ;;  %2991 = vst [vmem:[%s3651_s21 + $0x1838] sm:$0xff] %v1967_v41  ;;  %v966_v24 = vld [vmem:[%s3628_s6 + $0x1900] sm:$0xff]  ;;  %v1990_v25 = vmul.f32 %v3635_v1, %v964_v22  ;;  %v1991_v26 = vmul.f32 %v3635_v1, %v965_v23  ;;  %v967_v28 = vld [vmem:[%s3628_s6 + $0x1908] sm:$0xff] }
 0x1c7   : > { %2992 = vst [vmem:[%s3651_s21 + $0x1840] sm:$0xff] %v1968_v42  ;;  %2993 = vst [vmem:[%s3651_s21 + $0x1848] sm:$0xff] %v1969_v46  ;;  %v1992_v27 = vmul.f32 %v3635_v1, %v966_v24  ;;  %v968_v29 = vld [vmem:[%s3628_s6 + $0x1910] sm:$0xff]  ;;  %v969_v30 = vld [vmem:[%s3628_s6 + $0x1918] sm:$0xff]  ;;  %v1993_v31 = vmul.f32 %v3635_v1, %v967_v28 }
 0x1c8   : > { %2994 = vst [vmem:[%s3651_s21 + $0x1850] sm:$0xff] %v1970_v47  ;;  %2995 = vst [vmem:[%s3651_s21 + $0x1858] sm:$0xff] %v1971_v48  ;;  %v1994_v32 = vmul.f32 %v3635_v1, %v968_v29  ;;  %v1995_v33 = vmul.f32 %v3635_v1, %v969_v30  ;;  %v970_v34 = vld [vmem:[%s3628_s6 + $0x1920] sm:$0xff]  ;;  %v971_v35 = vld [vmem:[%s3628_s6 + $0x1928] sm:$0xff] }
 0x1c9   : > { %2996 = vst [vmem:[%s3651_s21 + $0x1860] sm:$0xff] %v1972_v52  ;;  %2997 = vst [vmem:[%s3651_s21 + $0x1868] sm:$0xff] %v1973_v53  ;;  %v972_v36 = vld [vmem:[%s3628_s6 + $0x1930] sm:$0xff]  ;;  %v1996_v37 = vmul.f32 %v3635_v1, %v970_v34  ;;  %v1997_v38 = vmul.f32 %v3635_v1, %v971_v35  ;;  %v973_v40 = vld [vmem:[%s3628_s6 + $0x1938] sm:$0xff] }
 0x1ca   : > { %2998 = vst [vmem:[%s3651_s21 + $0x1870] sm:$0xff] %v1974_v54  ;;  %2999 = vst [vmem:[%s3651_s21 + $0x1878] sm:$0xff] %v1975_v58  ;;  %v1998_v39 = vmul.f32 %v3635_v1, %v972_v36  ;;  %v974_v41 = vld [vmem:[%s3628_s6 + $0x1940] sm:$0xff]  ;;  %v975_v42 = vld [vmem:[%s3628_s6 + $0x1948] sm:$0xff]  ;;  %v1999_v43 = vmul.f32 %v3635_v1, %v973_v40 }
 0x1cb   : > { %3000 = vst [vmem:[%s3651_s21 + $0x1880] sm:$0xff] %v1976_v59  ;;  %3001 = vst [vmem:[%s3651_s21 + $0x1888] sm:$0xff] %v1977_v60  ;;  %v2000_v44 = vmul.f32 %v3635_v1, %v974_v41  ;;  %v2001_v45 = vmul.f32 %v3635_v1, %v975_v42  ;;  %v976_v46 = vld [vmem:[%s3628_s6 + $0x1950] sm:$0xff]  ;;  %v977_v47 = vld [vmem:[%s3628_s6 + $0x1958] sm:$0xff] }
 0x1cc   : > { %3002 = vst [vmem:[%s3651_s21 + $0x1890] sm:$0xff] %v1978_v0  ;;  %3003 = vst [vmem:[%s3651_s21 + $0x1898] sm:$0xff] %v1979_v2  ;;  %v978_v48 = vld [vmem:[%s3628_s6 + $0x1960] sm:$0xff]  ;;  %v2002_v49 = vmul.f32 %v3635_v1, %v976_v46  ;;  %v2003_v50 = vmul.f32 %v3635_v1, %v977_v47  ;;  %v979_v52 = vld [vmem:[%s3628_s6 + $0x1968] sm:$0xff] }
 0x1cd   : > { %3004 = vst [vmem:[%s3651_s21 + $0x18a0] sm:$0xff] %v1980_v3  ;;  %3005 = vst [vmem:[%s3651_s21 + $0x18a8] sm:$0xff] %v1981_v7  ;;  %v2004_v51 = vmul.f32 %v3635_v1, %v978_v48  ;;  %v980_v53 = vld [vmem:[%s3628_s6 + $0x1970] sm:$0xff]  ;;  %v981_v54 = vld [vmem:[%s3628_s6 + $0x1978] sm:$0xff]  ;;  %v2005_v55 = vmul.f32 %v3635_v1, %v979_v52 }
 0x1ce   : > { %3006 = vst [vmem:[%s3651_s21 + $0x18b0] sm:$0xff] %v1982_v8  ;;  %3007 = vst [vmem:[%s3651_s21 + $0x18b8] sm:$0xff] %v1983_v9  ;;  %v2006_v56 = vmul.f32 %v3635_v1, %v980_v53  ;;  %v2007_v57 = vmul.f32 %v3635_v1, %v981_v54  ;;  %v982_v58 = vld [vmem:[%s3628_s6 + $0x1980] sm:$0xff]  ;;  %v983_v59 = vld [vmem:[%s3628_s6 + $0x1988] sm:$0xff] }
 0x1cf   : > { %3008 = vst [vmem:[%s3651_s21 + $0x18c0] sm:$0xff] %v1984_v13  ;;  %3009 = vst [vmem:[%s3651_s21 + $0x18c8] sm:$0xff] %v1985_v14  ;;  %v984_v60 = vld [vmem:[%s3628_s6 + $0x1990] sm:$0xff]  ;;  %v2008_v61 = vmul.f32 %v3635_v1, %v982_v58  ;;  %v2009_v62 = vmul.f32 %v3635_v1, %v983_v59  ;;  %v985_v0 = vld [vmem:[%s3628_s6 + $0x1998] sm:$0xff] }
 0x1d0   : > { %3010 = vst [vmem:[%s3651_s21 + $0x18d0] sm:$0xff] %v1986_v15  ;;  %3011 = vst [vmem:[%s3651_s21 + $0x18d8] sm:$0xff] %v1987_v19  ;;  %v2010_v63 = vmul.f32 %v3635_v1, %v984_v60  ;;  %v986_v2 = vld [vmem:[%s3628_s6 + $0x19a0] sm:$0xff]  ;;  %v987_v3 = vld [vmem:[%s3628_s6 + $0x19a8] sm:$0xff]  ;;  %v2011_v4 = vmul.f32 %v3635_v1, %v985_v0 }
 0x1d1   : > { %3012 = vst [vmem:[%s3651_s21 + $0x18e0] sm:$0xff] %v1988_v20  ;;  %3013 = vst [vmem:[%s3651_s21 + $0x18e8] sm:$0xff] %v1989_v21  ;;  %v2012_v5 = vmul.f32 %v3635_v1, %v986_v2  ;;  %v2013_v6 = vmul.f32 %v3635_v1, %v987_v3  ;;  %v988_v7 = vld [vmem:[%s3628_s6 + $0x19b0] sm:$0xff]  ;;  %v989_v8 = vld [vmem:[%s3628_s6 + $0x19b8] sm:$0xff] }
 0x1d2   : > { %3014 = vst [vmem:[%s3651_s21 + $0x18f0] sm:$0xff] %v1990_v25  ;;  %3015 = vst [vmem:[%s3651_s21 + $0x18f8] sm:$0xff] %v1991_v26  ;;  %v990_v9 = vld [vmem:[%s3628_s6 + $0x19c0] sm:$0xff]  ;;  %v2014_v10 = vmul.f32 %v3635_v1, %v988_v7  ;;  %v2015_v11 = vmul.f32 %v3635_v1, %v989_v8  ;;  %v991_v13 = vld [vmem:[%s3628_s6 + $0x19c8] sm:$0xff] }
 0x1d3   : > { %3016 = vst [vmem:[%s3651_s21 + $0x1900] sm:$0xff] %v1992_v27  ;;  %3017 = vst [vmem:[%s3651_s21 + $0x1908] sm:$0xff] %v1993_v31  ;;  %v2016_v12 = vmul.f32 %v3635_v1, %v990_v9  ;;  %v992_v14 = vld [vmem:[%s3628_s6 + $0x19d0] sm:$0xff]  ;;  %v993_v15 = vld [vmem:[%s3628_s6 + $0x19d8] sm:$0xff]  ;;  %v2017_v16 = vmul.f32 %v3635_v1, %v991_v13 }
 0x1d4   : > { %3018 = vst [vmem:[%s3651_s21 + $0x1910] sm:$0xff] %v1994_v32  ;;  %3019 = vst [vmem:[%s3651_s21 + $0x1918] sm:$0xff] %v1995_v33  ;;  %v2018_v17 = vmul.f32 %v3635_v1, %v992_v14  ;;  %v2019_v18 = vmul.f32 %v3635_v1, %v993_v15  ;;  %v994_v19 = vld [vmem:[%s3628_s6 + $0x19e0] sm:$0xff]  ;;  %v995_v20 = vld [vmem:[%s3628_s6 + $0x19e8] sm:$0xff] }
 0x1d5   : > { %3020 = vst [vmem:[%s3651_s21 + $0x1920] sm:$0xff] %v1996_v37  ;;  %3021 = vst [vmem:[%s3651_s21 + $0x1928] sm:$0xff] %v1997_v38  ;;  %v996_v21 = vld [vmem:[%s3628_s6 + $0x19f0] sm:$0xff]  ;;  %v2020_v22 = vmul.f32 %v3635_v1, %v994_v19  ;;  %v2021_v23 = vmul.f32 %v3635_v1, %v995_v20  ;;  %v997_v25 = vld [vmem:[%s3628_s6 + $0x19f8] sm:$0xff] }
 0x1d6   : > { %3022 = vst [vmem:[%s3651_s21 + $0x1930] sm:$0xff] %v1998_v39  ;;  %3023 = vst [vmem:[%s3651_s21 + $0x1938] sm:$0xff] %v1999_v43  ;;  %v2022_v24 = vmul.f32 %v3635_v1, %v996_v21  ;;  %v998_v26 = vld [vmem:[%s3628_s6 + $0x1a00] sm:$0xff]  ;;  %v999_v27 = vld [vmem:[%s3628_s6 + $0x1a08] sm:$0xff]  ;;  %v2023_v28 = vmul.f32 %v3635_v1, %v997_v25 }
 0x1d7   : > { %3024 = vst [vmem:[%s3651_s21 + $0x1940] sm:$0xff] %v2000_v44  ;;  %3025 = vst [vmem:[%s3651_s21 + $0x1948] sm:$0xff] %v2001_v45  ;;  %v2024_v29 = vmul.f32 %v3635_v1, %v998_v26  ;;  %v2025_v30 = vmul.f32 %v3635_v1, %v999_v27  ;;  %v1000_v31 = vld [vmem:[%s3628_s6 + $0x1a10] sm:$0xff]  ;;  %v1001_v32 = vld [vmem:[%s3628_s6 + $0x1a18] sm:$0xff] }
 0x1d8   : > { %3026 = vst [vmem:[%s3651_s21 + $0x1950] sm:$0xff] %v2002_v49  ;;  %3027 = vst [vmem:[%s3651_s21 + $0x1958] sm:$0xff] %v2003_v50  ;;  %v1002_v33 = vld [vmem:[%s3628_s6 + $0x1a20] sm:$0xff]  ;;  %v2026_v34 = vmul.f32 %v3635_v1, %v1000_v31  ;;  %v2027_v35 = vmul.f32 %v3635_v1, %v1001_v32  ;;  %v1003_v37 = vld [vmem:[%s3628_s6 + $0x1a28] sm:$0xff] }
 0x1d9   : > { %3028 = vst [vmem:[%s3651_s21 + $0x1960] sm:$0xff] %v2004_v51  ;;  %3029 = vst [vmem:[%s3651_s21 + $0x1968] sm:$0xff] %v2005_v55  ;;  %v2028_v36 = vmul.f32 %v3635_v1, %v1002_v33  ;;  %v1004_v38 = vld [vmem:[%s3628_s6 + $0x1a30] sm:$0xff]  ;;  %v1005_v39 = vld [vmem:[%s3628_s6 + $0x1a38] sm:$0xff]  ;;  %v2029_v40 = vmul.f32 %v3635_v1, %v1003_v37 }
 0x1da   : > { %3030 = vst [vmem:[%s3651_s21 + $0x1970] sm:$0xff] %v2006_v56  ;;  %3031 = vst [vmem:[%s3651_s21 + $0x1978] sm:$0xff] %v2007_v57  ;;  %v2030_v41 = vmul.f32 %v3635_v1, %v1004_v38  ;;  %v2031_v42 = vmul.f32 %v3635_v1, %v1005_v39  ;;  %v1006_v43 = vld [vmem:[%s3628_s6 + $0x1a40] sm:$0xff]  ;;  %v1007_v44 = vld [vmem:[%s3628_s6 + $0x1a48] sm:$0xff] }
 0x1db   : > { %3032 = vst [vmem:[%s3651_s21 + $0x1980] sm:$0xff] %v2008_v61  ;;  %3033 = vst [vmem:[%s3651_s21 + $0x1988] sm:$0xff] %v2009_v62  ;;  %v1008_v45 = vld [vmem:[%s3628_s6 + $0x1a50] sm:$0xff]  ;;  %v2032_v46 = vmul.f32 %v3635_v1, %v1006_v43  ;;  %v2033_v47 = vmul.f32 %v3635_v1, %v1007_v44  ;;  %v1009_v49 = vld [vmem:[%s3628_s6 + $0x1a58] sm:$0xff] }
 0x1dc   : > { %3034 = vst [vmem:[%s3651_s21 + $0x1990] sm:$0xff] %v2010_v63  ;;  %3035 = vst [vmem:[%s3651_s21 + $0x1998] sm:$0xff] %v2011_v4  ;;  %v2034_v48 = vmul.f32 %v3635_v1, %v1008_v45  ;;  %v1010_v50 = vld [vmem:[%s3628_s6 + $0x1a60] sm:$0xff]  ;;  %v1011_v51 = vld [vmem:[%s3628_s6 + $0x1a68] sm:$0xff]  ;;  %v2035_v52 = vmul.f32 %v3635_v1, %v1009_v49 }
 0x1dd   : > { %3036 = vst [vmem:[%s3651_s21 + $0x19a0] sm:$0xff] %v2012_v5  ;;  %3037 = vst [vmem:[%s3651_s21 + $0x19a8] sm:$0xff] %v2013_v6  ;;  %v2036_v53 = vmul.f32 %v3635_v1, %v1010_v50  ;;  %v2037_v54 = vmul.f32 %v3635_v1, %v1011_v51  ;;  %v1012_v55 = vld [vmem:[%s3628_s6 + $0x1a70] sm:$0xff]  ;;  %v1013_v56 = vld [vmem:[%s3628_s6 + $0x1a78] sm:$0xff] }
 0x1de   : > { %3038 = vst [vmem:[%s3651_s21 + $0x19b0] sm:$0xff] %v2014_v10  ;;  %3039 = vst [vmem:[%s3651_s21 + $0x19b8] sm:$0xff] %v2015_v11  ;;  %v1014_v57 = vld [vmem:[%s3628_s6 + $0x1a80] sm:$0xff]  ;;  %v2038_v58 = vmul.f32 %v3635_v1, %v1012_v55  ;;  %v2039_v59 = vmul.f32 %v3635_v1, %v1013_v56  ;;  %v1015_v61 = vld [vmem:[%s3628_s6 + $0x1a88] sm:$0xff] }
 0x1df   : > { %3040 = vst [vmem:[%s3651_s21 + $0x19c0] sm:$0xff] %v2016_v12  ;;  %3041 = vst [vmem:[%s3651_s21 + $0x19c8] sm:$0xff] %v2017_v16  ;;  %v2040_v60 = vmul.f32 %v3635_v1, %v1014_v57  ;;  %v1016_v62 = vld [vmem:[%s3628_s6 + $0x1a90] sm:$0xff]  ;;  %v1017_v63 = vld [vmem:[%s3628_s6 + $0x1a98] sm:$0xff]  ;;  %v2041_v0 = vmul.f32 %v3635_v1, %v1015_v61 }
 0x1e0   : > { %3042 = vst [vmem:[%s3651_s21 + $0x19d0] sm:$0xff] %v2018_v17  ;;  %3043 = vst [vmem:[%s3651_s21 + $0x19d8] sm:$0xff] %v2019_v18  ;;  %v2042_v2 = vmul.f32 %v3635_v1, %v1016_v62  ;;  %v2043_v3 = vmul.f32 %v3635_v1, %v1017_v63  ;;  %v1018_v4 = vld [vmem:[%s3628_s6 + $0x1aa0] sm:$0xff]  ;;  %v1019_v5 = vld [vmem:[%s3628_s6 + $0x1aa8] sm:$0xff] }
 0x1e1   : > { %3044 = vst [vmem:[%s3651_s21 + $0x19e0] sm:$0xff] %v2020_v22  ;;  %3045 = vst [vmem:[%s3651_s21 + $0x19e8] sm:$0xff] %v2021_v23  ;;  %v1020_v6 = vld [vmem:[%s3628_s6 + $0x1ab0] sm:$0xff]  ;;  %v2044_v7 = vmul.f32 %v3635_v1, %v1018_v4  ;;  %v2045_v8 = vmul.f32 %v3635_v1, %v1019_v5  ;;  %v1021_v10 = vld [vmem:[%s3628_s6 + $0x1ab8] sm:$0xff] }
 0x1e2   : > { %3046 = vst [vmem:[%s3651_s21 + $0x19f0] sm:$0xff] %v2022_v24  ;;  %3047 = vst [vmem:[%s3651_s21 + $0x19f8] sm:$0xff] %v2023_v28  ;;  %v2046_v9 = vmul.f32 %v3635_v1, %v1020_v6  ;;  %v1022_v11 = vld [vmem:[%s3628_s6 + $0x1ac0] sm:$0xff]  ;;  %v1023_v12 = vld [vmem:[%s3628_s6 + $0x1ac8] sm:$0xff]  ;;  %v2047_v13 = vmul.f32 %v3635_v1, %v1021_v10 }
 0x1e3   : > { %3048 = vst [vmem:[%s3651_s21 + $0x1a00] sm:$0xff] %v2024_v29  ;;  %3049 = vst [vmem:[%s3651_s21 + $0x1a08] sm:$0xff] %v2025_v30  ;;  %v2048_v14 = vmul.f32 %v3635_v1, %v1022_v11  ;;  %v2049_v15 = vmul.f32 %v3635_v1, %v1023_v12  ;;  %v1024_v16 = vld [vmem:[%s3628_s6 + $0x1ad0] sm:$0xff]  ;;  %v1025_v17 = vld [vmem:[%s3628_s6 + $0x1ad8] sm:$0xff] }
 0x1e4   : > { %3050 = vst [vmem:[%s3651_s21 + $0x1a10] sm:$0xff] %v2026_v34  ;;  %3051 = vst [vmem:[%s3651_s21 + $0x1a18] sm:$0xff] %v2027_v35  ;;  %v1026_v18 = vld [vmem:[%s3628_s6 + $0x1ae0] sm:$0xff]  ;;  %v2050_v19 = vmul.f32 %v3635_v1, %v1024_v16  ;;  %v2051_v20 = vmul.f32 %v3635_v1, %v1025_v17  ;;  %v1027_v22 = vld [vmem:[%s3628_s6 + $0x1ae8] sm:$0xff] }
 0x1e5   : > { %3052 = vst [vmem:[%s3651_s21 + $0x1a20] sm:$0xff] %v2028_v36  ;;  %3053 = vst [vmem:[%s3651_s21 + $0x1a28] sm:$0xff] %v2029_v40  ;;  %v2052_v21 = vmul.f32 %v3635_v1, %v1026_v18  ;;  %v1028_v23 = vld [vmem:[%s3628_s6 + $0x1af0] sm:$0xff]  ;;  %v1029_v24 = vld [vmem:[%s3628_s6 + $0x1af8] sm:$0xff]  ;;  %v2053_v25 = vmul.f32 %v3635_v1, %v1027_v22 }
 0x1e6   : > { %3054 = vst [vmem:[%s3651_s21 + $0x1a30] sm:$0xff] %v2030_v41  ;;  %3055 = vst [vmem:[%s3651_s21 + $0x1a38] sm:$0xff] %v2031_v42  ;;  %v2054_v26 = vmul.f32 %v3635_v1, %v1028_v23  ;;  %v2055_v27 = vmul.f32 %v3635_v1, %v1029_v24  ;;  %v1030_v28 = vld [vmem:[%s3628_s6 + $0x1b00] sm:$0xff]  ;;  %v1031_v29 = vld [vmem:[%s3628_s6 + $0x1b08] sm:$0xff] }
 0x1e7   : > { %3056 = vst [vmem:[%s3651_s21 + $0x1a40] sm:$0xff] %v2032_v46  ;;  %3057 = vst [vmem:[%s3651_s21 + $0x1a48] sm:$0xff] %v2033_v47  ;;  %v1032_v30 = vld [vmem:[%s3628_s6 + $0x1b10] sm:$0xff]  ;;  %v2056_v31 = vmul.f32 %v3635_v1, %v1030_v28  ;;  %v2057_v32 = vmul.f32 %v3635_v1, %v1031_v29  ;;  %v1033_v34 = vld [vmem:[%s3628_s6 + $0x1b18] sm:$0xff] }
 0x1e8   : > { %3058 = vst [vmem:[%s3651_s21 + $0x1a50] sm:$0xff] %v2034_v48  ;;  %3059 = vst [vmem:[%s3651_s21 + $0x1a58] sm:$0xff] %v2035_v52  ;;  %v2058_v33 = vmul.f32 %v3635_v1, %v1032_v30  ;;  %v1034_v35 = vld [vmem:[%s3628_s6 + $0x1b20] sm:$0xff]  ;;  %v1035_v36 = vld [vmem:[%s3628_s6 + $0x1b28] sm:$0xff]  ;;  %v2059_v37 = vmul.f32 %v3635_v1, %v1033_v34 }
 0x1e9   : > { %3060 = vst [vmem:[%s3651_s21 + $0x1a60] sm:$0xff] %v2036_v53  ;;  %3061 = vst [vmem:[%s3651_s21 + $0x1a68] sm:$0xff] %v2037_v54  ;;  %v2060_v38 = vmul.f32 %v3635_v1, %v1034_v35  ;;  %v2061_v39 = vmul.f32 %v3635_v1, %v1035_v36  ;;  %v1036_v40 = vld [vmem:[%s3628_s6 + $0x1b30] sm:$0xff]  ;;  %v1037_v41 = vld [vmem:[%s3628_s6 + $0x1b38] sm:$0xff] }
 0x1ea   : > { %3062 = vst [vmem:[%s3651_s21 + $0x1a70] sm:$0xff] %v2038_v58  ;;  %3063 = vst [vmem:[%s3651_s21 + $0x1a78] sm:$0xff] %v2039_v59  ;;  %v1038_v42 = vld [vmem:[%s3628_s6 + $0x1b40] sm:$0xff]  ;;  %v2062_v43 = vmul.f32 %v3635_v1, %v1036_v40  ;;  %v2063_v44 = vmul.f32 %v3635_v1, %v1037_v41  ;;  %v1039_v46 = vld [vmem:[%s3628_s6 + $0x1b48] sm:$0xff] }
 0x1eb   : > { %3064 = vst [vmem:[%s3651_s21 + $0x1a80] sm:$0xff] %v2040_v60  ;;  %3065 = vst [vmem:[%s3651_s21 + $0x1a88] sm:$0xff] %v2041_v0  ;;  %v2064_v45 = vmul.f32 %v3635_v1, %v1038_v42  ;;  %v1040_v47 = vld [vmem:[%s3628_s6 + $0x1b50] sm:$0xff]  ;;  %v1041_v48 = vld [vmem:[%s3628_s6 + $0x1b58] sm:$0xff]  ;;  %v2065_v49 = vmul.f32 %v3635_v1, %v1039_v46 }
 0x1ec   : > { %3066 = vst [vmem:[%s3651_s21 + $0x1a90] sm:$0xff] %v2042_v2  ;;  %3067 = vst [vmem:[%s3651_s21 + $0x1a98] sm:$0xff] %v2043_v3  ;;  %v2066_v50 = vmul.f32 %v3635_v1, %v1040_v47  ;;  %v2067_v51 = vmul.f32 %v3635_v1, %v1041_v48  ;;  %v1042_v52 = vld [vmem:[%s3628_s6 + $0x1b60] sm:$0xff]  ;;  %v1043_v53 = vld [vmem:[%s3628_s6 + $0x1b68] sm:$0xff] }
 0x1ed   : > { %3068 = vst [vmem:[%s3651_s21 + $0x1aa0] sm:$0xff] %v2044_v7  ;;  %3069 = vst [vmem:[%s3651_s21 + $0x1aa8] sm:$0xff] %v2045_v8  ;;  %v1044_v54 = vld [vmem:[%s3628_s6 + $0x1b70] sm:$0xff]  ;;  %v2068_v55 = vmul.f32 %v3635_v1, %v1042_v52  ;;  %v2069_v56 = vmul.f32 %v3635_v1, %v1043_v53  ;;  %v1045_v58 = vld [vmem:[%s3628_s6 + $0x1b78] sm:$0xff] }
 0x1ee   : > { %3070 = vst [vmem:[%s3651_s21 + $0x1ab0] sm:$0xff] %v2046_v9  ;;  %3071 = vst [vmem:[%s3651_s21 + $0x1ab8] sm:$0xff] %v2047_v13  ;;  %v2070_v57 = vmul.f32 %v3635_v1, %v1044_v54  ;;  %v1046_v59 = vld [vmem:[%s3628_s6 + $0x1b80] sm:$0xff]  ;;  %v1047_v60 = vld [vmem:[%s3628_s6 + $0x1b88] sm:$0xff]  ;;  %v2071_v61 = vmul.f32 %v3635_v1, %v1045_v58 }
 0x1ef   : > { %3072 = vst [vmem:[%s3651_s21 + $0x1ac0] sm:$0xff] %v2048_v14  ;;  %3073 = vst [vmem:[%s3651_s21 + $0x1ac8] sm:$0xff] %v2049_v15  ;;  %v2072_v62 = vmul.f32 %v3635_v1, %v1046_v59  ;;  %v2073_v63 = vmul.f32 %v3635_v1, %v1047_v60  ;;  %v1048_v0 = vld [vmem:[%s3628_s6 + $0x1b90] sm:$0xff]  ;;  %v1049_v2 = vld [vmem:[%s3628_s6 + $0x1b98] sm:$0xff] }
 0x1f0   : > { %3074 = vst [vmem:[%s3651_s21 + $0x1ad0] sm:$0xff] %v2050_v19  ;;  %3075 = vst [vmem:[%s3651_s21 + $0x1ad8] sm:$0xff] %v2051_v20  ;;  %v1050_v3 = vld [vmem:[%s3628_s6 + $0x1ba0] sm:$0xff]  ;;  %v2074_v4 = vmul.f32 %v3635_v1, %v1048_v0  ;;  %v2075_v5 = vmul.f32 %v3635_v1, %v1049_v2  ;;  %v1051_v7 = vld [vmem:[%s3628_s6 + $0x1ba8] sm:$0xff] }
 0x1f1   : > { %3076 = vst [vmem:[%s3651_s21 + $0x1ae0] sm:$0xff] %v2052_v21  ;;  %3077 = vst [vmem:[%s3651_s21 + $0x1ae8] sm:$0xff] %v2053_v25  ;;  %v2076_v6 = vmul.f32 %v3635_v1, %v1050_v3  ;;  %v1052_v8 = vld [vmem:[%s3628_s6 + $0x1bb0] sm:$0xff]  ;;  %v1053_v9 = vld [vmem:[%s3628_s6 + $0x1bb8] sm:$0xff]  ;;  %v2077_v10 = vmul.f32 %v3635_v1, %v1051_v7 }
 0x1f2   : > { %3078 = vst [vmem:[%s3651_s21 + $0x1af0] sm:$0xff] %v2054_v26  ;;  %3079 = vst [vmem:[%s3651_s21 + $0x1af8] sm:$0xff] %v2055_v27  ;;  %v2078_v11 = vmul.f32 %v3635_v1, %v1052_v8  ;;  %v2079_v12 = vmul.f32 %v3635_v1, %v1053_v9  ;;  %v1054_v13 = vld [vmem:[%s3628_s6 + $0x1bc0] sm:$0xff]  ;;  %v1055_v14 = vld [vmem:[%s3628_s6 + $0x1bc8] sm:$0xff] }
 0x1f3   : > { %3080 = vst [vmem:[%s3651_s21 + $0x1b00] sm:$0xff] %v2056_v31  ;;  %3081 = vst [vmem:[%s3651_s21 + $0x1b08] sm:$0xff] %v2057_v32  ;;  %v1056_v15 = vld [vmem:[%s3628_s6 + $0x1bd0] sm:$0xff]  ;;  %v2080_v16 = vmul.f32 %v3635_v1, %v1054_v13  ;;  %v2081_v17 = vmul.f32 %v3635_v1, %v1055_v14  ;;  %v1057_v19 = vld [vmem:[%s3628_s6 + $0x1bd8] sm:$0xff] }
 0x1f4   : > { %3082 = vst [vmem:[%s3651_s21 + $0x1b10] sm:$0xff] %v2058_v33  ;;  %3083 = vst [vmem:[%s3651_s21 + $0x1b18] sm:$0xff] %v2059_v37  ;;  %v2082_v18 = vmul.f32 %v3635_v1, %v1056_v15  ;;  %v1058_v20 = vld [vmem:[%s3628_s6 + $0x1be0] sm:$0xff]  ;;  %v1059_v21 = vld [vmem:[%s3628_s6 + $0x1be8] sm:$0xff]  ;;  %v2083_v22 = vmul.f32 %v3635_v1, %v1057_v19 }
 0x1f5   : > { %3084 = vst [vmem:[%s3651_s21 + $0x1b20] sm:$0xff] %v2060_v38  ;;  %3085 = vst [vmem:[%s3651_s21 + $0x1b28] sm:$0xff] %v2061_v39  ;;  %v2084_v23 = vmul.f32 %v3635_v1, %v1058_v20  ;;  %v2085_v24 = vmul.f32 %v3635_v1, %v1059_v21  ;;  %v1060_v25 = vld [vmem:[%s3628_s6 + $0x1bf0] sm:$0xff]  ;;  %v1061_v26 = vld [vmem:[%s3628_s6 + $0x1bf8] sm:$0xff] }
 0x1f6   : > { %3086 = vst [vmem:[%s3651_s21 + $0x1b30] sm:$0xff] %v2062_v43  ;;  %3087 = vst [vmem:[%s3651_s21 + $0x1b38] sm:$0xff] %v2063_v44  ;;  %v1062_v27 = vld [vmem:[%s3628_s6 + $0x1c00] sm:$0xff]  ;;  %v2086_v28 = vmul.f32 %v3635_v1, %v1060_v25  ;;  %v2087_v29 = vmul.f32 %v3635_v1, %v1061_v26  ;;  %v1063_v31 = vld [vmem:[%s3628_s6 + $0x1c08] sm:$0xff] }
 0x1f7   : > { %3088 = vst [vmem:[%s3651_s21 + $0x1b40] sm:$0xff] %v2064_v45  ;;  %3089 = vst [vmem:[%s3651_s21 + $0x1b48] sm:$0xff] %v2065_v49  ;;  %v2088_v30 = vmul.f32 %v3635_v1, %v1062_v27  ;;  %v1064_v32 = vld [vmem:[%s3628_s6 + $0x1c10] sm:$0xff]  ;;  %v1065_v33 = vld [vmem:[%s3628_s6 + $0x1c18] sm:$0xff]  ;;  %v2089_v34 = vmul.f32 %v3635_v1, %v1063_v31 }
 0x1f8   : > { %3090 = vst [vmem:[%s3651_s21 + $0x1b50] sm:$0xff] %v2066_v50  ;;  %3091 = vst [vmem:[%s3651_s21 + $0x1b58] sm:$0xff] %v2067_v51  ;;  %v2090_v35 = vmul.f32 %v3635_v1, %v1064_v32  ;;  %v2091_v36 = vmul.f32 %v3635_v1, %v1065_v33  ;;  %v1066_v37 = vld [vmem:[%s3628_s6 + $0x1c20] sm:$0xff]  ;;  %v1067_v38 = vld [vmem:[%s3628_s6 + $0x1c28] sm:$0xff] }
 0x1f9   : > { %3092 = vst [vmem:[%s3651_s21 + $0x1b60] sm:$0xff] %v2068_v55  ;;  %3093 = vst [vmem:[%s3651_s21 + $0x1b68] sm:$0xff] %v2069_v56  ;;  %v1068_v39 = vld [vmem:[%s3628_s6 + $0x1c30] sm:$0xff]  ;;  %v2092_v40 = vmul.f32 %v3635_v1, %v1066_v37  ;;  %v2093_v41 = vmul.f32 %v3635_v1, %v1067_v38  ;;  %v1069_v43 = vld [vmem:[%s3628_s6 + $0x1c38] sm:$0xff] }
 0x1fa   : > { %3094 = vst [vmem:[%s3651_s21 + $0x1b70] sm:$0xff] %v2070_v57  ;;  %3095 = vst [vmem:[%s3651_s21 + $0x1b78] sm:$0xff] %v2071_v61  ;;  %v2094_v42 = vmul.f32 %v3635_v1, %v1068_v39  ;;  %v1070_v44 = vld [vmem:[%s3628_s6 + $0x1c40] sm:$0xff]  ;;  %v1071_v45 = vld [vmem:[%s3628_s6 + $0x1c48] sm:$0xff]  ;;  %v2095_v46 = vmul.f32 %v3635_v1, %v1069_v43 }
 0x1fb   : > { %3096 = vst [vmem:[%s3651_s21 + $0x1b80] sm:$0xff] %v2072_v62  ;;  %3097 = vst [vmem:[%s3651_s21 + $0x1b88] sm:$0xff] %v2073_v63  ;;  %v2096_v47 = vmul.f32 %v3635_v1, %v1070_v44  ;;  %v2097_v48 = vmul.f32 %v3635_v1, %v1071_v45  ;;  %v1072_v49 = vld [vmem:[%s3628_s6 + $0x1c50] sm:$0xff]  ;;  %v1073_v50 = vld [vmem:[%s3628_s6 + $0x1c58] sm:$0xff] }
 0x1fc   : > { %3098 = vst [vmem:[%s3651_s21 + $0x1b90] sm:$0xff] %v2074_v4  ;;  %3099 = vst [vmem:[%s3651_s21 + $0x1b98] sm:$0xff] %v2075_v5  ;;  %v1074_v51 = vld [vmem:[%s3628_s6 + $0x1c60] sm:$0xff]  ;;  %v2098_v52 = vmul.f32 %v3635_v1, %v1072_v49  ;;  %v2099_v53 = vmul.f32 %v3635_v1, %v1073_v50  ;;  %v1075_v55 = vld [vmem:[%s3628_s6 + $0x1c68] sm:$0xff] }
 0x1fd   : > { %3100 = vst [vmem:[%s3651_s21 + $0x1ba0] sm:$0xff] %v2076_v6  ;;  %3101 = vst [vmem:[%s3651_s21 + $0x1ba8] sm:$0xff] %v2077_v10  ;;  %v2100_v54 = vmul.f32 %v3635_v1, %v1074_v51  ;;  %v1076_v56 = vld [vmem:[%s3628_s6 + $0x1c70] sm:$0xff]  ;;  %v1077_v57 = vld [vmem:[%s3628_s6 + $0x1c78] sm:$0xff]  ;;  %v2101_v58 = vmul.f32 %v3635_v1, %v1075_v55 }
 0x1fe   : > { %3102 = vst [vmem:[%s3651_s21 + $0x1bb0] sm:$0xff] %v2078_v11  ;;  %3103 = vst [vmem:[%s3651_s21 + $0x1bb8] sm:$0xff] %v2079_v12  ;;  %v2102_v59 = vmul.f32 %v3635_v1, %v1076_v56  ;;  %v2103_v60 = vmul.f32 %v3635_v1, %v1077_v57  ;;  %v1078_v61 = vld [vmem:[%s3628_s6 + $0x1c80] sm:$0xff]  ;;  %v1079_v62 = vld [vmem:[%s3628_s6 + $0x1c88] sm:$0xff] }
 0x1ff   : > { %3104 = vst [vmem:[%s3651_s21 + $0x1bc0] sm:$0xff] %v2080_v16  ;;  %3105 = vst [vmem:[%s3651_s21 + $0x1bc8] sm:$0xff] %v2081_v17  ;;  %v1080_v63 = vld [vmem:[%s3628_s6 + $0x1c90] sm:$0xff]  ;;  %v2104_v0 = vmul.f32 %v3635_v1, %v1078_v61  ;;  %v2105_v2 = vmul.f32 %v3635_v1, %v1079_v62  ;;  %v1081_v4 = vld [vmem:[%s3628_s6 + $0x1c98] sm:$0xff] }
 0x200   : > { %3106 = vst [vmem:[%s3651_s21 + $0x1bd0] sm:$0xff] %v2082_v18  ;;  %3107 = vst [vmem:[%s3651_s21 + $0x1bd8] sm:$0xff] %v2083_v22  ;;  %v2106_v3 = vmul.f32 %v3635_v1, %v1080_v63  ;;  %v1082_v5 = vld [vmem:[%s3628_s6 + $0x1ca0] sm:$0xff]  ;;  %v1083_v6 = vld [vmem:[%s3628_s6 + $0x1ca8] sm:$0xff]  ;;  %v2107_v7 = vmul.f32 %v3635_v1, %v1081_v4 }
 0x201   : > { %3108 = vst [vmem:[%s3651_s21 + $0x1be0] sm:$0xff] %v2084_v23  ;;  %3109 = vst [vmem:[%s3651_s21 + $0x1be8] sm:$0xff] %v2085_v24  ;;  %v2108_v8 = vmul.f32 %v3635_v1, %v1082_v5  ;;  %v2109_v9 = vmul.f32 %v3635_v1, %v1083_v6  ;;  %v1084_v10 = vld [vmem:[%s3628_s6 + $0x1cb0] sm:$0xff]  ;;  %v1085_v11 = vld [vmem:[%s3628_s6 + $0x1cb8] sm:$0xff] }
 0x202   : > { %3110 = vst [vmem:[%s3651_s21 + $0x1bf0] sm:$0xff] %v2086_v28  ;;  %3111 = vst [vmem:[%s3651_s21 + $0x1bf8] sm:$0xff] %v2087_v29  ;;  %v1086_v12 = vld [vmem:[%s3628_s6 + $0x1cc0] sm:$0xff]  ;;  %v2110_v13 = vmul.f32 %v3635_v1, %v1084_v10  ;;  %v2111_v14 = vmul.f32 %v3635_v1, %v1085_v11  ;;  %v1087_v16 = vld [vmem:[%s3628_s6 + $0x1cc8] sm:$0xff] }
 0x203   : > { %3112 = vst [vmem:[%s3651_s21 + $0x1c00] sm:$0xff] %v2088_v30  ;;  %3113 = vst [vmem:[%s3651_s21 + $0x1c08] sm:$0xff] %v2089_v34  ;;  %v2112_v15 = vmul.f32 %v3635_v1, %v1086_v12  ;;  %v1088_v17 = vld [vmem:[%s3628_s6 + $0x1cd0] sm:$0xff]  ;;  %v1089_v18 = vld [vmem:[%s3628_s6 + $0x1cd8] sm:$0xff]  ;;  %v2113_v19 = vmul.f32 %v3635_v1, %v1087_v16 }
 0x204   : > { %3114 = vst [vmem:[%s3651_s21 + $0x1c10] sm:$0xff] %v2090_v35  ;;  %3115 = vst [vmem:[%s3651_s21 + $0x1c18] sm:$0xff] %v2091_v36  ;;  %v2114_v20 = vmul.f32 %v3635_v1, %v1088_v17  ;;  %v2115_v21 = vmul.f32 %v3635_v1, %v1089_v18  ;;  %v1090_v22 = vld [vmem:[%s3628_s6 + $0x1ce0] sm:$0xff]  ;;  %v1091_v23 = vld [vmem:[%s3628_s6 + $0x1ce8] sm:$0xff] }
 0x205   : > { %3116 = vst [vmem:[%s3651_s21 + $0x1c20] sm:$0xff] %v2092_v40  ;;  %3117 = vst [vmem:[%s3651_s21 + $0x1c28] sm:$0xff] %v2093_v41  ;;  %v1092_v24 = vld [vmem:[%s3628_s6 + $0x1cf0] sm:$0xff]  ;;  %v2116_v25 = vmul.f32 %v3635_v1, %v1090_v22  ;;  %v2117_v26 = vmul.f32 %v3635_v1, %v1091_v23  ;;  %v1093_v28 = vld [vmem:[%s3628_s6 + $0x1cf8] sm:$0xff] }
 0x206   : > { %3118 = vst [vmem:[%s3651_s21 + $0x1c30] sm:$0xff] %v2094_v42  ;;  %3119 = vst [vmem:[%s3651_s21 + $0x1c38] sm:$0xff] %v2095_v46  ;;  %v2118_v27 = vmul.f32 %v3635_v1, %v1092_v24  ;;  %v1094_v29 = vld [vmem:[%s3628_s6 + $0x1d00] sm:$0xff]  ;;  %v1095_v30 = vld [vmem:[%s3628_s6 + $0x1d08] sm:$0xff]  ;;  %v2119_v31 = vmul.f32 %v3635_v1, %v1093_v28 }
 0x207   : > { %3120 = vst [vmem:[%s3651_s21 + $0x1c40] sm:$0xff] %v2096_v47  ;;  %3121 = vst [vmem:[%s3651_s21 + $0x1c48] sm:$0xff] %v2097_v48  ;;  %v2120_v32 = vmul.f32 %v3635_v1, %v1094_v29  ;;  %v2121_v33 = vmul.f32 %v3635_v1, %v1095_v30  ;;  %v1096_v34 = vld [vmem:[%s3628_s6 + $0x1d10] sm:$0xff]  ;;  %v1097_v35 = vld [vmem:[%s3628_s6 + $0x1d18] sm:$0xff] }
 0x208   : > { %3122 = vst [vmem:[%s3651_s21 + $0x1c50] sm:$0xff] %v2098_v52  ;;  %3123 = vst [vmem:[%s3651_s21 + $0x1c58] sm:$0xff] %v2099_v53  ;;  %v1098_v36 = vld [vmem:[%s3628_s6 + $0x1d20] sm:$0xff]  ;;  %v2122_v37 = vmul.f32 %v3635_v1, %v1096_v34  ;;  %v2123_v38 = vmul.f32 %v3635_v1, %v1097_v35  ;;  %v1099_v40 = vld [vmem:[%s3628_s6 + $0x1d28] sm:$0xff] }
 0x209   : > { %3124 = vst [vmem:[%s3651_s21 + $0x1c60] sm:$0xff] %v2100_v54  ;;  %3125 = vst [vmem:[%s3651_s21 + $0x1c68] sm:$0xff] %v2101_v58  ;;  %v2124_v39 = vmul.f32 %v3635_v1, %v1098_v36  ;;  %v1100_v41 = vld [vmem:[%s3628_s6 + $0x1d30] sm:$0xff]  ;;  %v1101_v42 = vld [vmem:[%s3628_s6 + $0x1d38] sm:$0xff]  ;;  %v2125_v43 = vmul.f32 %v3635_v1, %v1099_v40 }
 0x20a   : > { %3126 = vst [vmem:[%s3651_s21 + $0x1c70] sm:$0xff] %v2102_v59  ;;  %3127 = vst [vmem:[%s3651_s21 + $0x1c78] sm:$0xff] %v2103_v60  ;;  %v2126_v44 = vmul.f32 %v3635_v1, %v1100_v41  ;;  %v2127_v45 = vmul.f32 %v3635_v1, %v1101_v42  ;;  %v1102_v46 = vld [vmem:[%s3628_s6 + $0x1d40] sm:$0xff]  ;;  %v1103_v47 = vld [vmem:[%s3628_s6 + $0x1d48] sm:$0xff] }
 0x20b   : > { %3128 = vst [vmem:[%s3651_s21 + $0x1c80] sm:$0xff] %v2104_v0  ;;  %3129 = vst [vmem:[%s3651_s21 + $0x1c88] sm:$0xff] %v2105_v2  ;;  %v1104_v48 = vld [vmem:[%s3628_s6 + $0x1d50] sm:$0xff]  ;;  %v2128_v49 = vmul.f32 %v3635_v1, %v1102_v46  ;;  %v2129_v50 = vmul.f32 %v3635_v1, %v1103_v47  ;;  %v1105_v52 = vld [vmem:[%s3628_s6 + $0x1d58] sm:$0xff] }
 0x20c   : > { %3130 = vst [vmem:[%s3651_s21 + $0x1c90] sm:$0xff] %v2106_v3  ;;  %3131 = vst [vmem:[%s3651_s21 + $0x1c98] sm:$0xff] %v2107_v7  ;;  %v2130_v51 = vmul.f32 %v3635_v1, %v1104_v48  ;;  %v1106_v53 = vld [vmem:[%s3628_s6 + $0x1d60] sm:$0xff]  ;;  %v1107_v54 = vld [vmem:[%s3628_s6 + $0x1d68] sm:$0xff]  ;;  %v2131_v55 = vmul.f32 %v3635_v1, %v1105_v52 }
 0x20d   : > { %3132 = vst [vmem:[%s3651_s21 + $0x1ca0] sm:$0xff] %v2108_v8  ;;  %3133 = vst [vmem:[%s3651_s21 + $0x1ca8] sm:$0xff] %v2109_v9  ;;  %v2132_v56 = vmul.f32 %v3635_v1, %v1106_v53  ;;  %v2133_v57 = vmul.f32 %v3635_v1, %v1107_v54  ;;  %v1108_v58 = vld [vmem:[%s3628_s6 + $0x1d70] sm:$0xff]  ;;  %v1109_v59 = vld [vmem:[%s3628_s6 + $0x1d78] sm:$0xff] }
 0x20e   : > { %3134 = vst [vmem:[%s3651_s21 + $0x1cb0] sm:$0xff] %v2110_v13  ;;  %3135 = vst [vmem:[%s3651_s21 + $0x1cb8] sm:$0xff] %v2111_v14  ;;  %v1110_v60 = vld [vmem:[%s3628_s6 + $0x1d80] sm:$0xff]  ;;  %v2134_v61 = vmul.f32 %v3635_v1, %v1108_v58  ;;  %v2135_v62 = vmul.f32 %v3635_v1, %v1109_v59  ;;  %v1111_v0 = vld [vmem:[%s3628_s6 + $0x1d88] sm:$0xff] }
 0x20f   : > { %3136 = vst [vmem:[%s3651_s21 + $0x1cc0] sm:$0xff] %v2112_v15  ;;  %3137 = vst [vmem:[%s3651_s21 + $0x1cc8] sm:$0xff] %v2113_v19  ;;  %v2136_v63 = vmul.f32 %v3635_v1, %v1110_v60  ;;  %v1112_v2 = vld [vmem:[%s3628_s6 + $0x1d90] sm:$0xff]  ;;  %v1113_v3 = vld [vmem:[%s3628_s6 + $0x1d98] sm:$0xff]  ;;  %v2137_v4 = vmul.f32 %v3635_v1, %v1111_v0 }
 0x210   : > { %3138 = vst [vmem:[%s3651_s21 + $0x1cd0] sm:$0xff] %v2114_v20  ;;  %3139 = vst [vmem:[%s3651_s21 + $0x1cd8] sm:$0xff] %v2115_v21  ;;  %v2138_v5 = vmul.f32 %v3635_v1, %v1112_v2  ;;  %v2139_v6 = vmul.f32 %v3635_v1, %v1113_v3  ;;  %v1114_v7 = vld [vmem:[%s3628_s6 + $0x1da0] sm:$0xff]  ;;  %v1115_v8 = vld [vmem:[%s3628_s6 + $0x1da8] sm:$0xff] }
 0x211   : > { %3140 = vst [vmem:[%s3651_s21 + $0x1ce0] sm:$0xff] %v2116_v25  ;;  %3141 = vst [vmem:[%s3651_s21 + $0x1ce8] sm:$0xff] %v2117_v26  ;;  %v1116_v9 = vld [vmem:[%s3628_s6 + $0x1db0] sm:$0xff]  ;;  %v2140_v10 = vmul.f32 %v3635_v1, %v1114_v7  ;;  %v2141_v11 = vmul.f32 %v3635_v1, %v1115_v8  ;;  %v1117_v13 = vld [vmem:[%s3628_s6 + $0x1db8] sm:$0xff] }
 0x212   : > { %3142 = vst [vmem:[%s3651_s21 + $0x1cf0] sm:$0xff] %v2118_v27  ;;  %3143 = vst [vmem:[%s3651_s21 + $0x1cf8] sm:$0xff] %v2119_v31  ;;  %v2142_v12 = vmul.f32 %v3635_v1, %v1116_v9  ;;  %v1118_v14 = vld [vmem:[%s3628_s6 + $0x1dc0] sm:$0xff]  ;;  %v1119_v15 = vld [vmem:[%s3628_s6 + $0x1dc8] sm:$0xff]  ;;  %v2143_v16 = vmul.f32 %v3635_v1, %v1117_v13 }
 0x213   : > { %3144 = vst [vmem:[%s3651_s21 + $0x1d00] sm:$0xff] %v2120_v32  ;;  %3145 = vst [vmem:[%s3651_s21 + $0x1d08] sm:$0xff] %v2121_v33  ;;  %v2144_v17 = vmul.f32 %v3635_v1, %v1118_v14  ;;  %v2145_v18 = vmul.f32 %v3635_v1, %v1119_v15  ;;  %v1120_v19 = vld [vmem:[%s3628_s6 + $0x1dd0] sm:$0xff]  ;;  %v1121_v20 = vld [vmem:[%s3628_s6 + $0x1dd8] sm:$0xff] }
 0x214   : > { %3146 = vst [vmem:[%s3651_s21 + $0x1d10] sm:$0xff] %v2122_v37  ;;  %3147 = vst [vmem:[%s3651_s21 + $0x1d18] sm:$0xff] %v2123_v38  ;;  %v1122_v21 = vld [vmem:[%s3628_s6 + $0x1de0] sm:$0xff]  ;;  %v2146_v22 = vmul.f32 %v3635_v1, %v1120_v19  ;;  %v2147_v23 = vmul.f32 %v3635_v1, %v1121_v20  ;;  %v1123_v25 = vld [vmem:[%s3628_s6 + $0x1de8] sm:$0xff] }
 0x215   : > { %3148 = vst [vmem:[%s3651_s21 + $0x1d20] sm:$0xff] %v2124_v39  ;;  %3149 = vst [vmem:[%s3651_s21 + $0x1d28] sm:$0xff] %v2125_v43  ;;  %v2148_v24 = vmul.f32 %v3635_v1, %v1122_v21  ;;  %v1124_v26 = vld [vmem:[%s3628_s6 + $0x1df0] sm:$0xff]  ;;  %v1125_v27 = vld [vmem:[%s3628_s6 + $0x1df8] sm:$0xff]  ;;  %v2149_v28 = vmul.f32 %v3635_v1, %v1123_v25 }
 0x216   : > { %3150 = vst [vmem:[%s3651_s21 + $0x1d30] sm:$0xff] %v2126_v44  ;;  %3151 = vst [vmem:[%s3651_s21 + $0x1d38] sm:$0xff] %v2127_v45  ;;  %v2150_v29 = vmul.f32 %v3635_v1, %v1124_v26  ;;  %v2151_v30 = vmul.f32 %v3635_v1, %v1125_v27  ;;  %v1126_v31 = vld [vmem:[%s3628_s6 + $0x1e00] sm:$0xff]  ;;  %v1127_v32 = vld [vmem:[%s3628_s6 + $0x1e08] sm:$0xff] }
 0x217   : > { %3152 = vst [vmem:[%s3651_s21 + $0x1d40] sm:$0xff] %v2128_v49  ;;  %3153 = vst [vmem:[%s3651_s21 + $0x1d48] sm:$0xff] %v2129_v50  ;;  %v1128_v33 = vld [vmem:[%s3628_s6 + $0x1e10] sm:$0xff]  ;;  %v2152_v34 = vmul.f32 %v3635_v1, %v1126_v31  ;;  %v2153_v35 = vmul.f32 %v3635_v1, %v1127_v32  ;;  %v1129_v37 = vld [vmem:[%s3628_s6 + $0x1e18] sm:$0xff] }
 0x218   : > { %3154 = vst [vmem:[%s3651_s21 + $0x1d50] sm:$0xff] %v2130_v51  ;;  %3155 = vst [vmem:[%s3651_s21 + $0x1d58] sm:$0xff] %v2131_v55  ;;  %v2154_v36 = vmul.f32 %v3635_v1, %v1128_v33  ;;  %v1130_v38 = vld [vmem:[%s3628_s6 + $0x1e20] sm:$0xff]  ;;  %v1131_v39 = vld [vmem:[%s3628_s6 + $0x1e28] sm:$0xff]  ;;  %v2155_v40 = vmul.f32 %v3635_v1, %v1129_v37 }
 0x219   : > { %3156 = vst [vmem:[%s3651_s21 + $0x1d60] sm:$0xff] %v2132_v56  ;;  %3157 = vst [vmem:[%s3651_s21 + $0x1d68] sm:$0xff] %v2133_v57  ;;  %v2156_v41 = vmul.f32 %v3635_v1, %v1130_v38  ;;  %v2157_v42 = vmul.f32 %v3635_v1, %v1131_v39  ;;  %v1132_v43 = vld [vmem:[%s3628_s6 + $0x1e30] sm:$0xff]  ;;  %v1133_v44 = vld [vmem:[%s3628_s6 + $0x1e38] sm:$0xff] }
 0x21a   : > { %3158 = vst [vmem:[%s3651_s21 + $0x1d70] sm:$0xff] %v2134_v61  ;;  %3159 = vst [vmem:[%s3651_s21 + $0x1d78] sm:$0xff] %v2135_v62  ;;  %v1134_v45 = vld [vmem:[%s3628_s6 + $0x1e40] sm:$0xff]  ;;  %v2158_v46 = vmul.f32 %v3635_v1, %v1132_v43  ;;  %v2159_v47 = vmul.f32 %v3635_v1, %v1133_v44  ;;  %v1135_v49 = vld [vmem:[%s3628_s6 + $0x1e48] sm:$0xff] }
 0x21b   : > { %3160 = vst [vmem:[%s3651_s21 + $0x1d80] sm:$0xff] %v2136_v63  ;;  %3161 = vst [vmem:[%s3651_s21 + $0x1d88] sm:$0xff] %v2137_v4  ;;  %v2160_v48 = vmul.f32 %v3635_v1, %v1134_v45  ;;  %v1136_v50 = vld [vmem:[%s3628_s6 + $0x1e50] sm:$0xff]  ;;  %v1137_v51 = vld [vmem:[%s3628_s6 + $0x1e58] sm:$0xff]  ;;  %v2161_v52 = vmul.f32 %v3635_v1, %v1135_v49 }
 0x21c   : > { %3162 = vst [vmem:[%s3651_s21 + $0x1d90] sm:$0xff] %v2138_v5  ;;  %3163 = vst [vmem:[%s3651_s21 + $0x1d98] sm:$0xff] %v2139_v6  ;;  %v2162_v53 = vmul.f32 %v3635_v1, %v1136_v50  ;;  %v2163_v54 = vmul.f32 %v3635_v1, %v1137_v51  ;;  %v1138_v55 = vld [vmem:[%s3628_s6 + $0x1e60] sm:$0xff]  ;;  %v1139_v56 = vld [vmem:[%s3628_s6 + $0x1e68] sm:$0xff] }
 0x21d   : > { %3164 = vst [vmem:[%s3651_s21 + $0x1da0] sm:$0xff] %v2140_v10  ;;  %3165 = vst [vmem:[%s3651_s21 + $0x1da8] sm:$0xff] %v2141_v11  ;;  %v1140_v57 = vld [vmem:[%s3628_s6 + $0x1e70] sm:$0xff]  ;;  %v2164_v58 = vmul.f32 %v3635_v1, %v1138_v55  ;;  %v2165_v59 = vmul.f32 %v3635_v1, %v1139_v56  ;;  %v1141_v61 = vld [vmem:[%s3628_s6 + $0x1e78] sm:$0xff] }
 0x21e   : > { %3166 = vst [vmem:[%s3651_s21 + $0x1db0] sm:$0xff] %v2142_v12  ;;  %3167 = vst [vmem:[%s3651_s21 + $0x1db8] sm:$0xff] %v2143_v16  ;;  %v2166_v60 = vmul.f32 %v3635_v1, %v1140_v57  ;;  %v1142_v62 = vld [vmem:[%s3628_s6 + $0x1e80] sm:$0xff]  ;;  %v1143_v63 = vld [vmem:[%s3628_s6 + $0x1e88] sm:$0xff]  ;;  %v2167_v0 = vmul.f32 %v3635_v1, %v1141_v61 }
 0x21f   : > { %3168 = vst [vmem:[%s3651_s21 + $0x1dc0] sm:$0xff] %v2144_v17  ;;  %3169 = vst [vmem:[%s3651_s21 + $0x1dc8] sm:$0xff] %v2145_v18  ;;  %v2168_v2 = vmul.f32 %v3635_v1, %v1142_v62  ;;  %v2169_v3 = vmul.f32 %v3635_v1, %v1143_v63  ;;  %v1144_v4 = vld [vmem:[%s3628_s6 + $0x1e90] sm:$0xff]  ;;  %v1145_v5 = vld [vmem:[%s3628_s6 + $0x1e98] sm:$0xff] }
 0x220   : > { %3170 = vst [vmem:[%s3651_s21 + $0x1dd0] sm:$0xff] %v2146_v22  ;;  %3171 = vst [vmem:[%s3651_s21 + $0x1dd8] sm:$0xff] %v2147_v23  ;;  %v1146_v6 = vld [vmem:[%s3628_s6 + $0x1ea0] sm:$0xff]  ;;  %v2170_v7 = vmul.f32 %v3635_v1, %v1144_v4  ;;  %v2171_v8 = vmul.f32 %v3635_v1, %v1145_v5  ;;  %v1147_v10 = vld [vmem:[%s3628_s6 + $0x1ea8] sm:$0xff] }
 0x221   : > { %3172 = vst [vmem:[%s3651_s21 + $0x1de0] sm:$0xff] %v2148_v24  ;;  %3173 = vst [vmem:[%s3651_s21 + $0x1de8] sm:$0xff] %v2149_v28  ;;  %v2172_v9 = vmul.f32 %v3635_v1, %v1146_v6  ;;  %v1148_v11 = vld [vmem:[%s3628_s6 + $0x1eb0] sm:$0xff]  ;;  %v1149_v12 = vld [vmem:[%s3628_s6 + $0x1eb8] sm:$0xff]  ;;  %v2173_v13 = vmul.f32 %v3635_v1, %v1147_v10 }
 0x222   : > { %3174 = vst [vmem:[%s3651_s21 + $0x1df0] sm:$0xff] %v2150_v29  ;;  %3175 = vst [vmem:[%s3651_s21 + $0x1df8] sm:$0xff] %v2151_v30  ;;  %v2174_v14 = vmul.f32 %v3635_v1, %v1148_v11  ;;  %v2175_v15 = vmul.f32 %v3635_v1, %v1149_v12  ;;  %v1150_v16 = vld [vmem:[%s3628_s6 + $0x1ec0] sm:$0xff]  ;;  %v1151_v17 = vld [vmem:[%s3628_s6 + $0x1ec8] sm:$0xff] }
 0x223   : > { %3176 = vst [vmem:[%s3651_s21 + $0x1e00] sm:$0xff] %v2152_v34  ;;  %3177 = vst [vmem:[%s3651_s21 + $0x1e08] sm:$0xff] %v2153_v35  ;;  %v1152_v18 = vld [vmem:[%s3628_s6 + $0x1ed0] sm:$0xff]  ;;  %v2176_v19 = vmul.f32 %v3635_v1, %v1150_v16  ;;  %v2177_v20 = vmul.f32 %v3635_v1, %v1151_v17  ;;  %v1153_v22 = vld [vmem:[%s3628_s6 + $0x1ed8] sm:$0xff] }
 0x224   : > { %3178 = vst [vmem:[%s3651_s21 + $0x1e10] sm:$0xff] %v2154_v36  ;;  %3179 = vst [vmem:[%s3651_s21 + $0x1e18] sm:$0xff] %v2155_v40  ;;  %v2178_v21 = vmul.f32 %v3635_v1, %v1152_v18  ;;  %v1154_v23 = vld [vmem:[%s3628_s6 + $0x1ee0] sm:$0xff]  ;;  %v1155_v24 = vld [vmem:[%s3628_s6 + $0x1ee8] sm:$0xff]  ;;  %v2179_v25 = vmul.f32 %v3635_v1, %v1153_v22 }
 0x225   : > { %3180 = vst [vmem:[%s3651_s21 + $0x1e20] sm:$0xff] %v2156_v41  ;;  %3181 = vst [vmem:[%s3651_s21 + $0x1e28] sm:$0xff] %v2157_v42  ;;  %v2180_v26 = vmul.f32 %v3635_v1, %v1154_v23  ;;  %v2181_v27 = vmul.f32 %v3635_v1, %v1155_v24  ;;  %v1156_v28 = vld [vmem:[%s3628_s6 + $0x1ef0] sm:$0xff]  ;;  %v1157_v29 = vld [vmem:[%s3628_s6 + $0x1ef8] sm:$0xff] }
 0x226   : > { %3182 = vst [vmem:[%s3651_s21 + $0x1e30] sm:$0xff] %v2158_v46  ;;  %3183 = vst [vmem:[%s3651_s21 + $0x1e38] sm:$0xff] %v2159_v47  ;;  %v1158_v30 = vld [vmem:[%s3628_s6 + $0x1f00] sm:$0xff]  ;;  %v2182_v31 = vmul.f32 %v3635_v1, %v1156_v28  ;;  %v2183_v32 = vmul.f32 %v3635_v1, %v1157_v29  ;;  %v1159_v34 = vld [vmem:[%s3628_s6 + $0x1f08] sm:$0xff] }
 0x227   : > { %3184 = vst [vmem:[%s3651_s21 + $0x1e40] sm:$0xff] %v2160_v48  ;;  %3185 = vst [vmem:[%s3651_s21 + $0x1e48] sm:$0xff] %v2161_v52  ;;  %v2184_v33 = vmul.f32 %v3635_v1, %v1158_v30  ;;  %v1160_v35 = vld [vmem:[%s3628_s6 + $0x1f10] sm:$0xff]  ;;  %v1161_v36 = vld [vmem:[%s3628_s6 + $0x1f18] sm:$0xff]  ;;  %v2185_v37 = vmul.f32 %v3635_v1, %v1159_v34 }
 0x228   : > { %3186 = vst [vmem:[%s3651_s21 + $0x1e50] sm:$0xff] %v2162_v53  ;;  %3187 = vst [vmem:[%s3651_s21 + $0x1e58] sm:$0xff] %v2163_v54  ;;  %v2186_v38 = vmul.f32 %v3635_v1, %v1160_v35  ;;  %v2187_v39 = vmul.f32 %v3635_v1, %v1161_v36  ;;  %v1162_v40 = vld [vmem:[%s3628_s6 + $0x1f20] sm:$0xff]  ;;  %v1163_v41 = vld [vmem:[%s3628_s6 + $0x1f28] sm:$0xff] }
 0x229   : > { %3188 = vst [vmem:[%s3651_s21 + $0x1e60] sm:$0xff] %v2164_v58  ;;  %3189 = vst [vmem:[%s3651_s21 + $0x1e68] sm:$0xff] %v2165_v59  ;;  %v1164_v42 = vld [vmem:[%s3628_s6 + $0x1f30] sm:$0xff]  ;;  %v2188_v43 = vmul.f32 %v3635_v1, %v1162_v40  ;;  %v2189_v44 = vmul.f32 %v3635_v1, %v1163_v41  ;;  %v1165_v46 = vld [vmem:[%s3628_s6 + $0x1f38] sm:$0xff] }
 0x22a   : > { %3190 = vst [vmem:[%s3651_s21 + $0x1e70] sm:$0xff] %v2166_v60  ;;  %3191 = vst [vmem:[%s3651_s21 + $0x1e78] sm:$0xff] %v2167_v0  ;;  %v2190_v45 = vmul.f32 %v3635_v1, %v1164_v42  ;;  %v1166_v47 = vld [vmem:[%s3628_s6 + $0x1f40] sm:$0xff]  ;;  %v1167_v48 = vld [vmem:[%s3628_s6 + $0x1f48] sm:$0xff]  ;;  %v2191_v49 = vmul.f32 %v3635_v1, %v1165_v46 }
 0x22b   : > { %3192 = vst [vmem:[%s3651_s21 + $0x1e80] sm:$0xff] %v2168_v2  ;;  %3193 = vst [vmem:[%s3651_s21 + $0x1e88] sm:$0xff] %v2169_v3  ;;  %v2192_v50 = vmul.f32 %v3635_v1, %v1166_v47  ;;  %v2193_v51 = vmul.f32 %v3635_v1, %v1167_v48  ;;  %v1168_v52 = vld [vmem:[%s3628_s6 + $0x1f50] sm:$0xff]  ;;  %v1169_v53 = vld [vmem:[%s3628_s6 + $0x1f58] sm:$0xff] }
 0x22c   : > { %3194 = vst [vmem:[%s3651_s21 + $0x1e90] sm:$0xff] %v2170_v7  ;;  %3195 = vst [vmem:[%s3651_s21 + $0x1e98] sm:$0xff] %v2171_v8  ;;  %v1170_v54 = vld [vmem:[%s3628_s6 + $0x1f60] sm:$0xff]  ;;  %v2194_v55 = vmul.f32 %v3635_v1, %v1168_v52  ;;  %v2195_v56 = vmul.f32 %v3635_v1, %v1169_v53  ;;  %v1171_v58 = vld [vmem:[%s3628_s6 + $0x1f68] sm:$0xff] }
 0x22d   : > { %3196 = vst [vmem:[%s3651_s21 + $0x1ea0] sm:$0xff] %v2172_v9  ;;  %3197 = vst [vmem:[%s3651_s21 + $0x1ea8] sm:$0xff] %v2173_v13  ;;  %v2196_v57 = vmul.f32 %v3635_v1, %v1170_v54  ;;  %v1172_v59 = vld [vmem:[%s3628_s6 + $0x1f70] sm:$0xff]  ;;  %v1173_v60 = vld [vmem:[%s3628_s6 + $0x1f78] sm:$0xff]  ;;  %v2197_v61 = vmul.f32 %v3635_v1, %v1171_v58 }
 0x22e   : > { %3198 = vst [vmem:[%s3651_s21 + $0x1eb0] sm:$0xff] %v2174_v14  ;;  %3199 = vst [vmem:[%s3651_s21 + $0x1eb8] sm:$0xff] %v2175_v15  ;;  %v2198_v62 = vmul.f32 %v3635_v1, %v1172_v59  ;;  %v2199_v63 = vmul.f32 %v3635_v1, %v1173_v60  ;;  %v1174_v0 = vld [vmem:[%s3628_s6 + $0x1f80] sm:$0xff]  ;;  %v1175_v2 = vld [vmem:[%s3628_s6 + $0x1f88] sm:$0xff] }
 0x22f   : > { %3200 = vst [vmem:[%s3651_s21 + $0x1ec0] sm:$0xff] %v2176_v19  ;;  %3201 = vst [vmem:[%s3651_s21 + $0x1ec8] sm:$0xff] %v2177_v20  ;;  %v1176_v3 = vld [vmem:[%s3628_s6 + $0x1f90] sm:$0xff]  ;;  %v2200_v4 = vmul.f32 %v3635_v1, %v1174_v0  ;;  %v2201_v5 = vmul.f32 %v3635_v1, %v1175_v2  ;;  %v1177_v7 = vld [vmem:[%s3628_s6 + $0x1f98] sm:$0xff] }
 0x230   : > { %3202 = vst [vmem:[%s3651_s21 + $0x1ed0] sm:$0xff] %v2178_v21  ;;  %3203 = vst [vmem:[%s3651_s21 + $0x1ed8] sm:$0xff] %v2179_v25  ;;  %v2202_v6 = vmul.f32 %v3635_v1, %v1176_v3  ;;  %v1178_v8 = vld [vmem:[%s3628_s6 + $0x1fa0] sm:$0xff]  ;;  %v1179_v9 = vld [vmem:[%s3628_s6 + $0x1fa8] sm:$0xff]  ;;  %v2203_v10 = vmul.f32 %v3635_v1, %v1177_v7 }
 0x231   : > { %3204 = vst [vmem:[%s3651_s21 + $0x1ee0] sm:$0xff] %v2180_v26  ;;  %3205 = vst [vmem:[%s3651_s21 + $0x1ee8] sm:$0xff] %v2181_v27  ;;  %v2204_v11 = vmul.f32 %v3635_v1, %v1178_v8  ;;  %v2205_v12 = vmul.f32 %v3635_v1, %v1179_v9  ;;  %v1180_v13 = vld [vmem:[%s3628_s6 + $0x1fb0] sm:$0xff]  ;;  %v1181_v14 = vld [vmem:[%s3628_s6 + $0x1fb8] sm:$0xff] }
 0x232   : > { %3206 = vst [vmem:[%s3651_s21 + $0x1ef0] sm:$0xff] %v2182_v31  ;;  %3207 = vst [vmem:[%s3651_s21 + $0x1ef8] sm:$0xff] %v2183_v32  ;;  %v1182_v15 = vld [vmem:[%s3628_s6 + $0x1fc0] sm:$0xff]  ;;  %v2206_v16 = vmul.f32 %v3635_v1, %v1180_v13  ;;  %v2207_v17 = vmul.f32 %v3635_v1, %v1181_v14  ;;  %v1183_v19 = vld [vmem:[%s3628_s6 + $0x1fc8] sm:$0xff] }
 0x233   : > { %3208 = vst [vmem:[%s3651_s21 + $0x1f00] sm:$0xff] %v2184_v33  ;;  %3209 = vst [vmem:[%s3651_s21 + $0x1f08] sm:$0xff] %v2185_v37  ;;  %v2208_v18 = vmul.f32 %v3635_v1, %v1182_v15  ;;  %v1184_v20 = vld [vmem:[%s3628_s6 + $0x1fd0] sm:$0xff]  ;;  %v1185_v21 = vld [vmem:[%s3628_s6 + $0x1fd8] sm:$0xff]  ;;  %v2209_v22 = vmul.f32 %v3635_v1, %v1183_v19 }
 0x234   : > { %3210 = vst [vmem:[%s3651_s21 + $0x1f10] sm:$0xff] %v2186_v38  ;;  %3211 = vst [vmem:[%s3651_s21 + $0x1f18] sm:$0xff] %v2187_v39  ;;  %v2210_v23 = vmul.f32 %v3635_v1, %v1184_v20  ;;  %v2211_v24 = vmul.f32 %v3635_v1, %v1185_v21  ;;  %v1186_v25 = vld [vmem:[%s3628_s6 + $0x1fe0] sm:$0xff]  ;;  %v1187_v26 = vld [vmem:[%s3628_s6 + $0x1fe8] sm:$0xff] }
 0x235   : > { %3212 = vst [vmem:[%s3651_s21 + $0x1f20] sm:$0xff] %v2188_v43  ;;  %3213 = vst [vmem:[%s3651_s21 + $0x1f28] sm:$0xff] %v2189_v44  ;;  %v1188_v27 = vld [vmem:[%s3628_s6 + $0x1ff0] sm:$0xff]  ;;  %v2212_v28 = vmul.f32 %v3635_v1, %v1186_v25  ;;  %v2213_v29 = vmul.f32 %v3635_v1, %v1187_v26  ;;  %v1189_v31 = vld [vmem:[%s3628_s6 + $0x1ff8] sm:$0xff] }
 0x236   : > { %3214 = vst [vmem:[%s3651_s21 + $0x1f30] sm:$0xff] %v2190_v45  ;;  %3215 = vst [vmem:[%s3651_s21 + $0x1f38] sm:$0xff] %v2191_v49  ;;  %v2214_v30 = vmul.f32 %v3635_v1, %v1188_v27  ;;  %v2215_v32 = vmul.f32 %v3635_v1, %v1189_v31 }
 0x237   : > { %3216 = vst [vmem:[%s3651_s21 + $0x1f40] sm:$0xff] %v2192_v50  ;;  %3217 = vst [vmem:[%s3651_s21 + $0x1f48] sm:$0xff] %v2193_v51 }
 0x238   : > { %3218 = vst [vmem:[%s3651_s21 + $0x1f50] sm:$0xff] %v2194_v55  ;;  %3219 = vst [vmem:[%s3651_s21 + $0x1f58] sm:$0xff] %v2195_v56 }
 0x239   : > { %3220 = vst [vmem:[%s3651_s21 + $0x1f60] sm:$0xff] %v2196_v57  ;;  %3221 = vst [vmem:[%s3651_s21 + $0x1f68] sm:$0xff] %v2197_v61 }
 0x23a   : > { %3222 = vst [vmem:[%s3651_s21 + $0x1f70] sm:$0xff] %v2198_v62  ;;  %3223 = vst [vmem:[%s3651_s21 + $0x1f78] sm:$0xff] %v2199_v63 }
 0x23b   : > { %3224 = vst [vmem:[%s3651_s21 + $0x1f80] sm:$0xff] %v2200_v4  ;;  %3225 = vst [vmem:[%s3651_s21 + $0x1f88] sm:$0xff] %v2201_v5 }
 0x23c   : > { %3226 = vst [vmem:[%s3651_s21 + $0x1f90] sm:$0xff] %v2202_v6  ;;  %3227 = vst [vmem:[%s3651_s21 + $0x1f98] sm:$0xff] %v2203_v10 }
 0x23d   : > { %3228 = vst [vmem:[%s3651_s21 + $0x1fa0] sm:$0xff] %v2204_v11  ;;  %3229 = vst [vmem:[%s3651_s21 + $0x1fa8] sm:$0xff] %v2205_v12 }
 0x23e   : > { %3230 = vst [vmem:[%s3651_s21 + $0x1fb0] sm:$0xff] %v2206_v16  ;;  %3231 = vst [vmem:[%s3651_s21 + $0x1fb8] sm:$0xff] %v2207_v17 }
 0x23f   : > { %3232 = vst [vmem:[%s3651_s21 + $0x1fc0] sm:$0xff] %v2208_v18  ;;  %3233 = vst [vmem:[%s3651_s21 + $0x1fc8] sm:$0xff] %v2209_v22 }
 0x240   : > { %3234 = vst [vmem:[%s3651_s21 + $0x1fd0] sm:$0xff] %v2210_v23  ;;  %3235 = vst [vmem:[%s3651_s21 + $0x1fd8] sm:$0xff] %v2211_v24 }
 0x241   : > { %3236 = vst [vmem:[%s3651_s21 + $0x1fe0] sm:$0xff] %v2212_v28  ;;  %3237 = vst [vmem:[%s3651_s21 + $0x1fe8] sm:$0xff] %v2213_v29 }
 0x242   : > { %3238 = vst [vmem:[%s3651_s21 + $0x1ff0] sm:$0xff] %v2214_v30  ;;  %3239 = vst [vmem:[%s3651_s21 + $0x1ff8] sm:$0xff] %v2215_v32 }
 0x243   : > { %3441 = shalt.err (!%p3438_p2)
}
 0x244   : > { %s3442_s18 = scalar_lea.hbm %s6707_s7, 131072  ;;  %s3446_s25 = scalar_lea.hbm %s6763_s2, 262144 }
 0x245   : > { %p3443_p4 = scmp.ne.s32.totalorder %s6707_s7, %s3442_s18  ;;  %p3447_p9 = scmp.lt.u32.totalorder %s6707_s7, %s6763_s2 }
 0x246   : > { %p3448_p1 = scmp.lt.u32.totalorder %s3446_s25, %s3442_s18  ;;  %p3450_p6 = scmp.lt.u32.totalorder %s3442_s18, %s6707_s7 }
 0x247   : > { %p3444_p5 = pnand %p3443_p4, %p6770_p11 }
 0x248   : > { %p3449_p3 = por %p3448_p1, %p3447_p9 }
 0x249   : > { %p3445_p7 = pneg %p3444_p5 }
 0x24a   : > { %p3451_p12 = por %p3450_p6, %p3449_p3 }
 0x24c   : > { %p3452_p13 = pnand %p3451_p12, %p3445_p7 }
 0x24e   : > { %3455 = shalt.err (!%p3452_p13)
}
 0x24f   : > { %s3500_s30 = smov 8192   ;;  %s3501_s6 = smov 512  }
 0x250   : > { %3350 = dma.vmem_to_hbm [thread:$0]  (%p6770_p11), %s6709_s4, 131072, %s6707_s7, %s3241_s8, %s3500_s30, %s3500_s30, %s3501_s6  }
 0x251 PF: > { %s3270_s29 = sand.u32 1, %s3482_s11   ;;  %p6771_p8 = scmp.ne.s32.totalorder %s6768_s23, 0 }
 0x252   : > { %p6772_p10 = scmp.ge.s32.totalorder %s3494_s14, 2  ;;  %s3271_s21 = scalar_lea.sflag [#allocation5], %s3270_s29 }
 0x254   : > { %p3357_p0 = pnand %p6772_p10, %p6771_p8 }
 0x256   : > { %3477 = dma.done.wait (!%p3357_p0), %s3271_s21, 131072  }
 0x257   : > { %3479 = vsyncadd (!%p3357_p0), %s3271_s21, 4294836224  ;;  %p16_p2 = scmp.ge.s32.totalorder %s3545_s16, 4   ;;  %s6773_s11 = smov %s3486_s12 }
 0x258   : > { %s6774_s12 = smov %s3490_s13  ;;  %s6775_s13 = smov %s3557_s19 }
 0x259   : > { %s6776_s14 = smov %s3545_s16  ;;  %18 = sbr.rel (!%p16_p2) target bundleno = 7 (0x7), region = 73 }
 0x260   :  { %3276 = vsyncpa [#allocation4], 1 }
 0x261   :  { %3278 = vsyncpa [#allocation4 + $0x1], 1 }
 0x262   :  { %3279 = vsyncpa [#allocation5], 1 }
 0x263   :  { %3281 = vsyncpa [#allocation5 + $0x1], 1 }

</bundles_post_ra>
